<compile_context>
chip_gen: v7x
topology: tpu7x:2x2x1
jax: 0.10.0
libtpu: 0.0.40
codegen_flags: <defaults>
</compile_context>

<pallas_src>
import functools
import math

import jax
import jax.numpy as jnp
from jax import lax
from jax.experimental import pallas as pl
from jax.experimental.pallas import tpu as pltpu


_VMEM_LIMIT = 48 * 1024 * 1024  # fits v7x's 64 MiB physical VMEM with headroom


# ----------------------------- tile helpers -----------------------------

def _row_tile(M, pref=256):
    """Largest convenient row tile: prefer `pref`, else a power-of-two divisor, else M."""
    if M >= pref and M % pref == 0:
        return pref
    for t in (128, 64, 32, 16, 8):
        if t <= M and M % t == 0:
            return t
    return M


def _col_tile(N, pref=512):
    """Lane-dense column tile: 128-multiples when possible, else the full dim."""
    for t in (pref, 256, 128):
        if N >= t and N % t == 0:
            return t
    return N


# ----------------------------- in-kernel helpers -----------------------------

def _layer_norm(z, g, b, eps=1e-5):
    mean = jnp.mean(z, axis=-1, keepdims=True)
    var = jnp.mean((z - mean) ** 2, axis=-1, keepdims=True)
    return (z - mean) * lax.rsqrt(var + eps) * g + b


def _mha_core(xq, mem, bias, wq, bq, wk, bk, wv, bv, wo, bo,
              n_heads, head_dim, inv_scale):
    """Multi-head attention + output projection on a (tq, E) query tile.

    Per-head Dh-column slices (contract Dh, not E).  bf16 matmul operands,
    f32 accumulation, exact softmax.
    """
    f32, bf16 = jnp.float32, jnp.bfloat16
    xb = xq.astype(bf16)
    mb = mem.astype(bf16)

    q = (jnp.dot(xb, wq, preferred_element_type=f32) + bq).astype(bf16)   # (tq, E)
    k = (jnp.dot(mb, wk, preferred_element_type=f32) + bk).astype(bf16)   # (Tk, E)
    v = (jnp.dot(mb, wv, preferred_element_type=f32) + bv).astype(bf16)   # (Tk, E)

    dn = (((1,), (1,)), ((), ()))    # contract last dims directly (Q @ K^T, no transpose)
    ctx_heads = []
    for h in range(n_heads):         # static unroll over heads
        sl = slice(h * head_dim, (h + 1) * head_dim)
        s = lax.dot_general(q[:, sl], k[:, sl], dn, preferred_element_type=f32)
        s = s * inv_scale + bias
        s = s - jnp.max(s, axis=-1, keepdims=True)
        e = jnp.exp(s)
        p = e / jnp.sum(e, axis=-1, keepdims=True)                        # exact softmax
        ctx_heads.append(jnp.dot(p.astype(bf16), v[:, sl],
                                 preferred_element_type=f32))             # (tq, Dh)
    ctx = jnp.concatenate(ctx_heads, axis=-1)                             # (tq, E)
    return jnp.dot(ctx.astype(bf16), wo, preferred_element_type=f32) + bo


# ----------------------------- Pallas kernels -----------------------------

def _self_attn_ln_kernel(xq_ref, xkv_ref, bias_ref,
                         wq_ref, bq_ref, wk_ref, bk_ref, wv_ref, bv_ref,
                         wo_ref, bo_ref, g_ref, beta_ref, o_ref,
                         *, n_heads, head_dim, inv_scale):
    """LN(x + SelfAttn(x)) on a (tq, E) query tile (K/V = full target sequence)."""
    x = xq_ref[...]
    attn_out = _mha_core(x, xkv_ref[...], bias_ref[...],
                         wq_ref[...], bq_ref[...], wk_ref[...], bk_ref[...],
                         wv_ref[...], bv_ref[...], wo_ref[...], bo_ref[...],
                         n_heads, head_dim, inv_scale)
    o_ref[...] = _layer_norm(x + attn_out, g_ref[...], beta_ref[...])


def _cross_attn_ffn_ln_kernel(xq_ref, mem_ref, bias_ref,
                              wq_ref, bq_ref, wk_ref, bk_ref, wv_ref, bv_ref,
                              wo_ref, bo_ref, g2_ref, beta2_ref,
                              w1_ref, fb1_ref, w2_ref, fb2_ref, g3_ref, beta3_ref,
                              o_ref, *, n_heads, head_dim, inv_scale):
    """LN3( LN2(x + CrossAttn(x, mem)) + FFN(LN2(...)) ) on a (tq, E) query tile."""
    f32, bf16 = jnp.float32, jnp.bfloat16
    x = xq_ref[...]
    attn_out = _mha_core(x, mem_ref[...], bias_ref[...],
                         wq_ref[...], bq_ref[...], wk_ref[...], bk_ref[...],
                         wv_ref[...], bv_ref[...], wo_ref[...], bo_ref[...],
                         n_heads, head_dim, inv_scale)
    z = _layer_norm(x + attn_out, g2_ref[...], beta2_ref[...])            # (tq, E)
    h = jnp.dot(z.astype(bf16), w1_ref[...], preferred_element_type=f32) + fb1_ref[...]
    h = jnp.maximum(h, 0.0)
    f = jnp.dot(h.astype(bf16), w2_ref[...], preferred_element_type=f32) + fb2_ref[...]
    o_ref[...] = _layer_norm(z + f, g3_ref[...], beta3_ref[...])


def _attn_probs_kernel(x_ref, mem_ref, bias_ref, wq_ref, bq_ref, wk_ref, bk_ref,
                       attn_ref, *, n_heads, head_dim, inv_scale):
    """softmax(Q K^T / scale + bias) per head -> (H, T, S).  Last layer only."""
    f32, bf16 = jnp.float32, jnp.bfloat16
    xb = x_ref[...].astype(bf16)
    mb = mem_ref[...].astype(bf16)
    q = (jnp.dot(xb, wq_ref[...], preferred_element_type=f32) + bq_ref[...]).astype(bf16)
    k = (jnp.dot(mb, wk_ref[...], preferred_element_type=f32) + bk_ref[...]).astype(bf16)
    bias = bias_ref[...]
    dn = (((1,), (1,)), ((), ()))
    for h in range(n_heads):
        sl = slice(h * head_dim, (h + 1) * head_dim)
        s = lax.dot_general(q[:, sl], k[:, sl], dn, preferred_element_type=f32)
        s = s * inv_scale + bias
        s = s - jnp.max(s, axis=-1, keepdims=True)
        e = jnp.exp(s)
        attn_ref[h, :, :] = e / jnp.sum(e, axis=-1, keepdims=True)


def _linear_kernel(x_ref, w_ref, b_ref, o_ref):
    o_ref[...] = jnp.dot(x_ref[...].astype(jnp.bfloat16), w_ref[...],
                         preferred_element_type=jnp.float32) + b_ref[...]


# ----------------------------- pallas_call wrappers -----------------------------

def fused_self_attn_ln(x, bias, p, ln_g, ln_b, n_heads):
    """x: (B, T, E), bias: (Bm, T, T) additive.  Returns LN(x + SelfAttn(x))."""
    B, T, E = x.shape
    Dh = E // n_heads
    Bm = bias.shape[0]
    tq = _row_tile(T)

    kernel = functools.partial(_self_attn_ln_kernel, n_heads=n_heads, head_dim=Dh,
                               inv_scale=1.0 / math.sqrt(Dh))
    w_spec = pl.BlockSpec((E, E), lambda b, t: (0, 0))
    r_spec = pl.BlockSpec((1, E), lambda b, t: (0, 0))
    bias_map = (lambda b, t: (b, t, 0)) if Bm > 1 else (lambda b, t: (0, t, 0))

    # TODO(synk): at long sequence lengths add an inner KV-tile loop (flash-style
    # online softmax) so the (tq, T) score block never exceeds v7x's VMEM budget.
    return pl.pallas_call(
        kernel,
        grid=(B, T // tq),
        out_shape=jax.ShapeDtypeStruct((B, T, E), jnp.float32),
        in_specs=[
            pl.BlockSpec((None, tq, E), lambda b, t: (b, t, 0)),   # query rows
            pl.BlockSpec((None, T, E), lambda b, t: (b, 0, 0)),    # full target (K/V)
            pl.BlockSpec((None, tq, T), bias_map),                 # additive bias
            w_spec, r_spec, w_spec, r_spec, w_spec, r_spec, w_spec, r_spec,
            r_spec, r_spec,                                        # LN gamma, beta
        ],
        out_specs=pl.BlockSpec((None, tq, E), lambda b, t: (b, t, 0)),
        compiler_params=pltpu.CompilerParams(
            dimension_semantics=("parallel", "parallel"),
            vmem_limit_bytes=_VMEM_LIMIT),
    )(x, x, bias, p["wq"], p["bq"], p["wk"], p["bk"], p["wv"], p["bv"],
      p["wo"], p["bo"], ln_g, ln_b)


def fused_cross_attn_ffn_ln(x, mem, bias, p, g2, b2, w1, fb1, w2, fb2, g3, b3, n_heads):
    """Cross-attention + LN2 + FFN + LN3, all in one call gridded over (B, T tiles)."""
    B, T, E = x.shape
    S = mem.shape[1]
    Hd = w1.shape[1]
    Dh = E // n_heads
    Bm = bias.shape[0]
    tq = _row_tile(T)

    kernel = functools.partial(_cross_attn_ffn_ln_kernel, n_heads=n_heads, head_dim=Dh,
                               inv_scale=1.0 / math.sqrt(Dh))
    w_spec = pl.BlockSpec((E, E), lambda b, t: (0, 0))
    r_spec = pl.BlockSpec((1, E), lambda b, t: (0, 0))
    bias_map = (lambda b, t: (b, t, 0)) if Bm > 1 else (lambda b, t: (0, t, 0))

    return pl.pallas_call(
        kernel,
        grid=(B, T // tq),
        out_shape=jax.ShapeDtypeStruct((B, T, E), jnp.float32),
        in_specs=[
            pl.BlockSpec((None, tq, E), lambda b, t: (b, t, 0)),   # query rows
            pl.BlockSpec((None, S, E), lambda b, t: (b, 0, 0)),    # encoder memory
            pl.BlockSpec((None, tq, S), bias_map),                 # additive bias
            w_spec, r_spec, w_spec, r_spec, w_spec, r_spec, w_spec, r_spec,
            r_spec, r_spec,                                        # LN2
            pl.BlockSpec((E, Hd), lambda b, t: (0, 0)),
            pl.BlockSpec((1, Hd), lambda b, t: (0, 0)),
            pl.BlockSpec((Hd, E), lambda b, t: (0, 0)),
            r_spec,
            r_spec, r_spec,                                        # LN3
        ],
        out_specs=pl.BlockSpec((None, tq, E), lambda b, t: (b, t, 0)),
        compiler_params=pltpu.CompilerParams(
            dimension_semantics=("parallel", "parallel"),
            vmem_limit_bytes=_VMEM_LIMIT),
    )(x, mem, bias, p["wq"], p["bq"], p["wk"], p["bk"], p["wv"], p["bv"],
      p["wo"], p["bo"], g2, b2, w1, fb1, w2, fb2, g3, b3)


def attention_probs(x, mem, bias, p, n_heads):
    """Recompute softmax probs for the last layer's cross-attention (output only)."""
    B, T, E = x.shape
    S = mem.shape[1]
    Dh = E // n_heads
    Bm = bias.shape[0]
    kernel = functools.partial(_attn_probs_kernel, n_heads=n_heads, head_dim=Dh,
                               inv_scale=1.0 / math.sqrt(Dh))
    w_spec = pl.BlockSpec((E, E), lambda b: (0, 0))
    r_spec = pl.BlockSpec((1, E), lambda b: (0, 0))
    bias_map = (lambda b: (b, 0, 0)) if Bm > 1 else (lambda b: (0, 0, 0))
    return pl.pallas_call(
        kernel,
        grid=(B,),
        out_shape=jax.ShapeDtypeStruct((B, n_heads, T, S), jnp.float32),
        in_specs=[pl.BlockSpec((None, T, E), lambda b: (b, 0, 0)),
                  pl.BlockSpec((None, S, E), lambda b: (b, 0, 0)),
                  pl.BlockSpec((None, T, S), bias_map),
                  w_spec, r_spec, w_spec, r_spec],
        out_specs=pl.BlockSpec((None, n_heads, T, S), lambda b: (b, 0, 0, 0)),
        compiler_params=pltpu.CompilerParams(
            dimension_semantics=("parallel",),
            vmem_limit_bytes=_VMEM_LIMIT),
    )(x, mem, bias, p["wq"], p["bq"], p["wk"], p["bk"])


def linear_tiled(x2d, w, b):
    """y = x @ w + b with w already (in, out) bf16; tiled over rows and lane-dense cols."""
    M, K = x2d.shape
    N = w.shape[1]
    tm = _row_tile(M, pref=256)
    tn = _col_tile(N, pref=512)
    # TODO(synk): at large K (real embedding dims) add a K grid axis marked "arbitrary"
    # with an f32 VMEM accumulator (pl.when init/finalize) instead of full-K blocks.
    return pl.pallas_call(
        _linear_kernel,
        grid=(M // tm, N // tn),
        out_shape=jax.ShapeDtypeStruct((M, N), jnp.float32),
        in_specs=[pl.BlockSpec((tm, K), lambda i, j: (i, 0)),
                  pl.BlockSpec((K, tn), lambda i, j: (0, j)),
                  pl.BlockSpec((1, tn), lambda i, j: (0, j))],
        out_specs=pl.BlockSpec((tm, tn), lambda i, j: (i, j)),
        compiler_params=pltpu.CompilerParams(
            dimension_semantics=("parallel", "parallel"),
            vmem_limit_bytes=_VMEM_LIMIT),
    )(x2d, w, b)


# ----------------------------- model -----------------------------

def _mask_to_bias(mask, T, Tk):
    """Convert a 0/1 mask (b, 1, t, tk)-broadcastable to additive bias (b_or_1, T, Tk)."""
    Bm = mask.shape[0]
    bias = jnp.where(jnp.broadcast_to(mask, (Bm, 1, T, Tk)) == 0,
                     jnp.float32(-1e10), jnp.float32(0.0))
    return bias.reshape(Bm, T, Tk)


def decoder_layer(lp, trg, enc, trg_bias, src_bias, n_heads, return_attn):
    trg = fused_self_attn_ln(trg, trg_bias, lp["self_attn"],
                             lp["ln1_g"], lp["ln1_b"], n_heads)
    attn = None
    if return_attn:
        # Probs of the cross-attention consumed below (same Q/K path), output-only call.
        attn = attention_probs(trg, enc, src_bias, lp["enc_attn"], n_heads)
    trg = fused_cross_attn_ffn_ln(trg, enc, src_bias, lp["enc_attn"],
                                  lp["ln2_g"], lp["ln2_b"],
                                  lp["fc1_w"], lp["fc1_b"], lp["fc2_w"], lp["fc2_b"],
                                  lp["ln3_g"], lp["ln3_b"], n_heads)
    return trg, attn


def decoder_forward(params, target, encoder_src, target_mask, src_mask, n_heads):
    B, T = target.shape
    S = encoder_src.shape[1]
    E = params["word_emb"].shape[1]

    # TODO(synk): embedding gather kept in plain JAX glue (data-dependent gather).
    we = params["word_emb"][target]                       # (B, T, E)
    pe = params["pos_emb"][:T][None, :, :]                # (1, T, E)
    trg = we * jnp.float32(math.sqrt(E)) + pe             # dropout = identity (eval)

    # Additive mask biases, built once.  Batch dim kept at 1 when the mask is shared
    # across the batch (e.g. causal mask) -> no per-batch replication / DMA traffic.
    trg_bias = _mask_to_bias(target_mask, T, T)
    src_bias = _mask_to_bias(src_mask, T, S)

    attention = None
    n_layers = len(params["layers"])
    for li, lp in enumerate(params["layers"]):
        trg, attn = decoder_layer(lp, trg, encoder_src, trg_bias, src_bias,
                                  n_heads, return_attn=(li == n_layers - 1))
        if attn is not None:
            attention = attn

    out = linear_tiled(trg.reshape(B * T, E), params["out_w"],
                       params["out_b"]).reshape(B, T, -1)
    return out, attention


# ----------------------------- deterministic init -----------------------------

def init_params(key, vocab, E, n_layers, n_heads, hidden, max_length=100):
    keys = iter(jax.random.split(key, 16 + n_layers * 64))

    def lin(out_f, in_f):
        # torch nn.Linear-style init, then pre-transpose to (in, out) bf16 once.
        bound = 1.0 / math.sqrt(in_f)
        w = jax.random.uniform(next(keys), (out_f, in_f), jnp.float32, -bound, bound)
        b = jax.random.uniform(next(keys), (out_f,), jnp.float32, -bound, bound)
        return w.T.astype(jnp.bfloat16), b.reshape(1, out_f)

    def mha():
        p = {}
        p["wq"], p["bq"] = lin(E, E)
        p["wk"], p["bk"] = lin(E, E)
        p["wv"], p["bv"] = lin(E, E)
        p["wo"], p["bo"] = lin(E, E)
        return p

    params = {
        "word_emb": jax.random.normal(next(keys), (vocab, E), jnp.float32),
        "pos_emb": jax.random.normal(next(keys), (max_length, E), jnp.float32),
        "layers": [],
    }
    for _ in range(n_layers):
        lp = {
            "self_attn": mha(),
            "enc_attn": mha(),
            "ln1_g": jnp.ones((1, E), jnp.float32), "ln1_b": jnp.zeros((1, E), jnp.float32),
            "ln2_g": jnp.ones((1, E), jnp.float32), "ln2_b": jnp.zeros((1, E), jnp.float32),
            "ln3_g": jnp.ones((1, E), jnp.float32), "ln3_b": jnp.zeros((1, E), jnp.float32),
        }
        lp["fc1_w"], lp["fc1_b"] = lin(hidden, E)
        lp["fc2_w"], lp["fc2_b"] = lin(E, hidden)
        params["layers"].append(lp)
    params["out_w"], params["out_b"] = lin(vocab, E)
    return params


# ----------------------------- main -----------------------------

if __name__ == "__main__":
    VOCAB, E, N_LAYERS, N_HEADS, HIDDEN = 50, 32, 2, 4, 64
    B, T, S = 2, 8, 10

    root = jax.random.PRNGKey(0)
    kp, kt, ke = jax.random.split(root, 3)

    params = init_params(kp, VOCAB, E, N_LAYERS, N_HEADS, HIDDEN)

    target = jax.random.randint(kt, (B, T), 0, VOCAB, dtype=jnp.int32)
    encoder_src = jax.random.normal(ke, (B, S, E), jnp.float32)
    # Causal target mask shared across batch -> keep batch dim 1 (no replication).
    target_mask = jnp.tril(jnp.ones((T, T), jnp.float32))[None, None, :, :]   # (1,1,T,T)
    src_mask = jnp.ones((B, 1, 1, S), jnp.float32)                            # (B,1,1,S)

    fwd = jax.jit(functools.partial(decoder_forward, n_heads=N_HEADS))
    output, attention = fwd(params, target, encoder_src, target_mask, src_mask)
    output = jax.block_until_ready(output)
    attention = jax.block_until_ready(attention)

    assert output.shape == (B, T, VOCAB)
    assert attention.shape == (B, N_HEADS, T, S)
    print("KERNEL_OK")
</pallas_src>

<mosaic_0001>
module attributes {stable_mosaic.version = 11 : i64} {
  func.func @_cross_attn_ffn_ln_kernel(%arg0: i32, %arg1: i32, %arg2: memref<1x8x32xf32, #tpu.memory_space<vmem>>, %arg3: memref<1x10x32xf32, #tpu.memory_space<vmem>>, %arg4: memref<1x8x10xf32, #tpu.memory_space<vmem>>, %arg5: memref<32x32xbf16, #tpu.memory_space<vmem>>, %arg6: memref<1x32xf32, #tpu.memory_space<vmem>>, %arg7: memref<32x32xbf16, #tpu.memory_space<vmem>>, %arg8: memref<1x32xf32, #tpu.memory_space<vmem>>, %arg9: memref<32x32xbf16, #tpu.memory_space<vmem>>, %arg10: memref<1x32xf32, #tpu.memory_space<vmem>>, %arg11: memref<32x32xbf16, #tpu.memory_space<vmem>>, %arg12: memref<1x32xf32, #tpu.memory_space<vmem>>, %arg13: memref<1x32xf32, #tpu.memory_space<vmem>>, %arg14: memref<1x32xf32, #tpu.memory_space<vmem>>, %arg15: memref<32x64xbf16, #tpu.memory_space<vmem>>, %arg16: memref<1x64xf32, #tpu.memory_space<vmem>>, %arg17: memref<64x32xbf16, #tpu.memory_space<vmem>>, %arg18: memref<1x32xf32, #tpu.memory_space<vmem>>, %arg19: memref<1x32xf32, #tpu.memory_space<vmem>>, %arg20: memref<1x32xf32, #tpu.memory_space<vmem>>, %arg21: memref<1x8x32xf32, #tpu.memory_space<vmem>>) attributes {dimension_semantics = [#tpu.dimension_semantics<parallel>, #tpu.dimension_semantics<parallel>], iteration_bounds = array<i64: 2, 1>, scalar_prefetch = 0 : i64, scratch_operands = 0 : i64, tpu.core_type = #tpu.core_type<tc>, window_params = [{transform_indices = @transform_0, window_bounds = array<i64: 1, 8, 32>}, {transform_indices = @transform_1, window_bounds = array<i64: 1, 10, 32>}, {transform_indices = @transform_2, window_bounds = array<i64: 1, 8, 10>}, {pipeline_mode = #tpu.pipeline_mode<synchronous>, transform_indices = @transform_3, window_bounds = array<i64: 32, 32>}, {pipeline_mode = #tpu.pipeline_mode<synchronous>, transform_indices = @transform_4, window_bounds = array<i64: 1, 32>}, {pipeline_mode = #tpu.pipeline_mode<synchronous>, transform_indices = @transform_5, window_bounds = array<i64: 32, 32>}, {pipeline_mode = #tpu.pipeline_mode<synchronous>, transform_indices = @transform_6, window_bounds = array<i64: 1, 32>}, {pipeline_mode = #tpu.pipeline_mode<synchronous>, transform_indices = @transform_7, window_bounds = array<i64: 32, 32>}, {pipeline_mode = #tpu.pipeline_mode<synchronous>, transform_indices = @transform_8, window_bounds = array<i64: 1, 32>}, {pipeline_mode = #tpu.pipeline_mode<synchronous>, transform_indices = @transform_9, window_bounds = array<i64: 32, 32>}, {pipeline_mode = #tpu.pipeline_mode<synchronous>, transform_indices = @transform_10, window_bounds = array<i64: 1, 32>}, {pipeline_mode = #tpu.pipeline_mode<synchronous>, transform_indices = @transform_11, window_bounds = array<i64: 1, 32>}, {pipeline_mode = #tpu.pipeline_mode<synchronous>, transform_indices = @transform_12, window_bounds = array<i64: 1, 32>}, {pipeline_mode = #tpu.pipeline_mode<synchronous>, transform_indices = @transform_13, window_bounds = array<i64: 32, 64>}, {pipeline_mode = #tpu.pipeline_mode<synchronous>, transform_indices = @transform_14, window_bounds = array<i64: 1, 64>}, {pipeline_mode = #tpu.pipeline_mode<synchronous>, transform_indices = @transform_15, window_bounds = array<i64: 64, 32>}, {pipeline_mode = #tpu.pipeline_mode<synchronous>, transform_indices = @transform_16, window_bounds = array<i64: 1, 32>}, {pipeline_mode = #tpu.pipeline_mode<synchronous>, transform_indices = @transform_17, window_bounds = array<i64: 1, 32>}, {pipeline_mode = #tpu.pipeline_mode<synchronous>, transform_indices = @transform_18, window_bounds = array<i64: 1, 32>}, {transform_indices = @transform_19, window_bounds = array<i64: 1, 8, 32>}]} {
    %c0 = arith.constant 0 : index
    %c0_0 = arith.constant 0 : index
    %c0_1 = arith.constant 0 : index
    %0 = vector.load %arg2[%c0, %c0_0, %c0_1] : memref<1x8x32xf32, #tpu.memory_space<vmem>>, vector<1x8x32xf32>
    %1 = vector.shape_cast %0 : vector<1x8x32xf32> to vector<8x32xf32>
    %c0_2 = arith.constant 0 : index
    %c0_3 = arith.constant 0 : index
    %c0_4 = arith.constant 0 : index
    %2 = vector.load %arg3[%c0_2, %c0_3, %c0_4] : memref<1x10x32xf32, #tpu.memory_space<vmem>>, vector<1x10x32xf32>
    %3 = vector.shape_cast %2 : vector<1x10x32xf32> to vector<10x32xf32>
    %c0_5 = arith.constant 0 : index
    %c0_6 = arith.constant 0 : index
    %c0_7 = arith.constant 0 : index
    %4 = vector.load %arg4[%c0_5, %c0_6, %c0_7] : memref<1x8x10xf32, #tpu.memory_space<vmem>>, vector<1x8x10xf32>
    %5 = vector.shape_cast %4 : vector<1x8x10xf32> to vector<8x10xf32>
    %c0_8 = arith.constant 0 : index
    %c0_9 = arith.constant 0 : index
    %6 = vector.load %arg5[%c0_8, %c0_9] : memref<32x32xbf16, #tpu.memory_space<vmem>>, vector<32x32xbf16>
    %c0_10 = arith.constant 0 : index
    %c0_11 = arith.constant 0 : index
    %7 = vector.load %arg6[%c0_10, %c0_11] : memref<1x32xf32, #tpu.memory_space<vmem>>, vector<1x32xf32>
    %c0_12 = arith.constant 0 : index
    %c0_13 = arith.constant 0 : index
    %8 = vector.load %arg7[%c0_12, %c0_13] : memref<32x32xbf16, #tpu.memory_space<vmem>>, vector<32x32xbf16>
    %c0_14 = arith.constant 0 : index
    %c0_15 = arith.constant 0 : index
    %9 = vector.load %arg8[%c0_14, %c0_15] : memref<1x32xf32, #tpu.memory_space<vmem>>, vector<1x32xf32>
    %c0_16 = arith.constant 0 : index
    %c0_17 = arith.constant 0 : index
    %10 = vector.load %arg9[%c0_16, %c0_17] : memref<32x32xbf16, #tpu.memory_space<vmem>>, vector<32x32xbf16>
    %c0_18 = arith.constant 0 : index
    %c0_19 = arith.constant 0 : index
    %11 = vector.load %arg10[%c0_18, %c0_19] : memref<1x32xf32, #tpu.memory_space<vmem>>, vector<1x32xf32>
    %c0_20 = arith.constant 0 : index
    %c0_21 = arith.constant 0 : index
    %12 = vector.load %arg11[%c0_20, %c0_21] : memref<32x32xbf16, #tpu.memory_space<vmem>>, vector<32x32xbf16>
    %c0_22 = arith.constant 0 : index
    %c0_23 = arith.constant 0 : index
    %13 = vector.load %arg12[%c0_22, %c0_23] : memref<1x32xf32, #tpu.memory_space<vmem>>, vector<1x32xf32>
    %14 = arith.truncf %1 : vector<8x32xf32> to vector<8x32xbf16>
    %15 = arith.truncf %3 : vector<10x32xf32> to vector<10x32xbf16>
    %cst = arith.constant dense<0.000000e+00> : vector<8x32xf32>
    %16 = tpu.matmul %14, %6, %cst {dimension_numbers = #tpu.dot_dimension_numbers<[1], [0], [0], [1], [0, 0, 1, 1], [], []>} : vector<8x32xbf16>, vector<32x32xbf16>, vector<8x32xf32> -> vector<8x32xf32>
    %17 = vector.broadcast %7 : vector<1x32xf32> to vector<8x32xf32>
    %18 = arith.addf %16, %17 : vector<8x32xf32>
    %19 = arith.truncf %18 : vector<8x32xf32> to vector<8x32xbf16>
    %cst_24 = arith.constant dense<0.000000e+00> : vector<10x32xf32>
    %20 = tpu.matmul %15, %8, %cst_24 {dimension_numbers = #tpu.dot_dimension_numbers<[1], [0], [0], [1], [0, 0, 1, 1], [], []>} : vector<10x32xbf16>, vector<32x32xbf16>, vector<10x32xf32> -> vector<10x32xf32>
    %21 = vector.broadcast %9 : vector<1x32xf32> to vector<10x32xf32>
    %22 = arith.addf %20, %21 : vector<10x32xf32>
    %23 = arith.truncf %22 : vector<10x32xf32> to vector<10x32xbf16>
    %cst_25 = arith.constant dense<0.000000e+00> : vector<10x32xf32>
    %24 = tpu.matmul %15, %10, %cst_25 {dimension_numbers = #tpu.dot_dimension_numbers<[1], [0], [0], [1], [0, 0, 1, 1], [], []>} : vector<10x32xbf16>, vector<32x32xbf16>, vector<10x32xf32> -> vector<10x32xf32>
    %25 = vector.broadcast %11 : vector<1x32xf32> to vector<10x32xf32>
    %26 = arith.addf %24, %25 : vector<10x32xf32>
    %27 = arith.truncf %26 : vector<10x32xf32> to vector<10x32xbf16>
    %28 = vector.extract_strided_slice %19 {offsets = [0, 0], sizes = [8, 8], strides = [1, 1]} : vector<8x32xbf16> to vector<8x8xbf16>
    %29 = vector.extract_strided_slice %23 {offsets = [0, 0], sizes = [10, 8], strides = [1, 1]} : vector<10x32xbf16> to vector<10x8xbf16>
    %cst_26 = arith.constant dense<0.000000e+00> : vector<8x10xf32>
    %30 = tpu.matmul %28, %29, %cst_26 {dimension_numbers = #tpu.dot_dimension_numbers<[1], [1], [0], [0], [0, 0, 1, 0], [], []>} : vector<8x8xbf16>, vector<10x8xbf16>, vector<8x10xf32> -> vector<8x10xf32>
    %cst_27 = arith.constant 0.353553385 : f32
    %31 = vector.broadcast %cst_27 : f32 to vector<8x10xf32>
    %32 = arith.mulf %30, %31 : vector<8x10xf32>
    %33 = arith.addf %32, %5 : vector<8x10xf32>
    %cst_28 = arith.constant dense<0xFF800000> : vector<8xf32>
    %34 = vector.multi_reduction <maximumf>, %33, %cst_28 [1] : vector<8x10xf32> to vector<8xf32>
    %35 = vector.shape_cast %34 : vector<8xf32> to vector<8x1xf32>
    %36 = vector.broadcast %35 : vector<8x1xf32> to vector<8x10xf32>
    %37 = arith.subf %33, %36 : vector<8x10xf32>
    %38 = math.exp %37 : vector<8x10xf32>
    %cst_29 = arith.constant dense<0.000000e+00> : vector<8xf32>
    %39 = vector.multi_reduction <add>, %38, %cst_29 [1] : vector<8x10xf32> to vector<8xf32>
    %40 = vector.shape_cast %39 : vector<8xf32> to vector<8x1xf32>
    %41 = vector.broadcast %40 : vector<8x1xf32> to vector<8x10xf32>
    %42 = arith.divf %38, %41 : vector<8x10xf32>
    %43 = arith.truncf %42 : vector<8x10xf32> to vector<8x10xbf16>
    %44 = vector.extract_strided_slice %27 {offsets = [0, 0], sizes = [10, 8], strides = [1, 1]} : vector<10x32xbf16> to vector<10x8xbf16>
    %cst_30 = arith.constant dense<0.000000e+00> : vector<8x8xf32>
    %45 = tpu.matmul %43, %44, %cst_30 {dimension_numbers = #tpu.dot_dimension_numbers<[1], [0], [0], [1], [0, 0, 1, 1], [], []>} : vector<8x10xbf16>, vector<10x8xbf16>, vector<8x8xf32> -> vector<8x8xf32>
    %46 = vector.extract_strided_slice %19 {offsets = [0, 8], sizes = [8, 8], strides = [1, 1]} : vector<8x32xbf16> to vector<8x8xbf16>
    %47 = vector.extract_strided_slice %23 {offsets = [0, 8], sizes = [10, 8], strides = [1, 1]} : vector<10x32xbf16> to vector<10x8xbf16>
    %cst_31 = arith.constant dense<0.000000e+00> : vector<8x10xf32>
    %48 = tpu.matmul %46, %47, %cst_31 {dimension_numbers = #tpu.dot_dimension_numbers<[1], [1], [0], [0], [0, 0, 1, 0], [], []>} : vector<8x8xbf16>, vector<10x8xbf16>, vector<8x10xf32> -> vector<8x10xf32>
    %cst_32 = arith.constant 0.353553385 : f32
    %49 = vector.broadcast %cst_32 : f32 to vector<8x10xf32>
    %50 = arith.mulf %48, %49 : vector<8x10xf32>
    %51 = arith.addf %50, %5 : vector<8x10xf32>
    %cst_33 = arith.constant dense<0xFF800000> : vector<8xf32>
    %52 = vector.multi_reduction <maximumf>, %51, %cst_33 [1] : vector<8x10xf32> to vector<8xf32>
    %53 = vector.shape_cast %52 : vector<8xf32> to vector<8x1xf32>
    %54 = vector.broadcast %53 : vector<8x1xf32> to vector<8x10xf32>
    %55 = arith.subf %51, %54 : vector<8x10xf32>
    %56 = math.exp %55 : vector<8x10xf32>
    %cst_34 = arith.constant dense<0.000000e+00> : vector<8xf32>
    %57 = vector.multi_reduction <add>, %56, %cst_34 [1] : vector<8x10xf32> to vector<8xf32>
    %58 = vector.shape_cast %57 : vector<8xf32> to vector<8x1xf32>
    %59 = vector.broadcast %58 : vector<8x1xf32> to vector<8x10xf32>
    %60 = arith.divf %56, %59 : vector<8x10xf32>
    %61 = arith.truncf %60 : vector<8x10xf32> to vector<8x10xbf16>
    %62 = vector.extract_strided_slice %27 {offsets = [0, 8], sizes = [10, 8], strides = [1, 1]} : vector<10x32xbf16> to vector<10x8xbf16>
    %cst_35 = arith.constant dense<0.000000e+00> : vector<8x8xf32>
    %63 = tpu.matmul %61, %62, %cst_35 {dimension_numbers = #tpu.dot_dimension_numbers<[1], [0], [0], [1], [0, 0, 1, 1], [], []>} : vector<8x10xbf16>, vector<10x8xbf16>, vector<8x8xf32> -> vector<8x8xf32>
    %64 = vector.extract_strided_slice %19 {offsets = [0, 16], sizes = [8, 8], strides = [1, 1]} : vector<8x32xbf16> to vector<8x8xbf16>
    %65 = vector.extract_strided_slice %23 {offsets = [0, 16], sizes = [10, 8], strides = [1, 1]} : vector<10x32xbf16> to vector<10x8xbf16>
    %cst_36 = arith.constant dense<0.000000e+00> : vector<8x10xf32>
    %66 = tpu.matmul %64, %65, %cst_36 {dimension_numbers = #tpu.dot_dimension_numbers<[1], [1], [0], [0], [0, 0, 1, 0], [], []>} : vector<8x8xbf16>, vector<10x8xbf16>, vector<8x10xf32> -> vector<8x10xf32>
    %cst_37 = arith.constant 0.353553385 : f32
    %67 = vector.broadcast %cst_37 : f32 to vector<8x10xf32>
    %68 = arith.mulf %66, %67 : vector<8x10xf32>
    %69 = arith.addf %68, %5 : vector<8x10xf32>
    %cst_38 = arith.constant dense<0xFF800000> : vector<8xf32>
    %70 = vector.multi_reduction <maximumf>, %69, %cst_38 [1] : vector<8x10xf32> to vector<8xf32>
    %71 = vector.shape_cast %70 : vector<8xf32> to vector<8x1xf32>
    %72 = vector.broadcast %71 : vector<8x1xf32> to vector<8x10xf32>
    %73 = arith.subf %69, %72 : vector<8x10xf32>
    %74 = math.exp %73 : vector<8x10xf32>
    %cst_39 = arith.constant dense<0.000000e+00> : vector<8xf32>
    %75 = vector.multi_reduction <add>, %74, %cst_39 [1] : vector<8x10xf32> to vector<8xf32>
    %76 = vector.shape_cast %75 : vector<8xf32> to vector<8x1xf32>
    %77 = vector.broadcast %76 : vector<8x1xf32> to vector<8x10xf32>
    %78 = arith.divf %74, %77 : vector<8x10xf32>
    %79 = arith.truncf %78 : vector<8x10xf32> to vector<8x10xbf16>
    %80 = vector.extract_strided_slice %27 {offsets = [0, 16], sizes = [10, 8], strides = [1, 1]} : vector<10x32xbf16> to vector<10x8xbf16>
    %cst_40 = arith.constant dense<0.000000e+00> : vector<8x8xf32>
    %81 = tpu.matmul %79, %80, %cst_40 {dimension_numbers = #tpu.dot_dimension_numbers<[1], [0], [0], [1], [0, 0, 1, 1], [], []>} : vector<8x10xbf16>, vector<10x8xbf16>, vector<8x8xf32> -> vector<8x8xf32>
    %82 = vector.extract_strided_slice %19 {offsets = [0, 24], sizes = [8, 8], strides = [1, 1]} : vector<8x32xbf16> to vector<8x8xbf16>
    %83 = vector.extract_strided_slice %23 {offsets = [0, 24], sizes = [10, 8], strides = [1, 1]} : vector<10x32xbf16> to vector<10x8xbf16>
    %cst_41 = arith.constant dense<0.000000e+00> : vector<8x10xf32>
    %84 = tpu.matmul %82, %83, %cst_41 {dimension_numbers = #tpu.dot_dimension_numbers<[1], [1], [0], [0], [0, 0, 1, 0], [], []>} : vector<8x8xbf16>, vector<10x8xbf16>, vector<8x10xf32> -> vector<8x10xf32>
    %cst_42 = arith.constant 0.353553385 : f32
    %85 = vector.broadcast %cst_42 : f32 to vector<8x10xf32>
    %86 = arith.mulf %84, %85 : vector<8x10xf32>
    %87 = arith.addf %86, %5 : vector<8x10xf32>
    %cst_43 = arith.constant dense<0xFF800000> : vector<8xf32>
    %88 = vector.multi_reduction <maximumf>, %87, %cst_43 [1] : vector<8x10xf32> to vector<8xf32>
    %89 = vector.shape_cast %88 : vector<8xf32> to vector<8x1xf32>
    %90 = vector.broadcast %89 : vector<8x1xf32> to vector<8x10xf32>
    %91 = arith.subf %87, %90 : vector<8x10xf32>
    %92 = math.exp %91 : vector<8x10xf32>
    %cst_44 = arith.constant dense<0.000000e+00> : vector<8xf32>
    %93 = vector.multi_reduction <add>, %92, %cst_44 [1] : vector<8x10xf32> to vector<8xf32>
    %94 = vector.shape_cast %93 : vector<8xf32> to vector<8x1xf32>
    %95 = vector.broadcast %94 : vector<8x1xf32> to vector<8x10xf32>
    %96 = arith.divf %92, %95 : vector<8x10xf32>
    %97 = arith.truncf %96 : vector<8x10xf32> to vector<8x10xbf16>
    %98 = vector.extract_strided_slice %27 {offsets = [0, 24], sizes = [10, 8], strides = [1, 1]} : vector<10x32xbf16> to vector<10x8xbf16>
    %cst_45 = arith.constant dense<0.000000e+00> : vector<8x8xf32>
    %99 = tpu.matmul %97, %98, %cst_45 {dimension_numbers = #tpu.dot_dimension_numbers<[1], [0], [0], [1], [0, 0, 1, 1], [], []>} : vector<8x10xbf16>, vector<10x8xbf16>, vector<8x8xf32> -> vector<8x8xf32>
    %100 = tpu.concatenate %45, %63, %81, %99 in 1 : vector<8x8xf32>, vector<8x8xf32>, vector<8x8xf32>, vector<8x8xf32> -> vector<8x32xf32>
    %101 = arith.truncf %100 : vector<8x32xf32> to vector<8x32xbf16>
    %cst_46 = arith.constant dense<0.000000e+00> : vector<8x32xf32>
    %102 = tpu.matmul %101, %12, %cst_46 {dimension_numbers = #tpu.dot_dimension_numbers<[1], [0], [0], [1], [0, 0, 1, 1], [], []>} : vector<8x32xbf16>, vector<32x32xbf16>, vector<8x32xf32> -> vector<8x32xf32>
    %103 = vector.broadcast %13 : vector<1x32xf32> to vector<8x32xf32>
    %104 = arith.addf %102, %103 : vector<8x32xf32>
    %105 = arith.addf %1, %104 : vector<8x32xf32>
    %c0_47 = arith.constant 0 : index
    %c0_48 = arith.constant 0 : index
    %106 = vector.load %arg13[%c0_47, %c0_48] : memref<1x32xf32, #tpu.memory_space<vmem>>, vector<1x32xf32>
    %c0_49 = arith.constant 0 : index
    %c0_50 = arith.constant 0 : index
    %107 = vector.load %arg14[%c0_49, %c0_50] : memref<1x32xf32, #tpu.memory_space<vmem>>, vector<1x32xf32>
    %cst_51 = arith.constant dense<0.000000e+00> : vector<8xf32>
    %108 = vector.multi_reduction <add>, %105, %cst_51 [1] : vector<8x32xf32> to vector<8xf32>
    %109 = vector.shape_cast %108 : vector<8xf32> to vector<8x1xf32>
    %cst_52 = arith.constant 3.200000e+01 : f32
    %110 = vector.broadcast %cst_52 : f32 to vector<8x1xf32>
    %111 = arith.divf %109, %110 : vector<8x1xf32>
    %112 = vector.broadcast %111 : vector<8x1xf32> to vector<8x32xf32>
    %113 = arith.subf %105, %112 : vector<8x32xf32>
    %114 = arith.mulf %113, %113 : vector<8x32xf32>
    %cst_53 = arith.constant dense<0.000000e+00> : vector<8xf32>
    %115 = vector.multi_reduction <add>, %114, %cst_53 [1] : vector<8x32xf32> to vector<8xf32>
    %116 = vector.shape_cast %115 : vector<8xf32> to vector<8x1xf32>
    %cst_54 = arith.constant 3.200000e+01 : f32
    %117 = vector.broadcast %cst_54 : f32 to vector<8x1xf32>
    %118 = arith.divf %116, %117 : vector<8x1xf32>
    %119 = vector.broadcast %111 : vector<8x1xf32> to vector<8x32xf32>
    %120 = arith.subf %105, %119 : vector<8x32xf32>
    %cst_55 = arith.constant 9.99999974E-6 : f32
    %121 = vector.broadcast %cst_55 : f32 to vector<8x1xf32>
    %122 = arith.addf %118, %121 : vector<8x1xf32>
    %123 = math.rsqrt %122 : vector<8x1xf32>
    %124 = vector.broadcast %123 : vector<8x1xf32> to vector<8x32xf32>
    %125 = arith.mulf %120, %124 : vector<8x32xf32>
    %126 = vector.broadcast %106 : vector<1x32xf32> to vector<8x32xf32>
    %127 = arith.mulf %125, %126 : vector<8x32xf32>
    %128 = vector.broadcast %107 : vector<1x32xf32> to vector<8x32xf32>
    %129 = arith.addf %127, %128 : vector<8x32xf32>
    %130 = arith.truncf %129 : vector<8x32xf32> to vector<8x32xbf16>
    %c0_56 = arith.constant 0 : index
    %c0_57 = arith.constant 0 : index
    %131 = vector.load %arg15[%c0_56, %c0_57] : memref<32x64xbf16, #tpu.memory_space<vmem>>, vector<32x64xbf16>
    %cst_58 = arith.constant dense<0.000000e+00> : vector<8x64xf32>
    %132 = tpu.matmul %130, %131, %cst_58 {dimension_numbers = #tpu.dot_dimension_numbers<[1], [0], [0], [1], [0, 0, 1, 1], [], []>} : vector<8x32xbf16>, vector<32x64xbf16>, vector<8x64xf32> -> vector<8x64xf32>
    %c0_59 = arith.constant 0 : index
    %c0_60 = arith.constant 0 : index
    %133 = vector.load %arg16[%c0_59, %c0_60] : memref<1x64xf32, #tpu.memory_space<vmem>>, vector<1x64xf32>
    %134 = vector.broadcast %133 : vector<1x64xf32> to vector<8x64xf32>
    %135 = arith.addf %132, %134 : vector<8x64xf32>
    %cst_61 = arith.constant 0.000000e+00 : f32
    %136 = vector.broadcast %cst_61 : f32 to vector<8x64xf32>
    %137 = arith.maximumf %135, %136 : vector<8x64xf32>
    %138 = arith.truncf %137 : vector<8x64xf32> to vector<8x64xbf16>
    %c0_62 = arith.constant 0 : index
    %c0_63 = arith.constant 0 : index
    %139 = vector.load %arg17[%c0_62, %c0_63] : memref<64x32xbf16, #tpu.memory_space<vmem>>, vector<64x32xbf16>
    %cst_64 = arith.constant dense<0.000000e+00> : vector<8x32xf32>
    %140 = tpu.matmul %138, %139, %cst_64 {dimension_numbers = #tpu.dot_dimension_numbers<[1], [0], [0], [1], [0, 0, 1, 1], [], []>} : vector<8x64xbf16>, vector<64x32xbf16>, vector<8x32xf32> -> vector<8x32xf32>
    %c0_65 = arith.constant 0 : index
    %c0_66 = arith.constant 0 : index
    %141 = vector.load %arg18[%c0_65, %c0_66] : memref<1x32xf32, #tpu.memory_space<vmem>>, vector<1x32xf32>
    %142 = vector.broadcast %141 : vector<1x32xf32> to vector<8x32xf32>
    %143 = arith.addf %140, %142 : vector<8x32xf32>
    %144 = arith.addf %129, %143 : vector<8x32xf32>
    %c0_67 = arith.constant 0 : index
    %c0_68 = arith.constant 0 : index
    %145 = vector.load %arg19[%c0_67, %c0_68] : memref<1x32xf32, #tpu.memory_space<vmem>>, vector<1x32xf32>
    %c0_69 = arith.constant 0 : index
    %c0_70 = arith.constant 0 : index
    %146 = vector.load %arg20[%c0_69, %c0_70] : memref<1x32xf32, #tpu.memory_space<vmem>>, vector<1x32xf32>
    %cst_71 = arith.constant dense<0.000000e+00> : vector<8xf32>
    %147 = vector.multi_reduction <add>, %144, %cst_71 [1] : vector<8x32xf32> to vector<8xf32>
    %148 = vector.shape_cast %147 : vector<8xf32> to vector<8x1xf32>
    %cst_72 = arith.constant 3.200000e+01 : f32
    %149 = vector.broadcast %cst_72 : f32 to vector<8x1xf32>
    %150 = arith.divf %148, %149 : vector<8x1xf32>
    %151 = vector.broadcast %150 : vector<8x1xf32> to vector<8x32xf32>
    %152 = arith.subf %144, %151 : vector<8x32xf32>
    %153 = arith.mulf %152, %152 : vector<8x32xf32>
    %cst_73 = arith.constant dense<0.000000e+00> : vector<8xf32>
    %154 = vector.multi_reduction <add>, %153, %cst_73 [1] : vector<8x32xf32> to vector<8xf32>
    %155 = vector.shape_cast %154 : vector<8xf32> to vector<8x1xf32>
    %cst_74 = arith.constant 3.200000e+01 : f32
    %156 = vector.broadcast %cst_74 : f32 to vector<8x1xf32>
    %157 = arith.divf %155, %156 : vector<8x1xf32>
    %158 = vector.broadcast %150 : vector<8x1xf32> to vector<8x32xf32>
    %159 = arith.subf %144, %158 : vector<8x32xf32>
    %cst_75 = arith.constant 9.99999974E-6 : f32
    %160 = vector.broadcast %cst_75 : f32 to vector<8x1xf32>
    %161 = arith.addf %157, %160 : vector<8x1xf32>
    %162 = math.rsqrt %161 : vector<8x1xf32>
    %163 = vector.broadcast %162 : vector<8x1xf32> to vector<8x32xf32>
    %164 = arith.mulf %159, %163 : vector<8x32xf32>
    %165 = vector.broadcast %145 : vector<1x32xf32> to vector<8x32xf32>
    %166 = arith.mulf %164, %165 : vector<8x32xf32>
    %167 = vector.broadcast %146 : vector<1x32xf32> to vector<8x32xf32>
    %168 = arith.addf %166, %167 : vector<8x32xf32>
    %c0_76 = arith.constant 0 : index
    %c0_77 = arith.constant 0 : index
    %c0_78 = arith.constant 0 : index
    %169 = vector.load %arg21[%c0_76, %c0_77, %c0_78] : memref<1x8x32xf32, #tpu.memory_space<vmem>>, vector<1x8x32xf32>
    %170 = vector.shape_cast %169 : vector<1x8x32xf32> to vector<8x32xf32>
    %171 = vector.shape_cast %168 : vector<8x32xf32> to vector<1x8x32xf32>
    tpu.vector_store %arg21[%c0_76, %c0_77, %c0_78], %171 {strides = array<i32>} : memref<1x8x32xf32, #tpu.memory_space<vmem>>, vector<1x8x32xf32>,
    return
  }
  func.func @transform_0(%arg0: i32, %arg1: i32) -> (i32, i32, i32) {
    %c0_i32 = arith.constant 0 : i32
    %c0_i32_0 = arith.constant 0 : i32
    return %arg0, %arg1, %c0_i32 : i32, i32, i32
  }
  func.func @transform_1(%arg0: i32, %arg1: i32) -> (i32, i32, i32) {
    %c0_i32 = arith.constant 0 : i32
    %c0_i32_0 = arith.constant 0 : i32
    %c0_i32_1 = arith.constant 0 : i32
    return %arg0, %c0_i32, %c0_i32_0 : i32, i32, i32
  }
  func.func @transform_2(%arg0: i32, %arg1: i32) -> (i32, i32, i32) {
    %c0_i32 = arith.constant 0 : i32
    %c0_i32_0 = arith.constant 0 : i32
    return %arg0, %arg1, %c0_i32 : i32, i32, i32
  }
  func.func @transform_3(%arg0: i32, %arg1: i32) -> (i32, i32) {
    %c0_i32 = arith.constant 0 : i32
    %c0_i32_0 = arith.constant 0 : i32
    %c0_i32_1 = arith.constant 0 : i32
    return %c0_i32, %c0_i32_0 : i32, i32
  }
  func.func @transform_4(%arg0: i32, %arg1: i32) -> (i32, i32) {
    %c0_i32 = arith.constant 0 : i32
    %c0_i32_0 = arith.constant 0 : i32
    %c0_i32_1 = arith.constant 0 : i32
    return %c0_i32, %c0_i32_0 : i32, i32
  }
  func.func @transform_5(%arg0: i32, %arg1: i32) -> (i32, i32) {
    %c0_i32 = arith.constant 0 : i32
    %c0_i32_0 = arith.constant 0 : i32
    %c0_i32_1 = arith.constant 0 : i32
    return %c0_i32, %c0_i32_0 : i32, i32
  }
  func.func @transform_6(%arg0: i32, %arg1: i32) -> (i32, i32) {
    %c0_i32 = arith.constant 0 : i32
    %c0_i32_0 = arith.constant 0 : i32
    %c0_i32_1 = arith.constant 0 : i32
    return %c0_i32, %c0_i32_0 : i32, i32
  }
  func.func @transform_7(%arg0: i32, %arg1: i32) -> (i32, i32) {
    %c0_i32 = arith.constant 0 : i32
    %c0_i32_0 = arith.constant 0 : i32
    %c0_i32_1 = arith.constant 0 : i32
    return %c0_i32, %c0_i32_0 : i32, i32
  }
  func.func @transform_8(%arg0: i32, %arg1: i32) -> (i32, i32) {
    %c0_i32 = arith.constant 0 : i32
    %c0_i32_0 = arith.constant 0 : i32
    %c0_i32_1 = arith.constant 0 : i32
    return %c0_i32, %c0_i32_0 : i32, i32
  }
  func.func @transform_9(%arg0: i32, %arg1: i32) -> (i32, i32) {
    %c0_i32 = arith.constant 0 : i32
    %c0_i32_0 = arith.constant 0 : i32
    %c0_i32_1 = arith.constant 0 : i32
    return %c0_i32, %c0_i32_0 : i32, i32
  }
  func.func @transform_10(%arg0: i32, %arg1: i32) -> (i32, i32) {
    %c0_i32 = arith.constant 0 : i32
    %c0_i32_0 = arith.constant 0 : i32
    %c0_i32_1 = arith.constant 0 : i32
    return %c0_i32, %c0_i32_0 : i32, i32
  }
  func.func @transform_11(%arg0: i32, %arg1: i32) -> (i32, i32) {
    %c0_i32 = arith.constant 0 : i32
    %c0_i32_0 = arith.constant 0 : i32
    %c0_i32_1 = arith.constant 0 : i32
    return %c0_i32, %c0_i32_0 : i32, i32
  }
  func.func @transform_12(%arg0: i32, %arg1: i32) -> (i32, i32) {
    %c0_i32 = arith.constant 0 : i32
    %c0_i32_0 = arith.constant 0 : i32
    %c0_i32_1 = arith.constant 0 : i32
    return %c0_i32, %c0_i32_0 : i32, i32
  }
  func.func @transform_13(%arg0: i32, %arg1: i32) -> (i32, i32) {
    %c0_i32 = arith.constant 0 : i32
    %c0_i32_0 = arith.constant 0 : i32
    %c0_i32_1 = arith.constant 0 : i32
    return %c0_i32, %c0_i32_0 : i32, i32
  }
  func.func @transform_14(%arg0: i32, %arg1: i32) -> (i32, i32) {
    %c0_i32 = arith.constant 0 : i32
    %c0_i32_0 = arith.constant 0 : i32
    %c0_i32_1 = arith.constant 0 : i32
    return %c0_i32, %c0_i32_0 : i32, i32
  }
  func.func @transform_15(%arg0: i32, %arg1: i32) -> (i32, i32) {
    %c0_i32 = arith.constant 0 : i32
    %c0_i32_0 = arith.constant 0 : i32
    %c0_i32_1 = arith.constant 0 : i32
    return %c0_i32, %c0_i32_0 : i32, i32
  }
  func.func @transform_16(%arg0: i32, %arg1: i32) -> (i32, i32) {
    %c0_i32 = arith.constant 0 : i32
    %c0_i32_0 = arith.constant 0 : i32
    %c0_i32_1 = arith.constant 0 : i32
    return %c0_i32, %c0_i32_0 : i32, i32
  }
  func.func @transform_17(%arg0: i32, %arg1: i32) -> (i32, i32) {
    %c0_i32 = arith.constant 0 : i32
    %c0_i32_0 = arith.constant 0 : i32
    %c0_i32_1 = arith.constant 0 : i32
    return %c0_i32, %c0_i32_0 : i32, i32
  }
  func.func @transform_18(%arg0: i32, %arg1: i32) -> (i32, i32) {
    %c0_i32 = arith.constant 0 : i32
    %c0_i32_0 = arith.constant 0 : i32
    %c0_i32_1 = arith.constant 0 : i32
    return %c0_i32, %c0_i32_0 : i32, i32
  }
  func.func @transform_19(%arg0: i32, %arg1: i32) -> (i32, i32, i32) {
    %c0_i32 = arith.constant 0 : i32
    %c0_i32_0 = arith.constant 0 : i32
    return %arg0, %arg1, %c0_i32 : i32, i32, i32
  }
}

module attributes {stable_mosaic.version = 11 : i64} {
  func.func @_cross_attn_ffn_ln_kernel(%arg0: i32, %arg1: i32, %arg2: memref<1x8x32xf32, #tpu.memory_space<vmem>>, %arg3: memref<1x10x32xf32, #tpu.memory_space<vmem>>, %arg4: memref<1x8x10xf32, #tpu.memory_space<vmem>>, %arg5: memref<32x32xbf16, #tpu.memory_space<vmem>>, %arg6: memref<1x32xf32, #tpu.memory_space<vmem>>, %arg7: memref<32x32xbf16, #tpu.memory_space<vmem>>, %arg8: memref<1x32xf32, #tpu.memory_space<vmem>>, %arg9: memref<32x32xbf16, #tpu.memory_space<vmem>>, %arg10: memref<1x32xf32, #tpu.memory_space<vmem>>, %arg11: memref<32x32xbf16, #tpu.memory_space<vmem>>, %arg12: memref<1x32xf32, #tpu.memory_space<vmem>>, %arg13: memref<1x32xf32, #tpu.memory_space<vmem>>, %arg14: memref<1x32xf32, #tpu.memory_space<vmem>>, %arg15: memref<32x64xbf16, #tpu.memory_space<vmem>>, %arg16: memref<1x64xf32, #tpu.memory_space<vmem>>, %arg17: memref<64x32xbf16, #tpu.memory_space<vmem>>, %arg18: memref<1x32xf32, #tpu.memory_space<vmem>>, %arg19: memref<1x32xf32, #tpu.memory_space<vmem>>, %arg20: memref<1x32xf32, #tpu.memory_space<vmem>>, %arg21: memref<1x8x32xf32, #tpu.memory_space<vmem>>) attributes {dimension_semantics = [#tpu.dimension_semantics<parallel>, #tpu.dimension_semantics<parallel>], iteration_bounds = array<i64: 2, 1>, scalar_prefetch = 0 : i64, scratch_operands = 0 : i64, tpu.core_type = #tpu.core_type<tc>, window_params = [{transform_indices = @transform_0, window_bounds = array<i64: 1, 8, 32>}, {transform_indices = @transform_1, window_bounds = array<i64: 1, 10, 32>}, {transform_indices = @transform_2, window_bounds = array<i64: 1, 8, 10>}, {pipeline_mode = #tpu.pipeline_mode<synchronous>, transform_indices = @transform_3, window_bounds = array<i64: 32, 32>}, {pipeline_mode = #tpu.pipeline_mode<synchronous>, transform_indices = @transform_4, window_bounds = array<i64: 1, 32>}, {pipeline_mode = #tpu.pipeline_mode<synchronous>, transform_indices = @transform_5, window_bounds = array<i64: 32, 32>}, {pipeline_mode = #tpu.pipeline_mode<synchronous>, transform_indices = @transform_6, window_bounds = array<i64: 1, 32>}, {pipeline_mode = #tpu.pipeline_mode<synchronous>, transform_indices = @transform_7, window_bounds = array<i64: 32, 32>}, {pipeline_mode = #tpu.pipeline_mode<synchronous>, transform_indices = @transform_8, window_bounds = array<i64: 1, 32>}, {pipeline_mode = #tpu.pipeline_mode<synchronous>, transform_indices = @transform_9, window_bounds = array<i64: 32, 32>}, {pipeline_mode = #tpu.pipeline_mode<synchronous>, transform_indices = @transform_10, window_bounds = array<i64: 1, 32>}, {pipeline_mode = #tpu.pipeline_mode<synchronous>, transform_indices = @transform_11, window_bounds = array<i64: 1, 32>}, {pipeline_mode = #tpu.pipeline_mode<synchronous>, transform_indices = @transform_12, window_bounds = array<i64: 1, 32>}, {pipeline_mode = #tpu.pipeline_mode<synchronous>, transform_indices = @transform_13, window_bounds = array<i64: 32, 64>}, {pipeline_mode = #tpu.pipeline_mode<synchronous>, transform_indices = @transform_14, window_bounds = array<i64: 1, 64>}, {pipeline_mode = #tpu.pipeline_mode<synchronous>, transform_indices = @transform_15, window_bounds = array<i64: 64, 32>}, {pipeline_mode = #tpu.pipeline_mode<synchronous>, transform_indices = @transform_16, window_bounds = array<i64: 1, 32>}, {pipeline_mode = #tpu.pipeline_mode<synchronous>, transform_indices = @transform_17, window_bounds = array<i64: 1, 32>}, {pipeline_mode = #tpu.pipeline_mode<synchronous>, transform_indices = @transform_18, window_bounds = array<i64: 1, 32>}, {transform_indices = @transform_19, window_bounds = array<i64: 1, 8, 32>}]} {
    %c0 = arith.constant 0 : index
    %c0_0 = arith.constant 0 : index
    %c0_1 = arith.constant 0 : index
    %0 = vector.load %arg2[%c0, %c0_0, %c0_1] : memref<1x8x32xf32, #tpu.memory_space<vmem>>, vector<1x8x32xf32>
    %1 = vector.shape_cast %0 : vector<1x8x32xf32> to vector<8x32xf32>
    %c0_2 = arith.constant 0 : index
    %c0_3 = arith.constant 0 : index
    %c0_4 = arith.constant 0 : index
    %2 = vector.load %arg3[%c0_2, %c0_3, %c0_4] : memref<1x10x32xf32, #tpu.memory_space<vmem>>, vector<1x10x32xf32>
    %3 = vector.shape_cast %2 : vector<1x10x32xf32> to vector<10x32xf32>
    %c0_5 = arith.constant 0 : index
    %c0_6 = arith.constant 0 : index
    %c0_7 = arith.constant 0 : index
    %4 = vector.load %arg4[%c0_5, %c0_6, %c0_7] : memref<1x8x10xf32, #tpu.memory_space<vmem>>, vector<1x8x10xf32>
    %5 = vector.shape_cast %4 : vector<1x8x10xf32> to vector<8x10xf32>
    %c0_8 = arith.constant 0 : index
    %c0_9 = arith.constant 0 : index
    %6 = vector.load %arg5[%c0_8, %c0_9] : memref<32x32xbf16, #tpu.memory_space<vmem>>, vector<32x32xbf16>
    %c0_10 = arith.constant 0 : index
    %c0_11 = arith.constant 0 : index
    %7 = vector.load %arg6[%c0_10, %c0_11] : memref<1x32xf32, #tpu.memory_space<vmem>>, vector<1x32xf32>
    %c0_12 = arith.constant 0 : index
    %c0_13 = arith.constant 0 : index
    %8 = vector.load %arg7[%c0_12, %c0_13] : memref<32x32xbf16, #tpu.memory_space<vmem>>, vector<32x32xbf16>
    %c0_14 = arith.constant 0 : index
    %c0_15 = arith.constant 0 : index
    %9 = vector.load %arg8[%c0_14, %c0_15] : memref<1x32xf32, #tpu.memory_space<vmem>>, vector<1x32xf32>
    %c0_16 = arith.constant 0 : index
    %c0_17 = arith.constant 0 : index
    %10 = vector.load %arg9[%c0_16, %c0_17] : memref<32x32xbf16, #tpu.memory_space<vmem>>, vector<32x32xbf16>
    %c0_18 = arith.constant 0 : index
    %c0_19 = arith.constant 0 : index
    %11 = vector.load %arg10[%c0_18, %c0_19] : memref<1x32xf32, #tpu.memory_space<vmem>>, vector<1x32xf32>
    %c0_20 = arith.constant 0 : index
    %c0_21 = arith.constant 0 : index
    %12 = vector.load %arg11[%c0_20, %c0_21] : memref<32x32xbf16, #tpu.memory_space<vmem>>, vector<32x32xbf16>
    %c0_22 = arith.constant 0 : index
    %c0_23 = arith.constant 0 : index
    %13 = vector.load %arg12[%c0_22, %c0_23] : memref<1x32xf32, #tpu.memory_space<vmem>>, vector<1x32xf32>
    %14 = arith.truncf %1 : vector<8x32xf32> to vector<8x32xbf16>
    %15 = arith.truncf %3 : vector<10x32xf32> to vector<10x32xbf16>
    %cst = arith.constant dense<0.000000e+00> : vector<8x32xf32>
    %16 = tpu.matmul %14, %6, %cst {dimension_numbers = #tpu.dot_dimension_numbers<[1], [0], [0], [1], [0, 0, 1, 1], [], []>} : vector<8x32xbf16>, vector<32x32xbf16>, vector<8x32xf32> -> vector<8x32xf32>
    %17 = vector.broadcast %7 : vector<1x32xf32> to vector<8x32xf32>
    %18 = arith.addf %16, %17 : vector<8x32xf32>
    %19 = arith.truncf %18 : vector<8x32xf32> to vector<8x32xbf16>
    %cst_24 = arith.constant dense<0.000000e+00> : vector<10x32xf32>
    %20 = tpu.matmul %15, %8, %cst_24 {dimension_numbers = #tpu.dot_dimension_numbers<[1], [0], [0], [1], [0, 0, 1, 1], [], []>} : vector<10x32xbf16>, vector<32x32xbf16>, vector<10x32xf32> -> vector<10x32xf32>
    %21 = vector.broadcast %9 : vector<1x32xf32> to vector<10x32xf32>
    %22 = arith.addf %20, %21 : vector<10x32xf32>
    %23 = arith.truncf %22 : vector<10x32xf32> to vector<10x32xbf16>
    %cst_25 = arith.constant dense<0.000000e+00> : vector<10x32xf32>
    %24 = tpu.matmul %15, %10, %cst_25 {dimension_numbers = #tpu.dot_dimension_numbers<[1], [0], [0], [1], [0, 0, 1, 1], [], []>} : vector<10x32xbf16>, vector<32x32xbf16>, vector<10x32xf32> -> vector<10x32xf32>
    %25 = vector.broadcast %11 : vector<1x32xf32> to vector<10x32xf32>
    %26 = arith.addf %24, %25 : vector<10x32xf32>
    %27 = arith.truncf %26 : vector<10x32xf32> to vector<10x32xbf16>
    %28 = vector.extract_strided_slice %19 {offsets = [0, 0], sizes = [8, 8], strides = [1, 1]} : vector<8x32xbf16> to vector<8x8xbf16>
    %29 = vector.extract_strided_slice %23 {offsets = [0, 0], sizes = [10, 8], strides = [1, 1]} : vector<10x32xbf16> to vector<10x8xbf16>
    %cst_26 = arith.constant dense<0.000000e+00> : vector<8x10xf32>
    %30 = tpu.matmul %28, %29, %cst_26 {dimension_numbers = #tpu.dot_dimension_numbers<[1], [1], [0], [0], [0, 0, 1, 0], [], []>} : vector<8x8xbf16>, vector<10x8xbf16>, vector<8x10xf32> -> vector<8x10xf32>
    %cst_27 = arith.constant 0.353553385 : f32
    %31 = vector.broadcast %cst_27 : f32 to vector<8x10xf32>
    %32 = arith.mulf %30, %31 : vector<8x10xf32>
    %33 = arith.addf %32, %5 : vector<8x10xf32>
    %cst_28 = arith.constant dense<0xFF800000> : vector<8xf32>
    %34 = vector.multi_reduction <maximumf>, %33, %cst_28 [1] : vector<8x10xf32> to vector<8xf32>
    %35 = vector.shape_cast %34 : vector<8xf32> to vector<8x1xf32>
    %36 = vector.broadcast %35 : vector<8x1xf32> to vector<8x10xf32>
    %37 = arith.subf %33, %36 : vector<8x10xf32>
    %38 = math.exp %37 : vector<8x10xf32>
    %cst_29 = arith.constant dense<0.000000e+00> : vector<8xf32>
    %39 = vector.multi_reduction <add>, %38, %cst_29 [1] : vector<8x10xf32> to vector<8xf32>
    %40 = vector.shape_cast %39 : vector<8xf32> to vector<8x1xf32>
    %41 = vector.broadcast %40 : vector<8x1xf32> to vector<8x10xf32>
    %42 = arith.divf %38, %41 : vector<8x10xf32>
    %43 = arith.truncf %42 : vector<8x10xf32> to vector<8x10xbf16>
    %44 = vector.extract_strided_slice %27 {offsets = [0, 0], sizes = [10, 8], strides = [1, 1]} : vector<10x32xbf16> to vector<10x8xbf16>
    %cst_30 = arith.constant dense<0.000000e+00> : vector<8x8xf32>
    %45 = tpu.matmul %43, %44, %cst_30 {dimension_numbers = #tpu.dot_dimension_numbers<[1], [0], [0], [1], [0, 0, 1, 1], [], []>} : vector<8x10xbf16>, vector<10x8xbf16>, vector<8x8xf32> -> vector<8x8xf32>
    %46 = vector.extract_strided_slice %19 {offsets = [0, 8], sizes = [8, 8], strides = [1, 1]} : vector<8x32xbf16> to vector<8x8xbf16>
    %47 = vector.extract_strided_slice %23 {offsets = [0, 8], sizes = [10, 8], strides = [1, 1]} : vector<10x32xbf16> to vector<10x8xbf16>
    %cst_31 = arith.constant dense<0.000000e+00> : vector<8x10xf32>
    %48 = tpu.matmul %46, %47, %cst_31 {dimension_numbers = #tpu.dot_dimension_numbers<[1], [1], [0], [0], [0, 0, 1, 0], [], []>} : vector<8x8xbf16>, vector<10x8xbf16>, vector<8x10xf32> -> vector<8x10xf32>
    %cst_32 = arith.constant 0.353553385 : f32
    %49 = vector.broadcast %cst_32 : f32 to vector<8x10xf32>
    %50 = arith.mulf %48, %49 : vector<8x10xf32>
    %51 = arith.addf %50, %5 : vector<8x10xf32>
    %cst_33 = arith.constant dense<0xFF800000> : vector<8xf32>
    %52 = vector.multi_reduction <maximumf>, %51, %cst_33 [1] : vector<8x10xf32> to vector<8xf32>
    %53 = vector.shape_cast %52 : vector<8xf32> to vector<8x1xf32>
    %54 = vector.broadcast %53 : vector<8x1xf32> to vector<8x10xf32>
    %55 = arith.subf %51, %54 : vector<8x10xf32>
    %56 = math.exp %55 : vector<8x10xf32>
    %cst_34 = arith.constant dense<0.000000e+00> : vector<8xf32>
    %57 = vector.multi_reduction <add>, %56, %cst_34 [1] : vector<8x10xf32> to vector<8xf32>
    %58 = vector.shape_cast %57 : vector<8xf32> to vector<8x1xf32>
    %59 = vector.broadcast %58 : vector<8x1xf32> to vector<8x10xf32>
    %60 = arith.divf %56, %59 : vector<8x10xf32>
    %61 = arith.truncf %60 : vector<8x10xf32> to vector<8x10xbf16>
    %62 = vector.extract_strided_slice %27 {offsets = [0, 8], sizes = [10, 8], strides = [1, 1]} : vector<10x32xbf16> to vector<10x8xbf16>
    %cst_35 = arith.constant dense<0.000000e+00> : vector<8x8xf32>
    %63 = tpu.matmul %61, %62, %cst_35 {dimension_numbers = #tpu.dot_dimension_numbers<[1], [0], [0], [1], [0, 0, 1, 1], [], []>} : vector<8x10xbf16>, vector<10x8xbf16>, vector<8x8xf32> -> vector<8x8xf32>
    %64 = vector.extract_strided_slice %19 {offsets = [0, 16], sizes = [8, 8], strides = [1, 1]} : vector<8x32xbf16> to vector<8x8xbf16>
    %65 = vector.extract_strided_slice %23 {offsets = [0, 16], sizes = [10, 8], strides = [1, 1]} : vector<10x32xbf16> to vector<10x8xbf16>
    %cst_36 = arith.constant dense<0.000000e+00> : vector<8x10xf32>
    %66 = tpu.matmul %64, %65, %cst_36 {dimension_numbers = #tpu.dot_dimension_numbers<[1], [1], [0], [0], [0, 0, 1, 0], [], []>} : vector<8x8xbf16>, vector<10x8xbf16>, vector<8x10xf32> -> vector<8x10xf32>
    %cst_37 = arith.constant 0.353553385 : f32
    %67 = vector.broadcast %cst_37 : f32 to vector<8x10xf32>
    %68 = arith.mulf %66, %67 : vector<8x10xf32>
    %69 = arith.addf %68, %5 : vector<8x10xf32>
    %cst_38 = arith.constant dense<0xFF800000> : vector<8xf32>
    %70 = vector.multi_reduction <maximumf>, %69, %cst_38 [1] : vector<8x10xf32> to vector<8xf32>
    %71 = vector.shape_cast %70 : vector<8xf32> to vector<8x1xf32>
    %72 = vector.broadcast %71 : vector<8x1xf32> to vector<8x10xf32>
    %73 = arith.subf %69, %72 : vector<8x10xf32>
    %74 = math.exp %73 : vector<8x10xf32>
    %cst_39 = arith.constant dense<0.000000e+00> : vector<8xf32>
    %75 = vector.multi_reduction <add>, %74, %cst_39 [1] : vector<8x10xf32> to vector<8xf32>
    %76 = vector.shape_cast %75 : vector<8xf32> to vector<8x1xf32>
    %77 = vector.broadcast %76 : vector<8x1xf32> to vector<8x10xf32>
    %78 = arith.divf %74, %77 : vector<8x10xf32>
    %79 = arith.truncf %78 : vector<8x10xf32> to vector<8x10xbf16>
    %80 = vector.extract_strided_slice %27 {offsets = [0, 16], sizes = [10, 8], strides = [1, 1]} : vector<10x32xbf16> to vector<10x8xbf16>
    %cst_40 = arith.constant dense<0.000000e+00> : vector<8x8xf32>
    %81 = tpu.matmul %79, %80, %cst_40 {dimension_numbers = #tpu.dot_dimension_numbers<[1], [0], [0], [1], [0, 0, 1, 1], [], []>} : vector<8x10xbf16>, vector<10x8xbf16>, vector<8x8xf32> -> vector<8x8xf32>
    %82 = vector.extract_strided_slice %19 {offsets = [0, 24], sizes = [8, 8], strides = [1, 1]} : vector<8x32xbf16> to vector<8x8xbf16>
    %83 = vector.extract_strided_slice %23 {offsets = [0, 24], sizes = [10, 8], strides = [1, 1]} : vector<10x32xbf16> to vector<10x8xbf16>
    %cst_41 = arith.constant dense<0.000000e+00> : vector<8x10xf32>
    %84 = tpu.matmul %82, %83, %cst_41 {dimension_numbers = #tpu.dot_dimension_numbers<[1], [1], [0], [0], [0, 0, 1, 0], [], []>} : vector<8x8xbf16>, vector<10x8xbf16>, vector<8x10xf32> -> vector<8x10xf32>
    %cst_42 = arith.constant 0.353553385 : f32
    %85 = vector.broadcast %cst_42 : f32 to vector<8x10xf32>
    %86 = arith.mulf %84, %85 : vector<8x10xf32>
    %87 = arith.addf %86, %5 : vector<8x10xf32>
    %cst_43 = arith.constant dense<0xFF800000> : vector<8xf32>
    %88 = vector.multi_reduction <maximumf>, %87, %cst_43 [1] : vector<8x10xf32> to vector<8xf32>
    %89 = vector.shape_cast %88 : vector<8xf32> to vector<8x1xf32>
    %90 = vector.broadcast %89 : vector<8x1xf32> to vector<8x10xf32>
    %91 = arith.subf %87, %90 : vector<8x10xf32>
    %92 = math.exp %91 : vector<8x10xf32>
    %cst_44 = arith.constant dense<0.000000e+00> : vector<8xf32>
    %93 = vector.multi_reduction <add>, %92, %cst_44 [1] : vector<8x10xf32> to vector<8xf32>
    %94 = vector.shape_cast %93 : vector<8xf32> to vector<8x1xf32>
    %95 = vector.broadcast %94 : vector<8x1xf32> to vector<8x10xf32>
    %96 = arith.divf %92, %95 : vector<8x10xf32>
    %97 = arith.truncf %96 : vector<8x10xf32> to vector<8x10xbf16>
    %98 = vector.extract_strided_slice %27 {offsets = [0, 24], sizes = [10, 8], strides = [1, 1]} : vector<10x32xbf16> to vector<10x8xbf16>
    %cst_45 = arith.constant dense<0.000000e+00> : vector<8x8xf32>
    %99 = tpu.matmul %97, %98, %cst_45 {dimension_numbers = #tpu.dot_dimension_numbers<[1], [0], [0], [1], [0, 0, 1, 1], [], []>} : vector<8x10xbf16>, vector<10x8xbf16>, vector<8x8xf32> -> vector<8x8xf32>
    %100 = tpu.concatenate %45, %63, %81, %99 in 1 : vector<8x8xf32>, vector<8x8xf32>, vector<8x8xf32>, vector<8x8xf32> -> vector<8x32xf32>
    %101 = arith.truncf %100 : vector<8x32xf32> to vector<8x32xbf16>
    %cst_46 = arith.constant dense<0.000000e+00> : vector<8x32xf32>
    %102 = tpu.matmul %101, %12, %cst_46 {dimension_numbers = #tpu.dot_dimension_numbers<[1], [0], [0], [1], [0, 0, 1, 1], [], []>} : vector<8x32xbf16>, vector<32x32xbf16>, vector<8x32xf32> -> vector<8x32xf32>
    %103 = vector.broadcast %13 : vector<1x32xf32> to vector<8x32xf32>
    %104 = arith.addf %102, %103 : vector<8x32xf32>
    %105 = arith.addf %1, %104 : vector<8x32xf32>
    %c0_47 = arith.constant 0 : index
    %c0_48 = arith.constant 0 : index
    %106 = vector.load %arg13[%c0_47, %c0_48] : memref<1x32xf32, #tpu.memory_space<vmem>>, vector<1x32xf32>
    %c0_49 = arith.constant 0 : index
    %c0_50 = arith.constant 0 : index
    %107 = vector.load %arg14[%c0_49, %c0_50] : memref<1x32xf32, #tpu.memory_space<vmem>>, vector<1x32xf32>
    %cst_51 = arith.constant dense<0.000000e+00> : vector<8xf32>
    %108 = vector.multi_reduction <add>, %105, %cst_51 [1] : vector<8x32xf32> to vector<8xf32>
    %109 = vector.shape_cast %108 : vector<8xf32> to vector<8x1xf32>
    %cst_52 = arith.constant 3.200000e+01 : f32
    %110 = vector.broadcast %cst_52 : f32 to vector<8x1xf32>
    %111 = arith.divf %109, %110 : vector<8x1xf32>
    %112 = vector.broadcast %111 : vector<8x1xf32> to vector<8x32xf32>
    %113 = arith.subf %105, %112 : vector<8x32xf32>
    %114 = arith.mulf %113, %113 : vector<8x32xf32>
    %cst_53 = arith.constant dense<0.000000e+00> : vector<8xf32>
    %115 = vector.multi_reduction <add>, %114, %cst_53 [1] : vector<8x32xf32> to vector<8xf32>
    %116 = vector.shape_cast %115 : vector<8xf32> to vector<8x1xf32>
    %cst_54 = arith.constant 3.200000e+01 : f32
    %117 = vector.broadcast %cst_54 : f32 to vector<8x1xf32>
    %118 = arith.divf %116, %117 : vector<8x1xf32>
    %119 = vector.broadcast %111 : vector<8x1xf32> to vector<8x32xf32>
    %120 = arith.subf %105, %119 : vector<8x32xf32>
    %cst_55 = arith.constant 9.99999974E-6 : f32
    %121 = vector.broadcast %cst_55 : f32 to vector<8x1xf32>
    %122 = arith.addf %118, %121 : vector<8x1xf32>
    %123 = math.rsqrt %122 : vector<8x1xf32>
    %124 = vector.broadcast %123 : vector<8x1xf32> to vector<8x32xf32>
    %125 = arith.mulf %120, %124 : vector<8x32xf32>
    %126 = vector.broadcast %106 : vector<1x32xf32> to vector<8x32xf32>
    %127 = arith.mulf %125, %126 : vector<8x32xf32>
    %128 = vector.broadcast %107 : vector<1x32xf32> to vector<8x32xf32>
    %129 = arith.addf %127, %128 : vector<8x32xf32>
    %130 = arith.truncf %129 : vector<8x32xf32> to vector<8x32xbf16>
    %c0_56 = arith.constant 0 : index
    %c0_57 = arith.constant 0 : index
    %131 = vector.load %arg15[%c0_56, %c0_57] : memref<32x64xbf16, #tpu.memory_space<vmem>>, vector<32x64xbf16>
    %cst_58 = arith.constant dense<0.000000e+00> : vector<8x64xf32>
    %132 = tpu.matmul %130, %131, %cst_58 {dimension_numbers = #tpu.dot_dimension_numbers<[1], [0], [0], [1], [0, 0, 1, 1], [], []>} : vector<8x32xbf16>, vector<32x64xbf16>, vector<8x64xf32> -> vector<8x64xf32>
    %c0_59 = arith.constant 0 : index
    %c0_60 = arith.constant 0 : index
    %133 = vector.load %arg16[%c0_59, %c0_60] : memref<1x64xf32, #tpu.memory_space<vmem>>, vector<1x64xf32>
    %134 = vector.broadcast %133 : vector<1x64xf32> to vector<8x64xf32>
    %135 = arith.addf %132, %134 : vector<8x64xf32>
    %cst_61 = arith.constant 0.000000e+00 : f32
    %136 = vector.broadcast %cst_61 : f32 to vector<8x64xf32>
    %137 = arith.maximumf %135, %136 : vector<8x64xf32>
    %138 = arith.truncf %137 : vector<8x64xf32> to vector<8x64xbf16>
    %c0_62 = arith.constant 0 : index
    %c0_63 = arith.constant 0 : index
    %139 = vector.load %arg17[%c0_62, %c0_63] : memref<64x32xbf16, #tpu.memory_space<vmem>>, vector<64x32xbf16>
    %cst_64 = arith.constant dense<0.000000e+00> : vector<8x32xf32>
    %140 = tpu.matmul %138, %139, %cst_64 {dimension_numbers = #tpu.dot_dimension_numbers<[1], [0], [0], [1], [0, 0, 1, 1], [], []>} : vector<8x64xbf16>, vector<64x32xbf16>, vector<8x32xf32> -> vector<8x32xf32>
    %c0_65 = arith.constant 0 : index
    %c0_66 = arith.constant 0 : index
    %141 = vector.load %arg18[%c0_65, %c0_66] : memref<1x32xf32, #tpu.memory_space<vmem>>, vector<1x32xf32>
    %142 = vector.broadcast %141 : vector<1x32xf32> to vector<8x32xf32>
    %143 = arith.addf %140, %142 : vector<8x32xf32>
    %144 = arith.addf %129, %143 : vector<8x32xf32>
    %c0_67 = arith.constant 0 : index
    %c0_68 = arith.constant 0 : index
    %145 = vector.load %arg19[%c0_67, %c0_68] : memref<1x32xf32, #tpu.memory_space<vmem>>, vector<1x32xf32>
    %c0_69 = arith.constant 0 : index
    %c0_70 = arith.constant 0 : index
    %146 = vector.load %arg20[%c0_69, %c0_70] : memref<1x32xf32, #tpu.memory_space<vmem>>, vector<1x32xf32>
    %cst_71 = arith.constant dense<0.000000e+00> : vector<8xf32>
    %147 = vector.multi_reduction <add>, %144, %cst_71 [1] : vector<8x32xf32> to vector<8xf32>
    %148 = vector.shape_cast %147 : vector<8xf32> to vector<8x1xf32>
    %cst_72 = arith.constant 3.200000e+01 : f32
    %149 = vector.broadcast %cst_72 : f32 to vector<8x1xf32>
    %150 = arith.divf %148, %149 : vector<8x1xf32>
    %151 = vector.broadcast %150 : vector<8x1xf32> to vector<8x32xf32>
    %152 = arith.subf %144, %151 : vector<8x32xf32>
    %153 = arith.mulf %152, %152 : vector<8x32xf32>
    %cst_73 = arith.constant dense<0.000000e+00> : vector<8xf32>
    %154 = vector.multi_reduction <add>, %153, %cst_73 [1] : vector<8x32xf32> to vector<8xf32>
    %155 = vector.shape_cast %154 : vector<8xf32> to vector<8x1xf32>
    %cst_74 = arith.constant 3.200000e+01 : f32
    %156 = vector.broadcast %cst_74 : f32 to vector<8x1xf32>
    %157 = arith.divf %155, %156 : vector<8x1xf32>
    %158 = vector.broadcast %150 : vector<8x1xf32> to vector<8x32xf32>
    %159 = arith.subf %144, %158 : vector<8x32xf32>
    %cst_75 = arith.constant 9.99999974E-6 : f32
    %160 = vector.broadcast %cst_75 : f32 to vector<8x1xf32>
    %161 = arith.addf %157, %160 : vector<8x1xf32>
    %162 = math.rsqrt %161 : vector<8x1xf32>
    %163 = vector.broadcast %162 : vector<8x1xf32> to vector<8x32xf32>
    %164 = arith.mulf %159, %163 : vector<8x32xf32>
    %165 = vector.broadcast %145 : vector<1x32xf32> to vector<8x32xf32>
    %166 = arith.mulf %164, %165 : vector<8x32xf32>
    %167 = vector.broadcast %146 : vector<1x32xf32> to vector<8x32xf32>
    %168 = arith.addf %166, %167 : vector<8x32xf32>
    %c0_76 = arith.constant 0 : index
    %c0_77 = arith.constant 0 : index
    %c0_78 = arith.constant 0 : index
    %169 = vector.load %arg21[%c0_76, %c0_77, %c0_78] : memref<1x8x32xf32, #tpu.memory_space<vmem>>, vector<1x8x32xf32>
    %170 = vector.shape_cast %169 : vector<1x8x32xf32> to vector<8x32xf32>
    %171 = vector.shape_cast %168 : vector<8x32xf32> to vector<1x8x32xf32>
    tpu.vector_store %arg21[%c0_76, %c0_77, %c0_78], %171 {strides = array<i32>} : memref<1x8x32xf32, #tpu.memory_space<vmem>>, vector<1x8x32xf32>,
    return
  }
  func.func @transform_0(%arg0: i32, %arg1: i32) -> (i32, i32, i32) {
    %c0_i32 = arith.constant 0 : i32
    %c0_i32_0 = arith.constant 0 : i32
    return %arg0, %arg1, %c0_i32 : i32, i32, i32
  }
  func.func @transform_1(%arg0: i32, %arg1: i32) -> (i32, i32, i32) {
    %c0_i32 = arith.constant 0 : i32
    %c0_i32_0 = arith.constant 0 : i32
    %c0_i32_1 = arith.constant 0 : i32
    return %arg0, %c0_i32, %c0_i32_0 : i32, i32, i32
  }
  func.func @transform_2(%arg0: i32, %arg1: i32) -> (i32, i32, i32) {
    %c0_i32 = arith.constant 0 : i32
    %c0_i32_0 = arith.constant 0 : i32
    return %arg0, %arg1, %c0_i32 : i32, i32, i32
  }
  func.func @transform_3(%arg0: i32, %arg1: i32) -> (i32, i32) {
    %c0_i32 = arith.constant 0 : i32
    %c0_i32_0 = arith.constant 0 : i32
    %c0_i32_1 = arith.constant 0 : i32
    return %c0_i32, %c0_i32_0 : i32, i32
  }
  func.func @transform_4(%arg0: i32, %arg1: i32) -> (i32, i32) {
    %c0_i32 = arith.constant 0 : i32
    %c0_i32_0 = arith.constant 0 : i32
    %c0_i32_1 = arith.constant 0 : i32
    return %c0_i32, %c0_i32_0 : i32, i32
  }
  func.func @transform_5(%arg0: i32, %arg1: i32) -> (i32, i32) {
    %c0_i32 = arith.constant 0 : i32
    %c0_i32_0 = arith.constant 0 : i32
    %c0_i32_1 = arith.constant 0 : i32
    return %c0_i32, %c0_i32_0 : i32, i32
  }
  func.func @transform_6(%arg0: i32, %arg1: i32) -> (i32, i32) {
    %c0_i32 = arith.constant 0 : i32
    %c0_i32_0 = arith.constant 0 : i32
    %c0_i32_1 = arith.constant 0 : i32
    return %c0_i32, %c0_i32_0 : i32, i32
  }
  func.func @transform_7(%arg0: i32, %arg1: i32) -> (i32, i32) {
    %c0_i32 = arith.constant 0 : i32
    %c0_i32_0 = arith.constant 0 : i32
    %c0_i32_1 = arith.constant 0 : i32
    return %c0_i32, %c0_i32_0 : i32, i32
  }
  func.func @transform_8(%arg0: i32, %arg1: i32) -> (i32, i32) {
    %c0_i32 = arith.constant 0 : i32
    %c0_i32_0 = arith.constant 0 : i32
    %c0_i32_1 = arith.constant 0 : i32
    return %c0_i32, %c0_i32_0 : i32, i32
  }
  func.func @transform_9(%arg0: i32, %arg1: i32) -> (i32, i32) {
    %c0_i32 = arith.constant 0 : i32
    %c0_i32_0 = arith.constant 0 : i32
    %c0_i32_1 = arith.constant 0 : i32
    return %c0_i32, %c0_i32_0 : i32, i32
  }
  func.func @transform_10(%arg0: i32, %arg1: i32) -> (i32, i32) {
    %c0_i32 = arith.constant 0 : i32
    %c0_i32_0 = arith.constant 0 : i32
    %c0_i32_1 = arith.constant 0 : i32
    return %c0_i32, %c0_i32_0 : i32, i32
  }
  func.func @transform_11(%arg0: i32, %arg1: i32) -> (i32, i32) {
    %c0_i32 = arith.constant 0 : i32
    %c0_i32_0 = arith.constant 0 : i32
    %c0_i32_1 = arith.constant 0 : i32
    return %c0_i32, %c0_i32_0 : i32, i32
  }
  func.func @transform_12(%arg0: i32, %arg1: i32) -> (i32, i32) {
    %c0_i32 = arith.constant 0 : i32
    %c0_i32_0 = arith.constant 0 : i32
    %c0_i32_1 = arith.constant 0 : i32
    return %c0_i32, %c0_i32_0 : i32, i32
  }
  func.func @transform_13(%arg0: i32, %arg1: i32) -> (i32, i32) {
    %c0_i32 = arith.constant 0 : i32
    %c0_i32_0 = arith.constant 0 : i32
    %c0_i32_1 = arith.constant 0 : i32
    return %c0_i32, %c0_i32_0 : i32, i32
  }
  func.func @transform_14(%arg0: i32, %arg1: i32) -> (i32, i32) {
    %c0_i32 = arith.constant 0 : i32
    %c0_i32_0 = arith.constant 0 : i32
    %c0_i32_1 = arith.constant 0 : i32
    return %c0_i32, %c0_i32_0 : i32, i32
  }
  func.func @transform_15(%arg0: i32, %arg1: i32) -> (i32, i32) {
    %c0_i32 = arith.constant 0 : i32
    %c0_i32_0 = arith.constant 0 : i32
    %c0_i32_1 = arith.constant 0 : i32
    return %c0_i32, %c0_i32_0 : i32, i32
  }
  func.func @transform_16(%arg0: i32, %arg1: i32) -> (i32, i32) {
    %c0_i32 = arith.constant 0 : i32
    %c0_i32_0 = arith.constant 0 : i32
    %c0_i32_1 = arith.constant 0 : i32
    return %c0_i32, %c0_i32_0 : i32, i32
  }
  func.func @transform_17(%arg0: i32, %arg1: i32) -> (i32, i32) {
    %c0_i32 = arith.constant 0 : i32
    %c0_i32_0 = arith.constant 0 : i32
    %c0_i32_1 = arith.constant 0 : i32
    return %c0_i32, %c0_i32_0 : i32, i32
  }
  func.func @transform_18(%arg0: i32, %arg1: i32) -> (i32, i32) {
    %c0_i32 = arith.constant 0 : i32
    %c0_i32_0 = arith.constant 0 : i32
    %c0_i32_1 = arith.constant 0 : i32
    return %c0_i32, %c0_i32_0 : i32, i32
  }
  func.func @transform_19(%arg0: i32, %arg1: i32) -> (i32, i32, i32) {
    %c0_i32 = arith.constant 0 : i32
    %c0_i32_0 = arith.constant 0 : i32
    return %arg0, %arg1, %c0_i32 : i32, i32, i32
  }
}

module attributes {stable_mosaic.version = 11 : i64} {
  func.func @_linear_kernel(%arg0: i32, %arg1: i32, %arg2: memref<16x32xf32, #tpu.memory_space<vmem>>, %arg3: memref<32x50xbf16, #tpu.memory_space<vmem>>, %arg4: memref<1x50xf32, #tpu.memory_space<vmem>>, %arg5: memref<16x50xf32, #tpu.memory_space<vmem>>) attributes {dimension_semantics = [#tpu.dimension_semantics<parallel>, #tpu.dimension_semantics<parallel>], iteration_bounds = array<i64: 1, 1>, scalar_prefetch = 0 : i64, scratch_operands = 0 : i64, tpu.core_type = #tpu.core_type<tc>, window_params = [{transform_indices = @transform_0, window_bounds = array<i64: 16, 32>}, {transform_indices = @transform_1, window_bounds = array<i64: 32, 50>}, {transform_indices = @transform_2, window_bounds = array<i64: 1, 50>}, {transform_indices = @transform_3, window_bounds = array<i64: 16, 50>}]} {
    %c0 = arith.constant 0 : index
    %c0_0 = arith.constant 0 : index
    %0 = vector.load %arg2[%c0, %c0_0] : memref<16x32xf32, #tpu.memory_space<vmem>>, vector<16x32xf32>
    %1 = arith.truncf %0 : vector<16x32xf32> to vector<16x32xbf16>
    %c0_1 = arith.constant 0 : index
    %c0_2 = arith.constant 0 : index
    %2 = vector.load %arg3[%c0_1, %c0_2] : memref<32x50xbf16, #tpu.memory_space<vmem>>, vector<32x50xbf16>
    %cst = arith.constant dense<0.000000e+00> : vector<16x50xf32>
    %3 = tpu.matmul %1, %2, %cst {dimension_numbers = #tpu.dot_dimension_numbers<[1], [0], [0], [1], [0, 0, 1, 1], [], []>} : vector<16x32xbf16>, vector<32x50xbf16>, vector<16x50xf32> -> vector<16x50xf32>
    %c0_3 = arith.constant 0 : index
    %c0_4 = arith.constant 0 : index
    %4 = vector.load %arg4[%c0_3, %c0_4] : memref<1x50xf32, #tpu.memory_space<vmem>>, vector<1x50xf32>
    %5 = vector.broadcast %4 : vector<1x50xf32> to vector<16x50xf32>
    %6 = arith.addf %3, %5 : vector<16x50xf32>
    %c0_5 = arith.constant 0 : index
    %c0_6 = arith.constant 0 : index
    %7 = vector.load %arg5[%c0_5, %c0_6] : memref<16x50xf32, #tpu.memory_space<vmem>>, vector<16x50xf32>
    tpu.vector_store %arg5[%c0_5, %c0_6], %6 {strides = array<i32>} : memref<16x50xf32, #tpu.memory_space<vmem>>, vector<16x50xf32>,
    return
  }
  func.func @transform_0(%arg0: i32, %arg1: i32) -> (i32, i32) {
    %c0_i32 = arith.constant 0 : i32
    %c0_i32_0 = arith.constant 0 : i32
    return %arg0, %c0_i32 : i32, i32
  }
  func.func @transform_1(%arg0: i32, %arg1: i32) -> (i32, i32) {
    %c0_i32 = arith.constant 0 : i32
    %c0_i32_0 = arith.constant 0 : i32
    return %c0_i32, %arg1 : i32, i32
  }
  func.func @transform_2(%arg0: i32, %arg1: i32) -> (i32, i32) {
    %c0_i32 = arith.constant 0 : i32
    %c0_i32_0 = arith.constant 0 : i32
    return %c0_i32, %arg1 : i32, i32
  }
  func.func @transform_3(%arg0: i32, %arg1: i32) -> (i32, i32) {
    %c0_i32 = arith.constant 0 : i32
    return %arg0, %arg1 : i32, i32
  }
}

module attributes {stable_mosaic.version = 11 : i64} {
  func.func @_self_attn_ln_kernel(%arg0: i32, %arg1: i32, %arg2: memref<1x8x32xf32, #tpu.memory_space<vmem>>, %arg3: memref<1x8x32xf32, #tpu.memory_space<vmem>>, %arg4: memref<1x8x8xf32, #tpu.memory_space<vmem>>, %arg5: memref<32x32xbf16, #tpu.memory_space<vmem>>, %arg6: memref<1x32xf32, #tpu.memory_space<vmem>>, %arg7: memref<32x32xbf16, #tpu.memory_space<vmem>>, %arg8: memref<1x32xf32, #tpu.memory_space<vmem>>, %arg9: memref<32x32xbf16, #tpu.memory_space<vmem>>, %arg10: memref<1x32xf32, #tpu.memory_space<vmem>>, %arg11: memref<32x32xbf16, #tpu.memory_space<vmem>>, %arg12: memref<1x32xf32, #tpu.memory_space<vmem>>, %arg13: memref<1x32xf32, #tpu.memory_space<vmem>>, %arg14: memref<1x32xf32, #tpu.memory_space<vmem>>, %arg15: memref<1x8x32xf32, #tpu.memory_space<vmem>>) attributes {dimension_semantics = [#tpu.dimension_semantics<parallel>, #tpu.dimension_semantics<parallel>], iteration_bounds = array<i64: 2, 1>, scalar_prefetch = 0 : i64, scratch_operands = 0 : i64, tpu.core_type = #tpu.core_type<tc>, window_params = [{transform_indices = @transform_0, window_bounds = array<i64: 1, 8, 32>}, {transform_indices = @transform_1, window_bounds = array<i64: 1, 8, 32>}, {transform_indices = @transform_2, window_bounds = array<i64: 1, 8, 8>}, {pipeline_mode = #tpu.pipeline_mode<synchronous>, transform_indices = @transform_3, window_bounds = array<i64: 32, 32>}, {pipeline_mode = #tpu.pipeline_mode<synchronous>, transform_indices = @transform_4, window_bounds = array<i64: 1, 32>}, {pipeline_mode = #tpu.pipeline_mode<synchronous>, transform_indices = @transform_5, window_bounds = array<i64: 32, 32>}, {pipeline_mode = #tpu.pipeline_mode<synchronous>, transform_indices = @transform_6, window_bounds = array<i64: 1, 32>}, {pipeline_mode = #tpu.pipeline_mode<synchronous>, transform_indices = @transform_7, window_bounds = array<i64: 32, 32>}, {pipeline_mode = #tpu.pipeline_mode<synchronous>, transform_indices = @transform_8, window_bounds = array<i64: 1, 32>}, {pipeline_mode = #tpu.pipeline_mode<synchronous>, transform_indices = @transform_9, window_bounds = array<i64: 32, 32>}, {pipeline_mode = #tpu.pipeline_mode<synchronous>, transform_indices = @transform_10, window_bounds = array<i64: 1, 32>}, {pipeline_mode = #tpu.pipeline_mode<synchronous>, transform_indices = @transform_11, window_bounds = array<i64: 1, 32>}, {pipeline_mode = #tpu.pipeline_mode<synchronous>, transform_indices = @transform_12, window_bounds = array<i64: 1, 32>}, {transform_indices = @transform_13, window_bounds = array<i64: 1, 8, 32>}]} {
    %c0 = arith.constant 0 : index
    %c0_0 = arith.constant 0 : index
    %c0_1 = arith.constant 0 : index
    %0 = vector.load %arg2[%c0, %c0_0, %c0_1] : memref<1x8x32xf32, #tpu.memory_space<vmem>>, vector<1x8x32xf32>
    %1 = vector.shape_cast %0 : vector<1x8x32xf32> to vector<8x32xf32>
    %c0_2 = arith.constant 0 : index
    %c0_3 = arith.constant 0 : index
    %c0_4 = arith.constant 0 : index
    %2 = vector.load %arg3[%c0_2, %c0_3, %c0_4] : memref<1x8x32xf32, #tpu.memory_space<vmem>>, vector<1x8x32xf32>
    %3 = vector.shape_cast %2 : vector<1x8x32xf32> to vector<8x32xf32>
    %c0_5 = arith.constant 0 : index
    %c0_6 = arith.constant 0 : index
    %c0_7 = arith.constant 0 : index
    %4 = vector.load %arg4[%c0_5, %c0_6, %c0_7] : memref<1x8x8xf32, #tpu.memory_space<vmem>>, vector<1x8x8xf32>
    %5 = vector.shape_cast %4 : vector<1x8x8xf32> to vector<8x8xf32>
    %c0_8 = arith.constant 0 : index
    %c0_9 = arith.constant 0 : index
    %6 = vector.load %arg5[%c0_8, %c0_9] : memref<32x32xbf16, #tpu.memory_space<vmem>>, vector<32x32xbf16>
    %c0_10 = arith.constant 0 : index
    %c0_11 = arith.constant 0 : index
    %7 = vector.load %arg6[%c0_10, %c0_11] : memref<1x32xf32, #tpu.memory_space<vmem>>, vector<1x32xf32>
    %c0_12 = arith.constant 0 : index
    %c0_13 = arith.constant 0 : index
    %8 = vector.load %arg7[%c0_12, %c0_13] : memref<32x32xbf16, #tpu.memory_space<vmem>>, vector<32x32xbf16>
    %c0_14 = arith.constant 0 : index
    %c0_15 = arith.constant 0 : index
    %9 = vector.load %arg8[%c0_14, %c0_15] : memref<1x32xf32, #tpu.memory_space<vmem>>, vector<1x32xf32>
    %c0_16 = arith.constant 0 : index
    %c0_17 = arith.constant 0 : index
    %10 = vector.load %arg9[%c0_16, %c0_17] : memref<32x32xbf16, #tpu.memory_space<vmem>>, vector<32x32xbf16>
    %c0_18 = arith.constant 0 : index
    %c0_19 = arith.constant 0 : index
    %11 = vector.load %arg10[%c0_18, %c0_19] : memref<1x32xf32, #tpu.memory_space<vmem>>, vector<1x32xf32>
    %c0_20 = arith.constant 0 : index
    %c0_21 = arith.constant 0 : index
    %12 = vector.load %arg11[%c0_20, %c0_21] : memref<32x32xbf16, #tpu.memory_space<vmem>>, vector<32x32xbf16>
    %c0_22 = arith.constant 0 : index
    %c0_23 = arith.constant 0 : index
    %13 = vector.load %arg12[%c0_22, %c0_23] : memref<1x32xf32, #tpu.memory_space<vmem>>, vector<1x32xf32>
    %14 = arith.truncf %1 : vector<8x32xf32> to vector<8x32xbf16>
    %15 = arith.truncf %3 : vector<8x32xf32> to vector<8x32xbf16>
    %cst = arith.constant dense<0.000000e+00> : vector<8x32xf32>
    %16 = tpu.matmul %14, %6, %cst {dimension_numbers = #tpu.dot_dimension_numbers<[1], [0], [0], [1], [0, 0, 1, 1], [], []>} : vector<8x32xbf16>, vector<32x32xbf16>, vector<8x32xf32> -> vector<8x32xf32>
    %17 = vector.broadcast %7 : vector<1x32xf32> to vector<8x32xf32>
    %18 = arith.addf %16, %17 : vector<8x32xf32>
    %19 = arith.truncf %18 : vector<8x32xf32> to vector<8x32xbf16>
    %cst_24 = arith.constant dense<0.000000e+00> : vector<8x32xf32>
    %20 = tpu.matmul %15, %8, %cst_24 {dimension_numbers = #tpu.dot_dimension_numbers<[1], [0], [0], [1], [0, 0, 1, 1], [], []>} : vector<8x32xbf16>, vector<32x32xbf16>, vector<8x32xf32> -> vector<8x32xf32>
    %21 = vector.broadcast %9 : vector<1x32xf32> to vector<8x32xf32>
    %22 = arith.addf %20, %21 : vector<8x32xf32>
    %23 = arith.truncf %22 : vector<8x32xf32> to vector<8x32xbf16>
    %cst_25 = arith.constant dense<0.000000e+00> : vector<8x32xf32>
    %24 = tpu.matmul %15, %10, %cst_25 {dimension_numbers = #tpu.dot_dimension_numbers<[1], [0], [0], [1], [0, 0, 1, 1], [], []>} : vector<8x32xbf16>, vector<32x32xbf16>, vector<8x32xf32> -> vector<8x32xf32>
    %25 = vector.broadcast %11 : vector<1x32xf32> to vector<8x32xf32>
    %26 = arith.addf %24, %25 : vector<8x32xf32>
    %27 = arith.truncf %26 : vector<8x32xf32> to vector<8x32xbf16>
    %28 = vector.extract_strided_slice %19 {offsets = [0, 0], sizes = [8, 8], strides = [1, 1]} : vector<8x32xbf16> to vector<8x8xbf16>
    %29 = vector.extract_strided_slice %23 {offsets = [0, 0], sizes = [8, 8], strides = [1, 1]} : vector<8x32xbf16> to vector<8x8xbf16>
    %cst_26 = arith.constant dense<0.000000e+00> : vector<8x8xf32>
    %30 = tpu.matmul %28, %29, %cst_26 {dimension_numbers = #tpu.dot_dimension_numbers<[1], [1], [0], [0], [0, 0, 1, 0], [], []>} : vector<8x8xbf16>, vector<8x8xbf16>, vector<8x8xf32> -> vector<8x8xf32>
    %cst_27 = arith.constant 0.353553385 : f32
    %31 = vector.broadcast %cst_27 : f32 to vector<8x8xf32>
    %32 = arith.mulf %30, %31 : vector<8x8xf32>
    %33 = arith.addf %32, %5 : vector<8x8xf32>
    %cst_28 = arith.constant dense<0xFF800000> : vector<8xf32>
    %34 = vector.multi_reduction <maximumf>, %33, %cst_28 [1] : vector<8x8xf32> to vector<8xf32>
    %35 = vector.shape_cast %34 : vector<8xf32> to vector<8x1xf32>
    %36 = vector.broadcast %35 : vector<8x1xf32> to vector<8x8xf32>
    %37 = arith.subf %33, %36 : vector<8x8xf32>
    %38 = math.exp %37 : vector<8x8xf32>
    %cst_29 = arith.constant dense<0.000000e+00> : vector<8xf32>
    %39 = vector.multi_reduction <add>, %38, %cst_29 [1] : vector<8x8xf32> to vector<8xf32>
    %40 = vector.shape_cast %39 : vector<8xf32> to vector<8x1xf32>
    %41 = vector.broadcast %40 : vector<8x1xf32> to vector<8x8xf32>
    %42 = arith.divf %38, %41 : vector<8x8xf32>
    %43 = arith.truncf %42 : vector<8x8xf32> to vector<8x8xbf16>
    %44 = vector.extract_strided_slice %27 {offsets = [0, 0], sizes = [8, 8], strides = [1, 1]} : vector<8x32xbf16> to vector<8x8xbf16>
    %cst_30 = arith.constant dense<0.000000e+00> : vector<8x8xf32>
    %45 = tpu.matmul %43, %44, %cst_30 {dimension_numbers = #tpu.dot_dimension_numbers<[1], [0], [0], [1], [0, 0, 1, 1], [], []>} : vector<8x8xbf16>, vector<8x8xbf16>, vector<8x8xf32> -> vector<8x8xf32>
    %46 = vector.extract_strided_slice %19 {offsets = [0, 8], sizes = [8, 8], strides = [1, 1]} : vector<8x32xbf16> to vector<8x8xbf16>
    %47 = vector.extract_strided_slice %23 {offsets = [0, 8], sizes = [8, 8], strides = [1, 1]} : vector<8x32xbf16> to vector<8x8xbf16>
    %cst_31 = arith.constant dense<0.000000e+00> : vector<8x8xf32>
    %48 = tpu.matmul %46, %47, %cst_31 {dimension_numbers = #tpu.dot_dimension_numbers<[1], [1], [0], [0], [0, 0, 1, 0], [], []>} : vector<8x8xbf16>, vector<8x8xbf16>, vector<8x8xf32> -> vector<8x8xf32>
    %cst_32 = arith.constant 0.353553385 : f32
    %49 = vector.broadcast %cst_32 : f32 to vector<8x8xf32>
    %50 = arith.mulf %48, %49 : vector<8x8xf32>
    %51 = arith.addf %50, %5 : vector<8x8xf32>
    %cst_33 = arith.constant dense<0xFF800000> : vector<8xf32>
    %52 = vector.multi_reduction <maximumf>, %51, %cst_33 [1] : vector<8x8xf32> to vector<8xf32>
    %53 = vector.shape_cast %52 : vector<8xf32> to vector<8x1xf32>
    %54 = vector.broadcast %53 : vector<8x1xf32> to vector<8x8xf32>
    %55 = arith.subf %51, %54 : vector<8x8xf32>
    %56 = math.exp %55 : vector<8x8xf32>
    %cst_34 = arith.constant dense<0.000000e+00> : vector<8xf32>
    %57 = vector.multi_reduction <add>, %56, %cst_34 [1] : vector<8x8xf32> to vector<8xf32>
    %58 = vector.shape_cast %57 : vector<8xf32> to vector<8x1xf32>
    %59 = vector.broadcast %58 : vector<8x1xf32> to vector<8x8xf32>
    %60 = arith.divf %56, %59 : vector<8x8xf32>
    %61 = arith.truncf %60 : vector<8x8xf32> to vector<8x8xbf16>
    %62 = vector.extract_strided_slice %27 {offsets = [0, 8], sizes = [8, 8], strides = [1, 1]} : vector<8x32xbf16> to vector<8x8xbf16>
    %cst_35 = arith.constant dense<0.000000e+00> : vector<8x8xf32>
    %63 = tpu.matmul %61, %62, %cst_35 {dimension_numbers = #tpu.dot_dimension_numbers<[1], [0], [0], [1], [0, 0, 1, 1], [], []>} : vector<8x8xbf16>, vector<8x8xbf16>, vector<8x8xf32> -> vector<8x8xf32>
    %64 = vector.extract_strided_slice %19 {offsets = [0, 16], sizes = [8, 8], strides = [1, 1]} : vector<8x32xbf16> to vector<8x8xbf16>
    %65 = vector.extract_strided_slice %23 {offsets = [0, 16], sizes = [8, 8], strides = [1, 1]} : vector<8x32xbf16> to vector<8x8xbf16>
    %cst_36 = arith.constant dense<0.000000e+00> : vector<8x8xf32>
    %66 = tpu.matmul %64, %65, %cst_36 {dimension_numbers = #tpu.dot_dimension_numbers<[1], [1], [0], [0], [0, 0, 1, 0], [], []>} : vector<8x8xbf16>, vector<8x8xbf16>, vector<8x8xf32> -> vector<8x8xf32>
    %cst_37 = arith.constant 0.353553385 : f32
    %67 = vector.broadcast %cst_37 : f32 to vector<8x8xf32>
    %68 = arith.mulf %66, %67 : vector<8x8xf32>
    %69 = arith.addf %68, %5 : vector<8x8xf32>
    %cst_38 = arith.constant dense<0xFF800000> : vector<8xf32>
    %70 = vector.multi_reduction <maximumf>, %69, %cst_38 [1] : vector<8x8xf32> to vector<8xf32>
    %71 = vector.shape_cast %70 : vector<8xf32> to vector<8x1xf32>
    %72 = vector.broadcast %71 : vector<8x1xf32> to vector<8x8xf32>
    %73 = arith.subf %69, %72 : vector<8x8xf32>
    %74 = math.exp %73 : vector<8x8xf32>
    %cst_39 = arith.constant dense<0.000000e+00> : vector<8xf32>
    %75 = vector.multi_reduction <add>, %74, %cst_39 [1] : vector<8x8xf32> to vector<8xf32>
    %76 = vector.shape_cast %75 : vector<8xf32> to vector<8x1xf32>
    %77 = vector.broadcast %76 : vector<8x1xf32> to vector<8x8xf32>
    %78 = arith.divf %74, %77 : vector<8x8xf32>
    %79 = arith.truncf %78 : vector<8x8xf32> to vector<8x8xbf16>
    %80 = vector.extract_strided_slice %27 {offsets = [0, 16], sizes = [8, 8], strides = [1, 1]} : vector<8x32xbf16> to vector<8x8xbf16>
    %cst_40 = arith.constant dense<0.000000e+00> : vector<8x8xf32>
    %81 = tpu.matmul %79, %80, %cst_40 {dimension_numbers = #tpu.dot_dimension_numbers<[1], [0], [0], [1], [0, 0, 1, 1], [], []>} : vector<8x8xbf16>, vector<8x8xbf16>, vector<8x8xf32> -> vector<8x8xf32>
    %82 = vector.extract_strided_slice %19 {offsets = [0, 24], sizes = [8, 8], strides = [1, 1]} : vector<8x32xbf16> to vector<8x8xbf16>
    %83 = vector.extract_strided_slice %23 {offsets = [0, 24], sizes = [8, 8], strides = [1, 1]} : vector<8x32xbf16> to vector<8x8xbf16>
    %cst_41 = arith.constant dense<0.000000e+00> : vector<8x8xf32>
    %84 = tpu.matmul %82, %83, %cst_41 {dimension_numbers = #tpu.dot_dimension_numbers<[1], [1], [0], [0], [0, 0, 1, 0], [], []>} : vector<8x8xbf16>, vector<8x8xbf16>, vector<8x8xf32> -> vector<8x8xf32>
    %cst_42 = arith.constant 0.353553385 : f32
    %85 = vector.broadcast %cst_42 : f32 to vector<8x8xf32>
    %86 = arith.mulf %84, %85 : vector<8x8xf32>
    %87 = arith.addf %86, %5 : vector<8x8xf32>
    %cst_43 = arith.constant dense<0xFF800000> : vector<8xf32>
    %88 = vector.multi_reduction <maximumf>, %87, %cst_43 [1] : vector<8x8xf32> to vector<8xf32>
    %89 = vector.shape_cast %88 : vector<8xf32> to vector<8x1xf32>
    %90 = vector.broadcast %89 : vector<8x1xf32> to vector<8x8xf32>
    %91 = arith.subf %87, %90 : vector<8x8xf32>
    %92 = math.exp %91 : vector<8x8xf32>
    %cst_44 = arith.constant dense<0.000000e+00> : vector<8xf32>
    %93 = vector.multi_reduction <add>, %92, %cst_44 [1] : vector<8x8xf32> to vector<8xf32>
    %94 = vector.shape_cast %93 : vector<8xf32> to vector<8x1xf32>
    %95 = vector.broadcast %94 : vector<8x1xf32> to vector<8x8xf32>
    %96 = arith.divf %92, %95 : vector<8x8xf32>
    %97 = arith.truncf %96 : vector<8x8xf32> to vector<8x8xbf16>
    %98 = vector.extract_strided_slice %27 {offsets = [0, 24], sizes = [8, 8], strides = [1, 1]} : vector<8x32xbf16> to vector<8x8xbf16>
    %cst_45 = arith.constant dense<0.000000e+00> : vector<8x8xf32>
    %99 = tpu.matmul %97, %98, %cst_45 {dimension_numbers = #tpu.dot_dimension_numbers<[1], [0], [0], [1], [0, 0, 1, 1], [], []>} : vector<8x8xbf16>, vector<8x8xbf16>, vector<8x8xf32> -> vector<8x8xf32>
    %100 = tpu.concatenate %45, %63, %81, %99 in 1 : vector<8x8xf32>, vector<8x8xf32>, vector<8x8xf32>, vector<8x8xf32> -> vector<8x32xf32>
    %101 = arith.truncf %100 : vector<8x32xf32> to vector<8x32xbf16>
    %cst_46 = arith.constant dense<0.000000e+00> : vector<8x32xf32>
    %102 = tpu.matmul %101, %12, %cst_46 {dimension_numbers = #tpu.dot_dimension_numbers<[1], [0], [0], [1], [0, 0, 1, 1], [], []>} : vector<8x32xbf16>, vector<32x32xbf16>, vector<8x32xf32> -> vector<8x32xf32>
    %103 = vector.broadcast %13 : vector<1x32xf32> to vector<8x32xf32>
    %104 = arith.addf %102, %103 : vector<8x32xf32>
    %105 = arith.addf %1, %104 : vector<8x32xf32>
    %c0_47 = arith.constant 0 : index
    %c0_48 = arith.constant 0 : index
    %106 = vector.load %arg13[%c0_47, %c0_48] : memref<1x32xf32, #tpu.memory_space<vmem>>, vector<1x32xf32>
    %c0_49 = arith.constant 0 : index
    %c0_50 = arith.constant 0 : index
    %107 = vector.load %arg14[%c0_49, %c0_50] : memref<1x32xf32, #tpu.memory_space<vmem>>, vector<1x32xf32>
    %cst_51 = arith.constant dense<0.000000e+00> : vector<8xf32>
    %108 = vector.multi_reduction <add>, %105, %cst_51 [1] : vector<8x32xf32> to vector<8xf32>
    %109 = vector.shape_cast %108 : vector<8xf32> to vector<8x1xf32>
    %cst_52 = arith.constant 3.200000e+01 : f32
    %110 = vector.broadcast %cst_52 : f32 to vector<8x1xf32>
    %111 = arith.divf %109, %110 : vector<8x1xf32>
    %112 = vector.broadcast %111 : vector<8x1xf32> to vector<8x32xf32>
    %113 = arith.subf %105, %112 : vector<8x32xf32>
    %114 = arith.mulf %113, %113 : vector<8x32xf32>
    %cst_53 = arith.constant dense<0.000000e+00> : vector<8xf32>
    %115 = vector.multi_reduction <add>, %114, %cst_53 [1] : vector<8x32xf32> to vector<8xf32>
    %116 = vector.shape_cast %115 : vector<8xf32> to vector<8x1xf32>
    %cst_54 = arith.constant 3.200000e+01 : f32
    %117 = vector.broadcast %cst_54 : f32 to vector<8x1xf32>
    %118 = arith.divf %116, %117 : vector<8x1xf32>
    %119 = vector.broadcast %111 : vector<8x1xf32> to vector<8x32xf32>
    %120 = arith.subf %105, %119 : vector<8x32xf32>
    %cst_55 = arith.constant 9.99999974E-6 : f32
    %121 = vector.broadcast %cst_55 : f32 to vector<8x1xf32>
    %122 = arith.addf %118, %121 : vector<8x1xf32>
    %123 = math.rsqrt %122 : vector<8x1xf32>
    %124 = vector.broadcast %123 : vector<8x1xf32> to vector<8x32xf32>
    %125 = arith.mulf %120, %124 : vector<8x32xf32>
    %126 = vector.broadcast %106 : vector<1x32xf32> to vector<8x32xf32>
    %127 = arith.mulf %125, %126 : vector<8x32xf32>
    %128 = vector.broadcast %107 : vector<1x32xf32> to vector<8x32xf32>
    %129 = arith.addf %127, %128 : vector<8x32xf32>
    %c0_56 = arith.constant 0 : index
    %c0_57 = arith.constant 0 : index
    %c0_58 = arith.constant 0 : index
    %130 = vector.load %arg15[%c0_56, %c0_57, %c0_58] : memref<1x8x32xf32, #tpu.memory_space<vmem>>, vector<1x8x32xf32>
    %131 = vector.shape_cast %130 : vector<1x8x32xf32> to vector<8x32xf32>
    %132 = vector.shape_cast %129 : vector<8x32xf32> to vector<1x8x32xf32>
    tpu.vector_store %arg15[%c0_56, %c0_57, %c0_58], %132 {strides = array<i32>} : memref<1x8x32xf32, #tpu.memory_space<vmem>>, vector<1x8x32xf32>,
    return
  }
  func.func @transform_0(%arg0: i32, %arg1: i32) -> (i32, i32, i32) {
    %c0_i32 = arith.constant 0 : i32
    %c0_i32_0 = arith.constant 0 : i32
    return %arg0, %arg1, %c0_i32 : i32, i32, i32
  }
  func.func @transform_1(%arg0: i32, %arg1: i32) -> (i32, i32, i32) {
    %c0_i32 = arith.constant 0 : i32
    %c0_i32_0 = arith.constant 0 : i32
    %c0_i32_1 = arith.constant 0 : i32
    return %arg0, %c0_i32, %c0_i32_0 : i32, i32, i32
  }
  func.func @transform_2(%arg0: i32, %arg1: i32) -> (i32, i32, i32) {
    %c0_i32 = arith.constant 0 : i32
    %c0_i32_0 = arith.constant 0 : i32
    %c0_i32_1 = arith.constant 0 : i32
    return %c0_i32, %arg1, %c0_i32_0 : i32, i32, i32
  }
  func.func @transform_3(%arg0: i32, %arg1: i32) -> (i32, i32) {
    %c0_i32 = arith.constant 0 : i32
    %c0_i32_0 = arith.constant 0 : i32
    %c0_i32_1 = arith.constant 0 : i32
    return %c0_i32, %c0_i32_0 : i32, i32
  }
  func.func @transform_4(%arg0: i32, %arg1: i32) -> (i32, i32) {
    %c0_i32 = arith.constant 0 : i32
    %c0_i32_0 = arith.constant 0 : i32
    %c0_i32_1 = arith.constant 0 : i32
    return %c0_i32, %c0_i32_0 : i32, i32
  }
  func.func @transform_5(%arg0: i32, %arg1: i32) -> (i32, i32) {
    %c0_i32 = arith.constant 0 : i32
    %c0_i32_0 = arith.constant 0 : i32
    %c0_i32_1 = arith.constant 0 : i32
    return %c0_i32, %c0_i32_0 : i32, i32
  }
  func.func @transform_6(%arg0: i32, %arg1: i32) -> (i32, i32) {
    %c0_i32 = arith.constant 0 : i32
    %c0_i32_0 = arith.constant 0 : i32
    %c0_i32_1 = arith.constant 0 : i32
    return %c0_i32, %c0_i32_0 : i32, i32
  }
  func.func @transform_7(%arg0: i32, %arg1: i32) -> (i32, i32) {
    %c0_i32 = arith.constant 0 : i32
    %c0_i32_0 = arith.constant 0 : i32
    %c0_i32_1 = arith.constant 0 : i32
    return %c0_i32, %c0_i32_0 : i32, i32
  }
  func.func @transform_8(%arg0: i32, %arg1: i32) -> (i32, i32) {
    %c0_i32 = arith.constant 0 : i32
    %c0_i32_0 = arith.constant 0 : i32
    %c0_i32_1 = arith.constant 0 : i32
    return %c0_i32, %c0_i32_0 : i32, i32
  }
  func.func @transform_9(%arg0: i32, %arg1: i32) -> (i32, i32) {
    %c0_i32 = arith.constant 0 : i32
    %c0_i32_0 = arith.constant 0 : i32
    %c0_i32_1 = arith.constant 0 : i32
    return %c0_i32, %c0_i32_0 : i32, i32
  }
  func.func @transform_10(%arg0: i32, %arg1: i32) -> (i32, i32) {
    %c0_i32 = arith.constant 0 : i32
    %c0_i32_0 = arith.constant 0 : i32
    %c0_i32_1 = arith.constant 0 : i32
    return %c0_i32, %c0_i32_0 : i32, i32
  }
  func.func @transform_11(%arg0: i32, %arg1: i32) -> (i32, i32) {
    %c0_i32 = arith.constant 0 : i32
    %c0_i32_0 = arith.constant 0 : i32
    %c0_i32_1 = arith.constant 0 : i32
    return %c0_i32, %c0_i32_0 : i32, i32
  }
  func.func @transform_12(%arg0: i32, %arg1: i32) -> (i32, i32) {
    %c0_i32 = arith.constant 0 : i32
    %c0_i32_0 = arith.constant 0 : i32
    %c0_i32_1 = arith.constant 0 : i32
    return %c0_i32, %c0_i32_0 : i32, i32
  }
  func.func @transform_13(%arg0: i32, %arg1: i32) -> (i32, i32, i32) {
    %c0_i32 = arith.constant 0 : i32
    %c0_i32_0 = arith.constant 0 : i32
    return %arg0, %arg1, %c0_i32 : i32, i32, i32
  }
}

module attributes {stable_mosaic.version = 11 : i64} {
  func.func @_attn_probs_kernel(%arg0: i32, %arg1: memref<1x8x32xf32, #tpu.memory_space<vmem>>, %arg2: memref<1x10x32xf32, #tpu.memory_space<vmem>>, %arg3: memref<1x8x10xf32, #tpu.memory_space<vmem>>, %arg4: memref<32x32xbf16, #tpu.memory_space<vmem>>, %arg5: memref<1x32xf32, #tpu.memory_space<vmem>>, %arg6: memref<32x32xbf16, #tpu.memory_space<vmem>>, %arg7: memref<1x32xf32, #tpu.memory_space<vmem>>, %arg8: memref<1x4x8x10xf32, #tpu.memory_space<vmem>>) attributes {dimension_semantics = [#tpu.dimension_semantics<parallel>], iteration_bounds = array<i64: 2>, scalar_prefetch = 0 : i64, scratch_operands = 0 : i64, tpu.core_type = #tpu.core_type<tc>, window_params = [{transform_indices = @transform_0, window_bounds = array<i64: 1, 8, 32>}, {transform_indices = @transform_1, window_bounds = array<i64: 1, 10, 32>}, {transform_indices = @transform_2, window_bounds = array<i64: 1, 8, 10>}, {pipeline_mode = #tpu.pipeline_mode<synchronous>, transform_indices = @transform_3, window_bounds = array<i64: 32, 32>}, {pipeline_mode = #tpu.pipeline_mode<synchronous>, transform_indices = @transform_4, window_bounds = array<i64: 1, 32>}, {pipeline_mode = #tpu.pipeline_mode<synchronous>, transform_indices = @transform_5, window_bounds = array<i64: 32, 32>}, {pipeline_mode = #tpu.pipeline_mode<synchronous>, transform_indices = @transform_6, window_bounds = array<i64: 1, 32>}, {transform_indices = @transform_7, window_bounds = array<i64: 1, 4, 8, 10>}]} {
    %c0 = arith.constant 0 : index
    %c0_0 = arith.constant 0 : index
    %c0_1 = arith.constant 0 : index
    %0 = vector.load %arg1[%c0, %c0_0, %c0_1] : memref<1x8x32xf32, #tpu.memory_space<vmem>>, vector<1x8x32xf32>
    %1 = vector.shape_cast %0 : vector<1x8x32xf32> to vector<8x32xf32>
    %2 = arith.truncf %1 : vector<8x32xf32> to vector<8x32xbf16>
    %c0_2 = arith.constant 0 : index
    %c0_3 = arith.constant 0 : index
    %c0_4 = arith.constant 0 : index
    %3 = vector.load %arg2[%c0_2, %c0_3, %c0_4] : memref<1x10x32xf32, #tpu.memory_space<vmem>>, vector<1x10x32xf32>
    %4 = vector.shape_cast %3 : vector<1x10x32xf32> to vector<10x32xf32>
    %5 = arith.truncf %4 : vector<10x32xf32> to vector<10x32xbf16>
    %c0_5 = arith.constant 0 : index
    %c0_6 = arith.constant 0 : index
    %6 = vector.load %arg4[%c0_5, %c0_6] : memref<32x32xbf16, #tpu.memory_space<vmem>>, vector<32x32xbf16>
    %cst = arith.constant dense<0.000000e+00> : vector<8x32xf32>
    %7 = tpu.matmul %2, %6, %cst {dimension_numbers = #tpu.dot_dimension_numbers<[1], [0], [0], [1], [0, 0, 1, 1], [], []>} : vector<8x32xbf16>, vector<32x32xbf16>, vector<8x32xf32> -> vector<8x32xf32>
    %c0_7 = arith.constant 0 : index
    %c0_8 = arith.constant 0 : index
    %8 = vector.load %arg5[%c0_7, %c0_8] : memref<1x32xf32, #tpu.memory_space<vmem>>, vector<1x32xf32>
    %9 = vector.broadcast %8 : vector<1x32xf32> to vector<8x32xf32>
    %10 = arith.addf %7, %9 : vector<8x32xf32>
    %11 = arith.truncf %10 : vector<8x32xf32> to vector<8x32xbf16>
    %c0_9 = arith.constant 0 : index
    %c0_10 = arith.constant 0 : index
    %12 = vector.load %arg6[%c0_9, %c0_10] : memref<32x32xbf16, #tpu.memory_space<vmem>>, vector<32x32xbf16>
    %cst_11 = arith.constant dense<0.000000e+00> : vector<10x32xf32>
    %13 = tpu.matmul %5, %12, %cst_11 {dimension_numbers = #tpu.dot_dimension_numbers<[1], [0], [0], [1], [0, 0, 1, 1], [], []>} : vector<10x32xbf16>, vector<32x32xbf16>, vector<10x32xf32> -> vector<10x32xf32>
    %c0_12 = arith.constant 0 : index
    %c0_13 = arith.constant 0 : index
    %14 = vector.load %arg7[%c0_12, %c0_13] : memref<1x32xf32, #tpu.memory_space<vmem>>, vector<1x32xf32>
    %15 = vector.broadcast %14 : vector<1x32xf32> to vector<10x32xf32>
    %16 = arith.addf %13, %15 : vector<10x32xf32>
    %17 = arith.truncf %16 : vector<10x32xf32> to vector<10x32xbf16>
    %c0_14 = arith.constant 0 : index
    %c0_15 = arith.constant 0 : index
    %c0_16 = arith.constant 0 : index
    %18 = vector.load %arg3[%c0_14, %c0_15, %c0_16] : memref<1x8x10xf32, #tpu.memory_space<vmem>>, vector<1x8x10xf32>
    %19 = vector.shape_cast %18 : vector<1x8x10xf32> to vector<8x10xf32>
    %20 = vector.extract_strided_slice %11 {offsets = [0, 0], sizes = [8, 8], strides = [1, 1]} : vector<8x32xbf16> to vector<8x8xbf16>
    %21 = vector.extract_strided_slice %17 {offsets = [0, 0], sizes = [10, 8], strides = [1, 1]} : vector<10x32xbf16> to vector<10x8xbf16>
    %cst_17 = arith.constant dense<0.000000e+00> : vector<8x10xf32>
    %22 = tpu.matmul %20, %21, %cst_17 {dimension_numbers = #tpu.dot_dimension_numbers<[1], [1], [0], [0], [0, 0, 1, 0], [], []>} : vector<8x8xbf16>, vector<10x8xbf16>, vector<8x10xf32> -> vector<8x10xf32>
    %cst_18 = arith.constant 0.353553385 : f32
    %23 = vector.broadcast %cst_18 : f32 to vector<8x10xf32>
    %24 = arith.mulf %22, %23 : vector<8x10xf32>
    %25 = arith.addf %24, %19 : vector<8x10xf32>
    %cst_19 = arith.constant dense<0xFF800000> : vector<8xf32>
    %26 = vector.multi_reduction <maximumf>, %25, %cst_19 [1] : vector<8x10xf32> to vector<8xf32>
    %27 = vector.shape_cast %26 : vector<8xf32> to vector<8x1xf32>
    %28 = vector.broadcast %27 : vector<8x1xf32> to vector<8x10xf32>
    %29 = arith.subf %25, %28 : vector<8x10xf32>
    %30 = math.exp %29 : vector<8x10xf32>
    %cst_20 = arith.constant dense<0.000000e+00> : vector<8xf32>
    %31 = vector.multi_reduction <add>, %30, %cst_20 [1] : vector<8x10xf32> to vector<8xf32>
    %32 = vector.shape_cast %31 : vector<8xf32> to vector<8x1xf32>
    %33 = vector.broadcast %32 : vector<8x1xf32> to vector<8x10xf32>
    %34 = arith.divf %30, %33 : vector<8x10xf32>
    %c0_21 = arith.constant 0 : index
    %c0_22 = arith.constant 0 : index
    %c0_23 = arith.constant 0 : index
    %c0_24 = arith.constant 0 : index
    %35 = vector.load %arg8[%c0_21, %c0_22, %c0_23, %c0_24] : memref<1x4x8x10xf32, #tpu.memory_space<vmem>>, vector<1x1x8x10xf32>
    %36 = vector.shape_cast %35 : vector<1x1x8x10xf32> to vector<8x10xf32>
    %37 = vector.shape_cast %34 : vector<8x10xf32> to vector<1x1x8x10xf32>
    tpu.vector_store %arg8[%c0_21, %c0_22, %c0_23, %c0_24], %37 {strides = array<i32>} : memref<1x4x8x10xf32, #tpu.memory_space<vmem>>, vector<1x1x8x10xf32>,
    %38 = vector.extract_strided_slice %11 {offsets = [0, 8], sizes = [8, 8], strides = [1, 1]} : vector<8x32xbf16> to vector<8x8xbf16>
    %39 = vector.extract_strided_slice %17 {offsets = [0, 8], sizes = [10, 8], strides = [1, 1]} : vector<10x32xbf16> to vector<10x8xbf16>
    %cst_25 = arith.constant dense<0.000000e+00> : vector<8x10xf32>
    %40 = tpu.matmul %38, %39, %cst_25 {dimension_numbers = #tpu.dot_dimension_numbers<[1], [1], [0], [0], [0, 0, 1, 0], [], []>} : vector<8x8xbf16>, vector<10x8xbf16>, vector<8x10xf32> -> vector<8x10xf32>
    %cst_26 = arith.constant 0.353553385 : f32
    %41 = vector.broadcast %cst_26 : f32 to vector<8x10xf32>
    %42 = arith.mulf %40, %41 : vector<8x10xf32>
    %43 = arith.addf %42, %19 : vector<8x10xf32>
    %cst_27 = arith.constant dense<0xFF800000> : vector<8xf32>
    %44 = vector.multi_reduction <maximumf>, %43, %cst_27 [1] : vector<8x10xf32> to vector<8xf32>
    %45 = vector.shape_cast %44 : vector<8xf32> to vector<8x1xf32>
    %46 = vector.broadcast %45 : vector<8x1xf32> to vector<8x10xf32>
    %47 = arith.subf %43, %46 : vector<8x10xf32>
    %48 = math.exp %47 : vector<8x10xf32>
    %cst_28 = arith.constant dense<0.000000e+00> : vector<8xf32>
    %49 = vector.multi_reduction <add>, %48, %cst_28 [1] : vector<8x10xf32> to vector<8xf32>
    %50 = vector.shape_cast %49 : vector<8xf32> to vector<8x1xf32>
    %51 = vector.broadcast %50 : vector<8x1xf32> to vector<8x10xf32>
    %52 = arith.divf %48, %51 : vector<8x10xf32>
    %c0_29 = arith.constant 0 : index
    %c1 = arith.constant 1 : index
    %c0_30 = arith.constant 0 : index
    %c0_31 = arith.constant 0 : index
    %53 = vector.load %arg8[%c0_29, %c1, %c0_30, %c0_31] : memref<1x4x8x10xf32, #tpu.memory_space<vmem>>, vector<1x1x8x10xf32>
    %54 = vector.shape_cast %53 : vector<1x1x8x10xf32> to vector<8x10xf32>
    %55 = vector.shape_cast %52 : vector<8x10xf32> to vector<1x1x8x10xf32>
    tpu.vector_store %arg8[%c0_29, %c1, %c0_30, %c0_31], %55 {strides = array<i32>} : memref<1x4x8x10xf32, #tpu.memory_space<vmem>>, vector<1x1x8x10xf32>,
    %56 = vector.extract_strided_slice %11 {offsets = [0, 16], sizes = [8, 8], strides = [1, 1]} : vector<8x32xbf16> to vector<8x8xbf16>
    %57 = vector.extract_strided_slice %17 {offsets = [0, 16], sizes = [10, 8], strides = [1, 1]} : vector<10x32xbf16> to vector<10x8xbf16>
    %cst_32 = arith.constant dense<0.000000e+00> : vector<8x10xf32>
    %58 = tpu.matmul %56, %57, %cst_32 {dimension_numbers = #tpu.dot_dimension_numbers<[1], [1], [0], [0], [0, 0, 1, 0], [], []>} : vector<8x8xbf16>, vector<10x8xbf16>, vector<8x10xf32> -> vector<8x10xf32>
    %cst_33 = arith.constant 0.353553385 : f32
    %59 = vector.broadcast %cst_33 : f32 to vector<8x10xf32>
    %60 = arith.mulf %58, %59 : vector<8x10xf32>
    %61 = arith.addf %60, %19 : vector<8x10xf32>
    %cst_34 = arith.constant dense<0xFF800000> : vector<8xf32>
    %62 = vector.multi_reduction <maximumf>, %61, %cst_34 [1] : vector<8x10xf32> to vector<8xf32>
    %63 = vector.shape_cast %62 : vector<8xf32> to vector<8x1xf32>
    %64 = vector.broadcast %63 : vector<8x1xf32> to vector<8x10xf32>
    %65 = arith.subf %61, %64 : vector<8x10xf32>
    %66 = math.exp %65 : vector<8x10xf32>
    %cst_35 = arith.constant dense<0.000000e+00> : vector<8xf32>
    %67 = vector.multi_reduction <add>, %66, %cst_35 [1] : vector<8x10xf32> to vector<8xf32>
    %68 = vector.shape_cast %67 : vector<8xf32> to vector<8x1xf32>
    %69 = vector.broadcast %68 : vector<8x1xf32> to vector<8x10xf32>
    %70 = arith.divf %66, %69 : vector<8x10xf32>
    %c0_36 = arith.constant 0 : index
    %c2 = arith.constant 2 : index
    %c0_37 = arith.constant 0 : index
    %c0_38 = arith.constant 0 : index
    %71 = vector.load %arg8[%c0_36, %c2, %c0_37, %c0_38] : memref<1x4x8x10xf32, #tpu.memory_space<vmem>>, vector<1x1x8x10xf32>
    %72 = vector.shape_cast %71 : vector<1x1x8x10xf32> to vector<8x10xf32>
    %73 = vector.shape_cast %70 : vector<8x10xf32> to vector<1x1x8x10xf32>
    tpu.vector_store %arg8[%c0_36, %c2, %c0_37, %c0_38], %73 {strides = array<i32>} : memref<1x4x8x10xf32, #tpu.memory_space<vmem>>, vector<1x1x8x10xf32>,
    %74 = vector.extract_strided_slice %11 {offsets = [0, 24], sizes = [8, 8], strides = [1, 1]} : vector<8x32xbf16> to vector<8x8xbf16>
    %75 = vector.extract_strided_slice %17 {offsets = [0, 24], sizes = [10, 8], strides = [1, 1]} : vector<10x32xbf16> to vector<10x8xbf16>
    %cst_39 = arith.constant dense<0.000000e+00> : vector<8x10xf32>
    %76 = tpu.matmul %74, %75, %cst_39 {dimension_numbers = #tpu.dot_dimension_numbers<[1], [1], [0], [0], [0, 0, 1, 0], [], []>} : vector<8x8xbf16>, vector<10x8xbf16>, vector<8x10xf32> -> vector<8x10xf32>
    %cst_40 = arith.constant 0.353553385 : f32
    %77 = vector.broadcast %cst_40 : f32 to vector<8x10xf32>
    %78 = arith.mulf %76, %77 : vector<8x10xf32>
    %79 = arith.addf %78, %19 : vector<8x10xf32>
    %cst_41 = arith.constant dense<0xFF800000> : vector<8xf32>
    %80 = vector.multi_reduction <maximumf>, %79, %cst_41 [1] : vector<8x10xf32> to vector<8xf32>
    %81 = vector.shape_cast %80 : vector<8xf32> to vector<8x1xf32>
    %82 = vector.broadcast %81 : vector<8x1xf32> to vector<8x10xf32>
    %83 = arith.subf %79, %82 : vector<8x10xf32>
    %84 = math.exp %83 : vector<8x10xf32>
    %cst_42 = arith.constant dense<0.000000e+00> : vector<8xf32>
    %85 = vector.multi_reduction <add>, %84, %cst_42 [1] : vector<8x10xf32> to vector<8xf32>
    %86 = vector.shape_cast %85 : vector<8xf32> to vector<8x1xf32>
    %87 = vector.broadcast %86 : vector<8x1xf32> to vector<8x10xf32>
    %88 = arith.divf %84, %87 : vector<8x10xf32>
    %c0_43 = arith.constant 0 : index
    %c3 = arith.constant 3 : index
    %c0_44 = arith.constant 0 : index
    %c0_45 = arith.constant 0 : index
    %89 = vector.load %arg8[%c0_43, %c3, %c0_44, %c0_45] : memref<1x4x8x10xf32, #tpu.memory_space<vmem>>, vector<1x1x8x10xf32>
    %90 = vector.shape_cast %89 : vector<1x1x8x10xf32> to vector<8x10xf32>
    %91 = vector.shape_cast %88 : vector<8x10xf32> to vector<1x1x8x10xf32>
    tpu.vector_store %arg8[%c0_43, %c3, %c0_44, %c0_45], %91 {strides = array<i32>} : memref<1x4x8x10xf32, #tpu.memory_space<vmem>>, vector<1x1x8x10xf32>,
    return
  }
  func.func @transform_0(%arg0: i32) -> (i32, i32, i32) {
    %c0_i32 = arith.constant 0 : i32
    %c0_i32_0 = arith.constant 0 : i32
    %c0_i32_1 = arith.constant 0 : i32
    return %arg0, %c0_i32, %c0_i32_0 : i32, i32, i32
  }
  func.func @transform_1(%arg0: i32) -> (i32, i32, i32) {
    %c0_i32 = arith.constant 0 : i32
    %c0_i32_0 = arith.constant 0 : i32
    %c0_i32_1 = arith.constant 0 : i32
    return %arg0, %c0_i32, %c0_i32_0 : i32, i32, i32
  }
  func.func @transform_2(%arg0: i32) -> (i32, i32, i32) {
    %c0_i32 = arith.constant 0 : i32
    %c0_i32_0 = arith.constant 0 : i32
    %c0_i32_1 = arith.constant 0 : i32
    return %arg0, %c0_i32, %c0_i32_0 : i32, i32, i32
  }
  func.func @transform_3(%arg0: i32) -> (i32, i32) {
    %c0_i32 = arith.constant 0 : i32
    %c0_i32_0 = arith.constant 0 : i32
    %c0_i32_1 = arith.constant 0 : i32
    return %c0_i32, %c0_i32_0 : i32, i32
  }
  func.func @transform_4(%arg0: i32) -> (i32, i32) {
    %c0_i32 = arith.constant 0 : i32
    %c0_i32_0 = arith.constant 0 : i32
    %c0_i32_1 = arith.constant 0 : i32
    return %c0_i32, %c0_i32_0 : i32, i32
  }
  func.func @transform_5(%arg0: i32) -> (i32, i32) {
    %c0_i32 = arith.constant 0 : i32
    %c0_i32_0 = arith.constant 0 : i32
    %c0_i32_1 = arith.constant 0 : i32
    return %c0_i32, %c0_i32_0 : i32, i32
  }
  func.func @transform_6(%arg0: i32) -> (i32, i32) {
    %c0_i32 = arith.constant 0 : i32
    %c0_i32_0 = arith.constant 0 : i32
    %c0_i32_1 = arith.constant 0 : i32
    return %c0_i32, %c0_i32_0 : i32, i32
  }
  func.func @transform_7(%arg0: i32) -> (i32, i32, i32, i32) {
    %c0_i32 = arith.constant 0 : i32
    %c0_i32_0 = arith.constant 0 : i32
    %c0_i32_1 = arith.constant 0 : i32
    %c0_i32_2 = arith.constant 0 : i32
    return %arg0, %c0_i32, %c0_i32_0, %c0_i32_1 : i32, i32, i32, i32
  }
}

</mosaic_0001>

<bundles_post_ra>
// kernel: decoder_forward.11
= control target key start
LH: loop header
LB: loop body
LE: loop exit
PB: predicated region body
PF: predicated region fallthrough
CT: control target
= control target key end

     0   :  { %v152_v1 = vmov 0.0   ;;  %vm153_vm0 = vmmov 0   ;;  %s204_s0 = inlined_call_operand.vmem [shape: f32[16,32], index: 0, kind: input, shape index: {}]   ;;  %s205_s1 = inlined_call_operand.vmem [shape: bf16[32,50], index: 1, kind: input, shape index: {}]   ;;  %s206_s2 = inlined_call_operand.vmem [shape: f32[1,50], index: 2, kind: input, shape index: {}]   ;;  %s207_s3 = inlined_call_operand.hbm [shape: f32[16,50], index: 3, kind: output, shape index: {}]  }
   0x1   :  { %v126_v0 = vld [vmem:[%s205_s1] sm:$0xff]   ;;  %113 = vmatprep.subr.bf16.mxu0 %v152_v1  ;;  %v127_v2 = vld [vmem:[%s205_s1 + $0x8] sm:$0xff]   ;;  %117 = vmatprep.mubr.msk.bf16.mxu0 %vm153_vm0, %v152_v1 }
   0x2   :  { %114 = vmatpush3.bf16.msra.mxu0 %v126_v0  ;;  %v16_v3 = vld [vmem:[%s204_s0] sm:$0xff]  ;;  %v17_v4 = vld [vmem:[%s204_s0 + $0x8] sm:$0xff] }
   0x3   :  { %115 = vmatprep.subr.bf16.mxu0 %v152_v1 }
   0x4   :  { %8 = vsyncpa [#allocation3], 0  ;;  %v18_v5 = vpack.c.bf16 %v17_v4, %v16_v3  ;;  %vm42_vm1 = vcmask 261120   ;;  %v106_v6 = vld [vmem:[%s206_s2] ss:$0 sm:$0xff]  ;;  %s154_s1 = smov [#allocation2]  }
   0x5   :  { %s95_s22 = sshll.u32 %s154_s1, 4  ;;  %vm87_vm2 = vcmask 408576   ;;  %s96_s22 = int_to_ptr.vmem [resolvable:$true] %s95_s22 }
   0x6   :  { %116 = vmatpush3.bf16.msra.mxu0 %v127_v2  ;;  %s128_s0 = scalar_lea.vmem %s96_s22, 256  ;;  %p133_p1 = scmp.lt.s32.totalorder %s96_s22, %s96_s22 }
   0x7   :  { %p129_p0 = scmp.ne.s32.totalorder %s96_s22, %s128_s0  ;;  %p134_p2 = scmp.lt.s32.totalorder %s128_s0, %s128_s0 }
   0x9   :  { %118 = vmatmul.mubr.msk.bf16.vlgmr.msra.gmra.mrb[0].mxu0 %vm42_vm1, %v18_v5  ;;  %p135_p3 = por %p134_p2, %p133_p1 }
   0xb   :  { %p136_p4 = pnand %p135_p3, %p129_p0 }
  0xdc   :  { %v80_v7 = vpop.f32.mrb[0].mxu0 }
  0xdd   :  { %v81_v8 = vadd.f32 %v106_v6, %v80_v7  ;;  %v119_v9 = vpop.f32.mrb[1].mxu0 }
  0xde   :  { %v83_v10 = vpop.f32.mrb[2].mxu0 }
  0xdf   :  { %88 = vst.msk [vmem:[#allocation2] sm:$0xff] %vm87_vm2, %v81_v8  ;;  %v84_v11 = vadd.f32 %v106_v6, %v83_v10  ;;  %v120_v12 = vpop.f32.mrb[3].mxu0 }
  0xe1   :  { %89 = vst.msk [vmem:[#allocation2 + $0x8] sm:$0xff] %vm87_vm2, %v84_v11 }
  0xe2   :  { %139 = shalt.err (!%p136_p4)
}
  0xe3   :  { %s140_s24 = scalar_lea.hbm %s207_s3, 256 }
  0xe4   :  { %p141_p5 = scmp.ne.s32.totalorder %s207_s3, %s140_s24  ;;  %p144_p6 = scmp.lt.u32.totalorder %s140_s24, %s207_s3 }
  0xe6   :  { %p146_p7 = pnand %p144_p6, %p141_p5 }
  0xe8   :  { %149 = shalt.err (!%p146_p7)
}
  0xe9   :  { %s155_s29 = smov 128   ;;  %s156_s30 = smov 8  }
  0xea   :  { %101 = dma.vmem_to_hbm [thread:$0]  %s96_s22, 256, %s207_s3, [#allocation3], %s155_s29, %s155_s29, %s156_s30  }
  0xeb   :  { %150 = dma.done.wait [#allocation3], 256  }
  0xec   :  { %151 = vsyncadd [#allocation3], 4294967040 }
  0xed   :  { %105 = vsyncpa [#allocation3], 1 }

// kernel: decoder_forward.6
= control target key start
LH: loop header
LB: loop body
LE: loop exit
PB: predicated region body
PF: predicated region fallthrough
CT: control target
= control target key end

     0   :  { %s1676_s25 = smov 0   ;;  %s1678_s26 = smov 0   ;;  %s1848_s0 = inlined_call_operand.vmem [shape: f32[2,8,32], index: 0, kind: input, shape index: {}, may-alias: {0,1}]   ;;  %s1849_s1 = inlined_call_operand.vmem [shape: f32[2,8,32], index: 1, kind: input, shape index: {}, may-alias: {0,1}]   ;;  %s1850_s2 = inlined_call_operand.vmem [shape: f32[1,8,8], index: 2, kind: input, shape index: {}]   ;;  %s1851_s3 = inlined_call_operand.vmem [shape: bf16[32,32], index: 3, kind: input, shape index: {}]   ;;  %s1852_s4 = inlined_call_operand.vmem [shape: f32[1,32], index: 4, kind: input, shape index: {}]   ;;  %s1853_s5 = inlined_call_operand.vmem [shape: bf16[32,32], index: 5, kind: input, shape index: {}]   ;;  %s1854_s6 = inlined_call_operand.vmem [shape: f32[1,32], index: 6, kind: input, shape index: {}]   ;;  %s1855_s7 = inlined_call_operand.vmem [shape: bf16[32,32], index: 7, kind: input, shape index: {}]   ;;  %s1856_s8 = inlined_call_operand.vmem [shape: f32[1,32], index: 8, kind: input, shape index: {}]   ;;  %s1857_s9 = inlined_call_operand.vmem [shape: bf16[32,32], index: 9, kind: input, shape index: {}]   ;;  %s1858_s10 = inlined_call_operand.vmem [shape: f32[1,32], index: 10, kind: input, shape index: {}]   ;;  %s1859_s11 = inlined_call_operand.vmem [shape: f32[1,32], index: 11, kind: input, shape index: {}]   ;;  %s1860_s12 = inlined_call_operand.vmem [shape: f32[1,32], index: 12, kind: input, shape index: {}]   ;;  %s1861_s13 = inlined_call_operand.vmem [shape: f32[2,8,32], index: 13, kind: output, shape index: {}]  }
   0x1   :  { %s1680_s27 = smov 0  }
   0x2 LB: > { %s35_s28 = sadd.s32 1, %s1592_s26  ;;  %p1376_p0 = scmp.ge.s32.totalorder %s1596_s27, 1  ;;  %s1596_s27 = sphi %s1680_s27, %s23_s27   ;;  %s1592_s26 = sphi %s1678_s26, %s1863_s26   ;;  %s1588_s25 = sphi %s1676_s25, %s1862_s25  }
   0x3   : > { %p37_p1 = scmp.ge.s32.totalorder %s35_s28, 2  ;;  %p423_p2 = scmp.lt.s32.totalorder %s1596_s27, 3 }
   0x5   : > { %s1865_s28 = smov (%p37_p1, %s35_s28), 0  ;;  %p424_p3 = pnand %p1376_p0, %p423_p2 }
   0x6   : > { %v1548_v0 = vld [vmem:[%s1853_s5] sm:$0xff] (!%p424_p3)   ;;  %v1598_v1 = vmov (!%p424_p3), 0.0   ;;  %v1550_v3 = vld [vmem:[%s1853_s5 + $0x8] sm:$0xff] (!%p424_p3)   ;;  %vm1599_vm0 = vmmov (!%p424_p3), 0   ;;  %p479_p4 = scmp.lt.s32.totalorder (!%p424_p3), %s1588_s25, 1  ;;  %vm545_vm1 = vcmask (!%p424_p3), 261120  }
   0x7   : > { %427 = sbr.rel (%p424_p3) target bundleno = 1768 (0x6e8), region = 72  ;;  %1444 = vmatprep.subr.bf16.mxu1 (!%p424_p3), %v1598_v1  ;;  %1436 = vmatprep.subr.bf16.mxu0 (!%p424_p3), %v1598_v1  ;;  %v1549_v2 = vld [vmem:[%s1851_s3] sm:$0xff] (!%p424_p3)   ;;  %v1551_v4 = vld [vmem:[%s1851_s3 + $0x8] sm:$0xff] (!%p424_p3)   ;;  %vm711_vm2 = vcmask (!%p424_p3), 64512   ;;  %s1600_s17 = smov (!%p424_p3), 112   ;;  %vm775_vm3 = vcmask (!%p424_p3), 1043456  }
   0x8   : > { %1445 = vmatpush3.bf16.msra.mxu1 (!%p424_p3), %v1548_v0  ;;  %1448 = vmatprep.mubr.msk.bf16.mxu1 (!%p424_p3), %vm1599_vm0, %v1598_v1  ;;  %v1384_v9 = vld [vmem:[%s1854_s6] ss:$0 sm:$0xff] (!%p424_p3)  ;;  %s1601_s18 = smov (!%p424_p3), 120   ;;  %s1602_s19 = smov (!%p424_p3), 104   ;;  %v1553_v25 = vld [vmem:[%s1855_s7 + $0x8] sm:$0xff] (!%p424_p3)   ;;  %vm1171_vm4 = vcmask (!%p424_p3), 130048  }
   0x9   : > { %1446 = vmatprep.subr.bf16.mxu1 (!%p424_p3), %v1598_v1  ;;  %1437 = vmatpush3.bf16.msra.mxu0 (!%p424_p3), %v1549_v2  ;;  %v1380_v10 = vld [vmem:[%s1852_s4] ss:$0 sm:$0xff] (!%p424_p3)  ;;  %s1604_s21 = smov (!%p424_p3), 16   ;;  %s1605_s22 = smov (!%p424_p3), 24   ;;  %vm1173_vm5 = vcmask (!%p424_p3), 195584  }
   0xa   : > { %1438 = vmatprep.subr.bf16.mxu0 (!%p424_p3), %v1598_v1  ;;  %1440 = vmatprep.mubr.msk.bf16.mxu0 (!%p424_p3), %vm1599_vm0, %v1598_v1  ;;  %v1552_v24 = vld [vmem:[%s1855_s7] sm:$0xff] (!%p424_p3)  }
   0xb   : > { %v504_v36 = vld [vmem:[%s1850_s2] sm:$0xff] (!%p424_p3) }
   0xc   : > { %1447 = vmatpush3.bf16.msra.mxu1 (!%p424_p3), %v1550_v3  ;;  %v1388_v43 = vld [vmem:[%s1856_s8] ss:$0 sm:$0xff] (!%p424_p3) }
   0xd   : > { %1439 = vmatpush3.bf16.msra.mxu0 (!%p424_p3), %v1551_v4  ;;  %1460 = vmatprep.subr.bf16.mxu1 (!%p424_p3), %v1598_v1 }
   0xe   : > { %s1867_s25 = smov (!%p479_p4, %s1588_s25), 1  ;;  %1452 = vmatprep.subr.bf16.mxu0 %v1598_v1 }
   0xf   : > { %s1714_s20 = sshll.u32 %s1867_s25, 3 }
  0x10   : > { %s489_s23 = scalar_lea.vmem %s1849_s1, %s1714_s20  ;;  %s485_s30 = scalar_lea.vmem %s1848_s0, %s1714_s20 }
  0x11   : > { %v503_v5 = vld [vmem:[%s489_s23] sm:$0xff] }
  0x12   : > { %v526_v6 = vpack.c.bf16 %v503_v5, %v503_v5  ;;  %v1726_v7 = vld [vmem:[%s485_s30] sm:$0xff] }
  0x13   : > { %v525_v8 = vpack.c.bf16 %v1726_v7, %v1726_v7 }
  0x14   : > { %1449 = vmatmul.mubr.msk.bf16.vlgmr.msra.gmra.mrb[0].mxu1 %vm545_vm1, %v526_v6 }
  0x15   : > { %1441 = vmatmul.mubr.msk.bf16.vlgmr.msra.gmra.mrb[0].mxu0 %vm545_vm1, %v525_v8  ;;  %1462 = vmatprep.mubr.msk.bf16.mxu1 %vm1599_vm0, %v1598_v1 }
  0x16   : > { %1456 = vmatprep.mubr.msk.bf16.mxu0 %vm1599_vm0, %v1598_v1  ;;  %1453 = vmatpush3.bf16.msra.mxu0 %v1552_v24 }
  0x17   : > { %1454 = vmatprep.subr.bf16.mxu0 %v1598_v1 }
  0x1a   : > { %1455 = vmatpush3.bf16.msra.mxu0 %v1553_v25 }
  0x1b   : > { %1466 = vmatprep.subr.bf16.mxu0 %v1598_v1 }
  0x1d   : > { %1457 = vmatmul.mubr.msk.bf16.vlgmr.msra.gmra.mrb[4].mxu0 %vm545_vm1, %v526_v6 }
  0x1e   : > { %1468 = vmatprep.mubr.msk.bf16.mxu0 %vm1599_vm0, %v1598_v1 }
  0xe7   : > { %v645_v11 = vpop.f32.mrb[0].mxu1 }
  0xe8   : > { %v646_v12 = vadd.f32 %v1384_v9, %v645_v11  ;;  %v1450_v13 = vpop.f32.mrb[1].mxu1  ;;  %v583_v14 = vpop.f32.mrb[0].mxu0 }
  0xe9   : > { %v648_v15 = vpop.f32.mrb[2].mxu1  ;;  %v584_v16 = vadd.f32 %v1380_v10, %v583_v14  ;;  %v1442_v17 = vpop.f32.mrb[1].mxu0 }
  0xea   : > { %v651_v18 = vpack.c.bf16 %v646_v12, %v646_v12  ;;  %v1451_v19 = vpop.f32.mrb[3].mxu1  ;;  %v586_v20 = vpop.f32.mrb[2].mxu0 }
  0xeb   : > { %v1443_v21 = vpop.f32.mrb[3].mxu0  ;;  %v589_v22 = vpack.c.bf16 %v584_v16, %v584_v16 }
  0xec   : > { %936 = vrot.lane.b32.xlu1 %v651_v18, %s1600_s17  ;;  %823 = vrot.lane.b32.xlu0 %v651_v18, %s1601_s18  ;;  %v716_v23 = vsel %vm711_vm2, %v651_v18, 0 }
  0xed   : > { %1461 = vmatpush3.bf16.xpose.msra.mxu1 %v716_v23 }
  0xee   : > { %1472 = vmatprep.subr.bf16.mxu1 %v1598_v1 }
  0xf0   : > { %934 = vrot.lane.b32.xlu1 %v589_v22, %s1600_s17  ;;  %820 = vrot.lane.b32.xlu0 %v589_v22, %s1601_s18  ;;  %v704_v44 = vpop.f32.mrb[4].mxu0 }
  0xf1   : > { %v705_v45 = vadd.f32 %v1388_v43, %v704_v44  ;;  %v1458_v46 = vpop.f32.mrb[5].mxu0 }
  0xf2   : > { %v707_v47 = vpop.f32.mrb[6].mxu0 }
  0xf3   : > { %v710_v48 = vpack.c.bf16 %v705_v45, %v705_v45  ;;  %v1459_v49 = vpop.f32.mrb[7].mxu0 }
  0xf4   : > { %1046 = vrot.lane.b32.xlu1 %v589_v22, %s1602_s19  ;;  %1048 = vrot.lane.b32.xlu0 %v651_v18, %s1602_s19 }
  0xf5   : > { %1463 = vmatmul.mubr.msk.bf16.vlgmr.msra.gmra.mrb[4].mxu1 %vm711_vm2, %v589_v22  ;;  %v777_v50 = vsel %vm775_vm3, %v710_v48, 0 }
  0xf6   : > { %1474 = vmatprep.mubr.msk.bf16.mxu1 %vm1599_vm0, %v1598_v1  ;;  %1467 = vmatpush3.bf16.msra.mxu0 %v777_v50 }
  0xf7   : > { %1478 = vmatprep.subr.bf16.mxu0 %v1598_v1 }
 0x15e   : > { %v824_v26 = vpop.permute.xlu0 %823  ;;  %v937_v28 = vpop.permute.xlu1 %936 }
 0x15f   : > { %v829_v27 = vsel %vm711_vm2, %v824_v26, 0  ;;  %v942_v30 = vsel %vm711_vm2, %v937_v28, 0 }
 0x160   : > { %1473 = vmatpush3.bf16.xpose.msra.mxu1 %v829_v27 }
 0x161   : > { %1484 = vmatprep.subr.bf16.mxu1 %v1598_v1 }
 0x162   : > { %v821_v29 = vpop.permute.xlu0 %820  ;;  %v935_v32 = vpop.permute.xlu1 %934 }
 0x166   : > { %v1049_v31 = vpop.permute.xlu0 %1048  ;;  %v1047_v34 = vpop.permute.xlu1 %1046 }
 0x167   : > { %1475 = vmatmul.mubr.msk.bf16.vlgmr.msra.gmra.mrb[8].mxu1 %vm711_vm2, %v821_v29  ;;  %v1054_v33 = vsel %vm711_vm2, %v1049_v31, 0 }
 0x168   : > { %1485 = vmatpush3.bf16.xpose.msra.mxu1 %v942_v30  ;;  %1486 = vmatprep.mubr.msk.bf16.mxu1 %vm1599_vm0, %v1598_v1 }
 0x169   : > { %1496 = vmatprep.subr.bf16.mxu1 %v1598_v1 }
 0x16f   : > { %1487 = vmatmul.mubr.msk.bf16.vlgmr.msra.gmra.mrb[12].mxu1 %vm711_vm2, %v935_v32 }
 0x170   : > { %1497 = vmatpush3.bf16.xpose.msra.mxu1 %v1054_v33  ;;  %1498 = vmatprep.mubr.msk.bf16.mxu1 %vm1599_vm0, %v1598_v1 }
 0x171   : > { %1508 = vmatprep.subr.bf16.mxu1 %v1598_v1 }
 0x177   : > { %1499 = vmatmul.mubr.msk.bf16.vlgmr.msra.gmra.mrb[16].mxu1 %vm711_vm2, %v1047_v34 }
 0x178   : > { %1512 = vmatprep.mubr.msk.bf16.mxu1 %vm1599_vm0, %v1598_v1 }
 0x1c8   : > { %v752_v35 = vpop.f32.mrb[4].mxu1 }
 0x1c9   : > { %v758_v37 = vmul.f32 0.35355338, %v752_v35  ;;  %v1464_v38 = vpop.f32.mrb[5].mxu1 }
 0x1ca   : > { %v755_v39 = vpop.f32.mrb[6].mxu1 }
 0x1cb   : > { %v1465_v40 = vpop.f32.mrb[7].mxu1  ;;  %v759_v41 = vadd.f32 %v758_v37, %v504_v36 }
 0x1cd   : > { %v760_v42 = vsel %vm711_vm2, %v759_v41, -inf }
 0x1ce   : > { %761 = vmax.xlane.f32.xlu0 %v760_v42 }
 0x23a   : > { %v865_v51 = vpop.f32.mrb[8].mxu1 }
 0x23b   : > { %v871_v52 = vmul.f32 0.35355338, %v865_v51  ;;  %v1476_v53 = vpop.f32.mrb[9].mxu1 }
 0x23c   : > { %v868_v54 = vpop.f32.mrb[10].mxu1 }
 0x23d   : > { %v1477_v55 = vpop.f32.mrb[11].mxu1  ;;  %v872_v56 = vadd.f32 %v871_v52, %v504_v36 }
 0x23f   : > { %v873_v57 = vsel %vm711_vm2, %v872_v56, -inf }
 0x240   : > { %874 = vmax.xlane.f32.xlu1 %v873_v57 }
 0x242   : > { %v978_v58 = vpop.f32.mrb[12].mxu1 }
 0x243   : > { %v984_v59 = vmul.f32 0.35355338, %v978_v58  ;;  %v1488_v60 = vpop.f32.mrb[13].mxu1 }
 0x244   : > { %v981_v61 = vpop.f32.mrb[14].mxu1 }
 0x245   : > { %v1489_v62 = vpop.f32.mrb[15].mxu1  ;;  %v985_v63 = vadd.f32 %v984_v59, %v504_v36  ;;  %v1555_v61 = vld [vmem:[%s1857_s9 + $0x8] sm:$0xff]  }
 0x247   : > { %v986_v0 = vsel %vm711_vm2, %v985_v63, -inf }
 0x248   : > { %987 = vmax.xlane.f32.xlu0 %v986_v0 }
 0x24a   : > { %v1090_v2 = vpop.f32.mrb[16].mxu1 }
 0x24b   : > { %v1096_v3 = vmul.f32 0.35355338, %v1090_v2  ;;  %v1500_v4 = vpop.f32.mrb[17].mxu1 }
 0x24c   : > { %v1093_v5 = vpop.f32.mrb[18].mxu1 }
 0x24d   : > { %v1501_v6 = vpop.f32.mrb[19].mxu1  ;;  %v1097_v8 = vadd.f32 %v1096_v3, %v504_v36 }
 0x24f   : > { %v1098_v9 = vsel %vm711_vm2, %v1097_v8, -inf }
 0x250   : > { %1099 = vmax.xlane.f32.xlu0 %v1098_v9 }
 0x25b   : > { %v762_v10 = vpop.xlane.xlu0 %761 }
 0x25c   : > { %v763_v11 = vsub.f32 %v759_v41, %v762_v10 }
 0x25e   : > { %v764_v12 = vmul.f32 1.442695, %v763_v11 }
 0x260   : > { %1556 = vpow2.f32 %v764_v12 }
 0x26a   : > { %v1557_v13 = vpop.eup %1556 }
 0x26b   : > { %v766_v14 = vsel %vm711_vm2, %v1557_v13, 0.0 }
 0x26c   : > { %767 = vadd.xlane.f32.xlu1 %v766_v14  ;;  %v1400_v14 = vld [vmem:[%s1858_s10] ss:$0 sm:$0xff] }
 0x27d   : > { %886 = vrot.lane.b32.xlu1 %v710_v48, %s1601_s18 }
 0x2cd   : > { %v875_v15 = vpop.xlane.xlu1 %874 }
 0x2ce   : > { %v876_v16 = vsub.f32 %v872_v56, %v875_v15  ;;  %v1554_v56 = vld [vmem:[%s1857_s9] sm:$0xff]  }
 0x2cf   : > { %1509 = vmatpush3.bf16.msra.mxu1 %v1554_v56 }
 0x2d0   : > { %v877_v17 = vmul.f32 1.442695, %v876_v16  ;;  %1510 = vmatprep.subr.bf16.mxu1 %v1598_v1 }
 0x2d2   : > { %1558 = vpow2.f32 %v877_v17 }
 0x2d3   : > { %1511 = vmatpush3.bf16.msra.mxu1 %v1555_v61 }
 0x2d5   : > { %v988_v18 = vpop.xlane.xlu0 %987 }
 0x2d6   : > { %v989_v19 = vsub.f32 %v985_v63, %v988_v18 }
 0x2d8   : > { %v990_v20 = vmul.f32 1.442695, %v989_v19 }
 0x2da   : > { %1560 = vpow2.f32 %v990_v20 }
 0x2dc   : > { %v1559_v21 = vpop.eup %1558 }
 0x2dd   : > { %v1100_v22 = vpop.xlane.xlu0 %1099  ;;  %v879_v23 = vsel %vm711_vm2, %v1559_v21, 0.0 }
 0x2de   : > { %v1101_v24 = vsub.f32 %v1097_v8, %v1100_v22  ;;  %880 = vadd.xlane.f32.xlu0 %v879_v23 }
 0x2e0   : > { %v1102_v25 = vmul.f32 1.442695, %v1101_v24 }
 0x2e2   : > { %1562 = vpow2.f32 %v1102_v25 }
 0x2e4   : > { %v1561_v26 = vpop.eup %1560 }
 0x2e5   : > { %v992_v27 = vsel %vm711_vm2, %v1561_v26, 0.0 }
 0x2e6   : > { %993 = vadd.xlane.f32.xlu1 %v992_v27 }
 0x2ec   : > { %v1563_v28 = vpop.eup %1562 }
 0x2ed   : > { %v1104_v29 = vsel %vm711_vm2, %v1563_v28, 0.0 }
 0x2ee   : > { %1105 = vadd.xlane.f32.xlu0 %v1104_v29 }
 0x2f7   : > { %1110 = vrot.lane.b32.xlu1 %v710_v48, %s1602_s19 }
 0x2f9   : > { %v768_v30 = vpop.xlane.xlu1 %767 }
 0x2fa   : > { %1564 = vrcp.f32 %v768_v30 }
 0x2fd   : > { %v887_v32 = vpop.permute.xlu1 %886 }
 0x2fe   : > { %v892_v35 = vsel %vm775_vm3, %v887_v32, 0  ;;  %v1405_v32 = vld [vmem:[%s1860_s12] ss:$0 sm:$0xff] }
 0x304   : > { %v1565_v31 = vpop.eup %1564  ;;  %998 = vrot.lane.b32.xlu0 %v710_v48, %s1600_s17  ;;  %s1603_s17 = smov 8  }
 0x305   : > { %v770_v33 = vmul.f32 %v1565_v31, %v1557_v13 }
 0x307   : > { %v771_v34 = vpack.c.bf16 %v770_v33, %v770_v33 }
 0x309   : > { %1469 = vmatmul.mubr.msk.bf16.vlgmr.msra.gmra.mrb[8].mxu0 %vm711_vm2, %v771_v34 }
 0x30a   : > { %1479 = vmatpush3.bf16.msra.mxu0 %v892_v35  ;;  %1480 = vmatprep.mubr.msk.bf16.mxu0 %vm1599_vm0, %v1598_v1 }
 0x30b   : > { %1490 = vmatprep.subr.bf16.mxu0 %v1598_v1 }
 0x36b   : > { %v881_v36 = vpop.xlane.xlu0 %880 }
 0x36c   : > { %1566 = vrcp.f32 %v881_v36 }
 0x373   : > { %v994_v37 = vpop.xlane.xlu1 %993 }
 0x374   : > { %1568 = vrcp.f32 %v994_v37 }
 0x376   : > { %v1567_v38 = vpop.eup %1566 }
 0x377   : > { %v883_v39 = vmul.f32 %v1567_v38, %v1559_v21  ;;  %v1111_v46 = vpop.permute.xlu1 %1110 }
 0x378   : > { %v1116_v48 = vsel %vm775_vm3, %v1111_v46, 0 }
 0x379   : > { %v884_v40 = vpack.c.bf16 %v883_v39, %v883_v39 }
 0x37b   : > { %v1106_v41 = vpop.xlane.xlu0 %1105  ;;  %1481 = vmatmul.mubr.msk.bf16.vlgmr.msra.gmra.mrb[12].mxu0 %vm711_vm2, %v884_v40 }
 0x37c   : > { %1570 = vrcp.f32 %v1106_v41  ;;  %1492 = vmatprep.mubr.msk.bf16.mxu0 %vm1599_vm0, %v1598_v1 }
 0x37e   : > { %v1569_v42 = vpop.eup %1568 }
 0x37f   : > { %v996_v43 = vmul.f32 %v1569_v42, %v1561_v26  ;;  %v999_v44 = vpop.permute.xlu0 %998 }
 0x380   : > { %v1004_v45 = vsel %vm775_vm3, %v999_v44, 0 }
 0x381   : > { %1491 = vmatpush3.bf16.msra.mxu0 %v1004_v45  ;;  %v997_v47 = vpack.c.bf16 %v996_v43, %v996_v43 }
 0x382   : > { %1502 = vmatprep.subr.bf16.mxu0 %v1598_v1 }
 0x384   : > { %1493 = vmatmul.mubr.msk.bf16.vlgmr.msra.gmra.mrb[16].mxu0 %vm711_vm2, %v997_v47 }
 0x385   : > { %1503 = vmatpush3.bf16.msra.mxu0 %v1116_v48  ;;  %1504 = vmatprep.mubr.msk.bf16.mxu0 %vm1599_vm0, %v1598_v1 }
 0x386   : > { %v1571_v49 = vpop.eup %1570 }
 0x387   : > { %v1108_v50 = vmul.f32 %v1571_v49, %v1563_v28 }
 0x389   : > { %v1109_v51 = vpack.c.bf16 %v1108_v50, %v1108_v50 }
 0x38c   : > { %1505 = vmatmul.mubr.msk.bf16.vlgmr.msra.gmra.mrb[20].mxu0 %vm711_vm2, %v1109_v51 }
 0x3dc   : > { %v813_v52 = vpop.f32.mrb[8].mxu0 }
 0x3dd   : > { %v1470_v53 = vpop.f32.mrb[9].mxu0 }
 0x3de   : > { %v816_v54 = vpop.f32.mrb[10].mxu0 }
 0x3df   : > { %v1471_v55 = vpop.f32.mrb[11].mxu0 }
 0x44e   : > { %v928_v57 = vpop.f32.mrb[12].mxu0 }
 0x44f   : > { %1159 = vrot.lane.b32.xlu1 %v928_v57, %s1603_s17  ;;  %v1482_v58 = vpop.f32.mrb[13].mxu0  ;;  %s500_s17 = scalar_lea.vmem %s1861_s13, %s1714_s20 }
 0x450   : > { %v931_v59 = vpop.f32.mrb[14].mxu0 }
 0x451   : > { %v1483_v60 = vpop.f32.mrb[15].mxu0 }
 0x457   : > { %v1040_v62 = vpop.f32.mrb[16].mxu0 }
 0x458   : > { %1163 = vrot.lane.b32.xlu0 %v1040_v62, %s1604_s21  ;;  %v1494_v63 = vpop.f32.mrb[17].mxu0 }
 0x459   : > { %v1043_v0 = vpop.f32.mrb[18].mxu0 }
 0x45a   : > { %v1495_v2 = vpop.f32.mrb[19].mxu0 }
 0x45f   : > { %v1152_v3 = vpop.f32.mrb[20].mxu0 }
 0x460   : > { %1167 = vrot.lane.b32.xlu1 %v1152_v3, %s1605_s22  ;;  %v1506_v1 = vpop.f32.mrb[21].mxu0 }
 0x461   : > { %v1155_v4 = vpop.f32.mrb[22].mxu0 }
 0x462   : > { %v1507_v5 = vpop.f32.mrb[23].mxu0 }
 0x4c1   : > { %v1160_v6 = vpop.permute.xlu1 %1159 }
 0x4c2   : > { %v1170_v9 = vsel %vm711_vm2, %v813_v52, %v1160_v6 }
 0x4ca   : > { %v1164_v8 = vpop.permute.xlu0 %1163 }
 0x4cb   : > { %v1172_v10 = vsel %vm1171_vm4, %v1170_v9, %v1164_v8 }
 0x4d2   : > { %v1168_v11 = vpop.permute.xlu1 %1167 }
 0x4d3   : > { %v1174_v12 = vsel %vm1173_vm5, %v1172_v10, %v1168_v11 }
 0x4d4   : > { %v1175_v13 = vpack.c.bf16 %v1174_v12, %v1174_v12 }
 0x4d6   : > { %1513 = vmatmul.mubr.msk.bf16.vlgmr.msra.gmra.mrb[20].mxu1 %vm545_vm1, %v1175_v13 }
 0x5a9   : > { %v1231_v15 = vpop.f32.mrb[20].mxu1 }
 0x5aa   : > { %v1232_v16 = vadd.f32 %v1400_v14, %v1231_v15  ;;  %v1514_v17 = vpop.f32.mrb[21].mxu1 }
 0x5ab   : > { %v1234_v18 = vpop.f32.mrb[22].mxu1 }
 0x5ac   : > { %v1515_v19 = vpop.f32.mrb[23].mxu1  ;;  %v1237_v20 = vadd.f32 %v1232_v16, %v1726_v7  ;;  %v1404_v7 = vld [vmem:[%s1859_s11] ss:$0 sm:$0xff] }
 0x5ae   : > { %v1240_v21 = vsel %vm545_vm1, %v1237_v20, 0.0 }
 0x5af   : > { %1241 = vadd.xlane.f32.xlu0 %v1240_v21 }
 0x63c   : > { %v1242_v22 = vpop.xlane.xlu0 %1241 }
 0x63d   : > { %v1244_v23 = vmul.f32 0.03125, %v1242_v22 }
 0x63f   : > { %v1245_v24 = vsub.f32 %v1237_v20, %v1244_v23 }
 0x641   : > { %v1246_v25 = vmul.f32 %v1245_v24, %v1245_v24 }
 0x643   : > { %v1247_v26 = vsel %vm545_vm1, %v1246_v25, 0.0 }
 0x644   : > { %1248 = vadd.xlane.f32.xlu1 %v1247_v26 }
 0x6d1   : > { %v1249_v27 = vpop.xlane.xlu1 %1248 }
 0x6d2   : > { %v1250_v28 = vmul.f32 0.03125, %v1249_v27 }
 0x6d4   : > { %v1251_v29 = vadd.f32 1e-05, %v1250_v28 }
 0x6d6   : > { %1572 = vrsqrt.f32 %v1251_v29 }
 0x6e0   : > { %v1573_v30 = vpop.eup %1572 }
 0x6e1   : > { %v1253_v31 = vmul.f32 %v1573_v30, %v1245_v24 }
 0x6e3   : > { %v1260_v33 = vmul.f32 %v1404_v7, %v1253_v31 }
 0x6e5   : > { %v1267_v34 = vadd.f32 %v1405_v32, %v1260_v33 }
 0x6e7   : > { %1268 = vst.msk [vmem:[%s500_s17] sm:$0xff] %vm545_vm1, %v1267_v34 }
 0x6e8 PF: > { %s23_s27 = sadd.s32 1, %s1596_s27   ;;  %s1862_s25 = smov %s1592_s26 }
 0x6e9   : > { %p20_p5 = scmp.ge.s32.totalorder %s23_s27, 4   ;;  %s1863_s26 = smov %s1865_s28 }
 0x6eb   :  { %22 = sbr.rel (!%p20_p5) target bundleno = 2 (0x2), region = 108 }

// kernel: decoder_forward.7
= control target key start
LH: loop header
LB: loop body
LE: loop exit
PB: predicated region body
PF: predicated region fallthrough
CT: control target
= control target key end

     0   :  { %s2119_s30 = smov 0   ;;  %s2121_s20 = smov 0   ;;  %s2332_s0 = inlined_call_operand.vmem [shape: f32[2,8,32], index: 0, kind: input, shape index: {}]   ;;  %s2333_s1 = inlined_call_operand.vmem [shape: f32[2,10,32], index: 1, kind: input, shape index: {}]   ;;  %s2334_s2 = inlined_call_operand.vmem [shape: f32[2,8,10], index: 2, kind: input, shape index: {}]   ;;  %s2335_s3 = inlined_call_operand.vmem [shape: bf16[32,32], index: 3, kind: input, shape index: {}]   ;;  %s2336_s4 = inlined_call_operand.vmem [shape: f32[1,32], index: 4, kind: input, shape index: {}]   ;;  %s2337_s5 = inlined_call_operand.vmem [shape: bf16[32,32], index: 5, kind: input, shape index: {}]   ;;  %s2338_s6 = inlined_call_operand.vmem [shape: f32[1,32], index: 6, kind: input, shape index: {}]   ;;  %s2339_s7 = inlined_call_operand.vmem [shape: bf16[32,32], index: 7, kind: input, shape index: {}]   ;;  %s2340_s8 = inlined_call_operand.vmem [shape: f32[1,32], index: 8, kind: input, shape index: {}]   ;;  %s2341_s9 = inlined_call_operand.vmem [shape: bf16[32,32], index: 9, kind: input, shape index: {}]   ;;  %s2342_s10 = inlined_call_operand.vmem [shape: f32[1,32], index: 10, kind: input, shape index: {}]   ;;  %s2343_s11 = inlined_call_operand.vmem [shape: f32[1,32], index: 11, kind: input, shape index: {}]   ;;  %s2344_s12 = inlined_call_operand.vmem [shape: f32[1,32], index: 12, kind: input, shape index: {}]   ;;  %s2345_s13 = inlined_call_operand.vmem [shape: bf16[32,64], index: 13, kind: input, shape index: {}]   ;;  %s2346_s14 = inlined_call_operand.vmem [shape: f32[1,64], index: 14, kind: input, shape index: {}]   ;;  %s2347_s15 = inlined_call_operand.vmem [shape: bf16[64,32], index: 15, kind: input, shape index: {}]   ;;  %s2348_s16 = inlined_call_operand.vmem [shape: f32[1,32], index: 16, kind: input, shape index: {}]   ;;  %s2349_s17 = inlined_call_operand.vmem [shape: f32[1,32], index: 17, kind: input, shape index: {}]   ;;  %s2350_s18 = inlined_call_operand.vmem [shape: f32[1,32], index: 18, kind: input, shape index: {}]   ;;  %s2351_s19 = inlined_call_operand.vmem [shape: f32[2,8,32], index: 19, kind: output, shape index: {}]  }
   0x1   :  { %2353 = sst [smem:[#allocation3_spill]] %s2332_s0  ;;  %s2117_s0 = smov 0  }
   0x2   :  { %2354 = sst [smem:[#allocation4_spill]] %s2333_s1 }
   0x3   :  { %2355 = sst [smem:[#allocation5_spill]] %s2334_s2 }
   0x4   :  { %2356 = sst [smem:[#allocation6_spill]] %s2335_s3 }
   0x5   :  { %2357 = sst [smem:[#allocation7_spill]] %s2337_s5 }
   0x6 LB: > { %s41_s21 = sadd.s32 1, %s2003_s30  ;;  %p1736_p0 = scmp.ge.s32.totalorder %s2007_s20, 1  ;;  %s2007_s20 = sphi %s2121_s20, %s29_s20   ;;  %s2003_s30 = sphi %s2119_s30, %s2366_s30   ;;  %s1999_s0 = sphi %s2117_s0, %s2365_s0  }
   0x7   : > { %p43_p1 = scmp.ge.s32.totalorder %s41_s21, 2  ;;  %p579_p2 = scmp.lt.s32.totalorder %s2007_s20, 3 }
   0x9   : > { %s2368_s21 = smov (%p43_p1, %s41_s21), 0  ;;  %p580_p3 = pnand %p1736_p0, %p579_p2 }
   0xa   : > { %2358 = sst [smem:[#allocation2_spill]] %s2368_s21  ;;  %s2359_s5 = sld [smem:[#allocation7_spill]] (!%p580_p3)  ;;  %v2009_v1 = vmov (!%p580_p3), 0.0   ;;  %vm2010_vm0 = vmmov (!%p580_p3), 0   ;;  %vm722_vm1 = vcmask (!%p580_p3), 261120   ;;  %vm890_vm2 = vcmask (!%p580_p3), 64512  }
   0xb   : > { %583 = sbr.rel (%p580_p3) target bundleno = 2523 (0x9db), region = 96  ;;  %1827 = vmatprep.subr.bf16.mxu1 (!%p580_p3), %v2009_v1  ;;  %1819 = vmatprep.subr.bf16.mxu0 (!%p580_p3), %v2009_v1  ;;  %s2360_s3 = sld [smem:[#allocation6_spill]] (!%p580_p3)  ;;  %v1746_v10 = vld [vmem:[%s2338_s6] ss:$0 sm:$0xff] (!%p580_p3)  ;;  %v1956_v27 = vld [vmem:[%s2339_s7 + $0x8] sm:$0xff] (!%p580_p3)   ;;  %vm939_vm3 = vcmask (!%p580_p3), 80896  }
   0xc   : > { %1831 = vmatprep.mubr.msk.bf16.mxu1 (!%p580_p3), %vm2010_vm0, %v2009_v1  ;;  %p651_p4 = scmp.lt.s32.totalorder (!%p580_p3), %s1999_s0, 1  ;;  %1823 = vmatprep.mubr.msk.bf16.mxu0 (!%p580_p3), %vm2010_vm0, %v2009_v1  ;;  %s2361_s2 = sld [smem:[#allocation4_spill]] (!%p580_p3)  ;;  %v1742_v12 = vld [vmem:[%s2336_s4] ss:$0 sm:$0xff] (!%p580_p3)  ;;  %vm955_vm4 = vcmask (!%p580_p3), 1044480   ;;  %vm1351_vm5 = vcmask (!%p580_p3), 130048  }
   0xd   : > { %s2011_s27 = smov (!%p580_p3), 112   ;;  %s2013_s1 = smov (!%p580_p3), 104   ;;  %v1955_v26 = vld [vmem:[%s2339_s7] sm:$0xff] (!%p580_p3)   ;;  %vm1353_vm6 = vcmask (!%p580_p3), 195584   ;;  %vm1556_vm7 = vcmask (!%p580_p3), 523264  }
   0xe   : > { %v1750_v45 = vld [vmem:[%s2340_s8] ss:$0 sm:$0xff] (!%p580_p3)  ;;  %s2015_s24 = smov (!%p580_p3), 16   ;;  %s2016_s25 = smov (!%p580_p3), 24  }
  0x10   : > { %v1951_v0 = vld [vmem:[%s2359_s5] sm:$0xff] (!%p580_p3)   ;;  %v1952_v2 = vld [vmem:[%s2359_s5 + $0x8] sm:$0xff] (!%p580_p3)   ;;  %s2362_s5 = sld [smem:[#allocation3_spill]] (!%p580_p3) }
  0x11   : > { %1828 = vmatpush3.bf16.msra.mxu1 (!%p580_p3), %v1951_v0  ;;  %v1953_v3 = vld [vmem:[%s2360_s3] sm:$0xff] (!%p580_p3)   ;;  %v1954_v4 = vld [vmem:[%s2360_s3 + $0x8] sm:$0xff] (!%p580_p3)  }
  0x12   : > { %1829 = vmatprep.subr.bf16.mxu1 %v2009_v1  ;;  %1820 = vmatpush3.bf16.msra.mxu0 %v1953_v3  ;;  %s2370_s0 = smov (!%p651_p4, %s1999_s0), 1 }
  0x13   : > { %1821 = vmatprep.subr.bf16.mxu0 %v2009_v1  ;;  %s1782_s28 = sshll.u32 %s2370_s0, 4  ;;  %s2155_s29 = sshll.u32 %s2370_s0, 3 }
  0x14   : > { %s662_s23 = scalar_lea.vmem %s2361_s2, %s1782_s28  ;;  %s2012_s28 = smov 120  }
  0x15   : > { %1830 = vmatpush3.bf16.msra.mxu1 %v1952_v2  ;;  %v679_v5 = vld [vmem:[%s662_s23] sm:$0xff]  ;;  %v680_v6 = vld [vmem:[%s662_s23 + $0x8] sm:$0x3]  ;;  %s2363_s0 = sld [smem:[#allocation5_spill]]  ;;  %s676_s22 = scalar_lea.vmem %s2351_s19, %s2155_s29 }
  0x16   : > { %s657_s21 = scalar_lea.vmem %s2362_s5, %s2155_s29  ;;  %1843 = vmatprep.subr.bf16.mxu1 %v2009_v1  ;;  %1822 = vmatpush3.bf16.msra.mxu0 %v1954_v4  ;;  %v703_v8 = vpack.c.bf16 %v680_v6, %v679_v5 }
  0x17   : > { %v2165_v7 = vld [vmem:[%s657_s21] sm:$0xff]  ;;  %1835 = vmatprep.subr.bf16.mxu0 %v2009_v1 }
  0x18   : > { %v702_v9 = vpack.c.bf16 %v2165_v7, %v2165_v7  ;;  %1832 = vmatmul.mubr.msk.bf16.vlgmr.msra.gmra.mrb[0].mxu1 %vm722_vm1, %v703_v8 }
  0x19   : > { %1845 = vmatprep.mubr.msk.bf16.mxu1 %vm2010_vm0, %v2009_v1 }
  0x1a   : > { %1824 = vmatmul.mubr.msk.bf16.vlgmr.msra.gmra.mrb[0].mxu0 %vm722_vm1, %v702_v9 }
  0x1b   : > { %1839 = vmatprep.mubr.msk.bf16.mxu0 %vm2010_vm0, %v2009_v1  ;;  %1836 = vmatpush3.bf16.msra.mxu0 %v1955_v26  ;;  %s669_s21 = scalar_lea.vmem %s2363_s0, %s2155_s29 }
  0x1c   : > { %1837 = vmatprep.subr.bf16.mxu0 %v2009_v1  ;;  %v681_v38 = vld [vmem:[%s669_s21] sm:$0xff] }
  0x1f   : > { %1838 = vmatpush3.bf16.msra.mxu0 %v1956_v27 }
  0x20   : > { %1849 = vmatprep.subr.bf16.mxu0 %v2009_v1 }
  0x22   : > { %1840 = vmatmul.mubr.msk.bf16.vlgmr.msra.gmra.mrb[4].mxu0 %vm722_vm1, %v703_v8 }
  0x23   : > { %1851 = vmatprep.mubr.msk.bf16.mxu0 %vm2010_vm0, %v2009_v1 }
  0xeb   : > { %v822_v11 = vpop.f32.mrb[0].mxu1 }
  0xec   : > { %v1833_v14 = vpop.f32.mrb[1].mxu1  ;;  %v823_v18 = vadd.f32 %v1746_v10, %v822_v11 }
  0xed   : > { %v760_v13 = vpop.f32.mrb[0].mxu0  ;;  %v825_v16 = vpop.f32.mrb[2].mxu1 }
  0xee   : > { %v1825_v15 = vpop.f32.mrb[1].mxu0  ;;  %v826_v19 = vadd.f32 %v1746_v10, %v825_v16  ;;  %v1834_v20 = vpop.f32.mrb[3].mxu1  ;;  %v761_v21 = vadd.f32 %v1742_v12, %v760_v13 }
  0xef   : > { %v763_v17 = vpop.f32.mrb[2].mxu0 }
  0xf0   : > { %v1826_v22 = vpop.f32.mrb[3].mxu0  ;;  %v829_v23 = vpack.c.bf16 %v826_v19, %v823_v18  ;;  %v766_v24 = vpack.c.bf16 %v761_v21, %v761_v21 }
  0xf2   : > { %1116 = vrot.lane.b32.xlu1 %v829_v23, %s2011_s27  ;;  %1003 = vrot.lane.b32.xlu0 %v829_v23, %s2012_s28  ;;  %v895_v25 = vsel %vm890_vm2, %v829_v23, 0 }
  0xf3   : > { %1844 = vmatpush3.bf16.xpose.msra.mxu1 %v895_v25 }
  0xf4   : > { %1855 = vmatprep.subr.bf16.mxu1 %v2009_v1 }
  0xf5   : > { %v882_v46 = vpop.f32.mrb[4].mxu0 }
  0xf6   : > { %1114 = vrot.lane.b32.xlu1 %v766_v24, %s2011_s27  ;;  %1000 = vrot.lane.b32.xlu0 %v766_v24, %s2012_s28  ;;  %v883_v47 = vadd.f32 %v1750_v45, %v882_v46  ;;  %v1841_v48 = vpop.f32.mrb[5].mxu0 }
  0xf7   : > { %v885_v49 = vpop.f32.mrb[6].mxu0 }
  0xf8   : > { %v886_v50 = vadd.f32 %v1750_v45, %v885_v49  ;;  %v1842_v51 = vpop.f32.mrb[7].mxu0 }
  0xfa   : > { %1226 = vrot.lane.b32.xlu1 %v766_v24, %s2013_s1  ;;  %1228 = vrot.lane.b32.xlu0 %v829_v23, %s2013_s1  ;;  %v889_v52 = vpack.c.bf16 %v886_v50, %v883_v47 }
  0xfb   : > { %1846 = vmatmul.mubr.msk.bf16.vlgmr.msra.gmra.mrb[4].mxu1 %vm890_vm2, %v766_v24 }
  0xfc   : > { %1857 = vmatprep.mubr.msk.bf16.mxu1 %vm2010_vm0, %v2009_v1  ;;  %v957_v53 = vsel %vm955_vm4, %v889_v52, 0 }
  0xfd   : > { %1850 = vmatpush3.bf16.msra.mxu0 %v957_v53 }
  0xfe   : > { %1861 = vmatprep.subr.bf16.mxu0 %v2009_v1 }
 0x164   : > { %v1004_v28 = vpop.permute.xlu0 %1003  ;;  %v1117_v30 = vpop.permute.xlu1 %1116 }
 0x165   : > { %v1009_v29 = vsel %vm890_vm2, %v1004_v28, 0  ;;  %v1122_v32 = vsel %vm890_vm2, %v1117_v30, 0 }
 0x166   : > { %1856 = vmatpush3.bf16.xpose.msra.mxu1 %v1009_v29 }
 0x167   : > { %1867 = vmatprep.subr.bf16.mxu1 %v2009_v1 }
 0x168   : > { %v1001_v31 = vpop.permute.xlu0 %1000  ;;  %v1115_v34 = vpop.permute.xlu1 %1114 }
 0x16c   : > { %v1229_v33 = vpop.permute.xlu0 %1228  ;;  %v1227_v36 = vpop.permute.xlu1 %1226 }
 0x16d   : > { %1858 = vmatmul.mubr.msk.bf16.vlgmr.msra.gmra.mrb[8].mxu1 %vm890_vm2, %v1001_v31  ;;  %v1234_v35 = vsel %vm890_vm2, %v1229_v33, 0 }
 0x16e   : > { %1868 = vmatpush3.bf16.xpose.msra.mxu1 %v1122_v32  ;;  %1869 = vmatprep.mubr.msk.bf16.mxu1 %vm2010_vm0, %v2009_v1 }
 0x16f   : > { %1879 = vmatprep.subr.bf16.mxu1 %v2009_v1 }
 0x175   : > { %1870 = vmatmul.mubr.msk.bf16.vlgmr.msra.gmra.mrb[12].mxu1 %vm890_vm2, %v1115_v34 }
 0x176   : > { %1880 = vmatpush3.bf16.xpose.msra.mxu1 %v1234_v35  ;;  %1881 = vmatprep.mubr.msk.bf16.mxu1 %vm2010_vm0, %v2009_v1 }
 0x177   : > { %1891 = vmatprep.subr.bf16.mxu1 %v2009_v1 }
 0x17d   : > { %1882 = vmatmul.mubr.msk.bf16.vlgmr.msra.gmra.mrb[16].mxu1 %vm890_vm2, %v1227_v36 }
 0x17e   : > { %1895 = vmatprep.mubr.msk.bf16.mxu1 %vm2010_vm0, %v2009_v1 }
 0x1ce   : > { %v931_v37 = vpop.f32.mrb[4].mxu1 }
 0x1cf   : > { %v937_v39 = vmul.f32 0.35355338, %v931_v37  ;;  %v1847_v40 = vpop.f32.mrb[5].mxu1 }
 0x1d0   : > { %v934_v41 = vpop.f32.mrb[6].mxu1 }
 0x1d1   : > { %v1848_v42 = vpop.f32.mrb[7].mxu1  ;;  %v938_v43 = vadd.f32 %v937_v39, %v681_v38 }
 0x1d3   : > { %v940_v44 = vsel %vm939_vm3, %v938_v43, -inf }
 0x1d4   : > { %941 = vmax.xlane.f32.xlu0 %v940_v44 }
 0x240   : > { %v1045_v54 = vpop.f32.mrb[8].mxu1 }
 0x241   : > { %v1051_v55 = vmul.f32 0.35355338, %v1045_v54  ;;  %v1859_v56 = vpop.f32.mrb[9].mxu1 }
 0x242   : > { %v1048_v57 = vpop.f32.mrb[10].mxu1 }
 0x243   : > { %v1860_v58 = vpop.f32.mrb[11].mxu1  ;;  %v1052_v59 = vadd.f32 %v1051_v55, %v681_v38 }
 0x245   : > { %v1053_v60 = vsel %vm939_vm3, %v1052_v59, -inf }
 0x246   : > { %1054 = vmax.xlane.f32.xlu1 %v1053_v60 }
 0x248   : > { %v1158_v61 = vpop.f32.mrb[12].mxu1 }
 0x249   : > { %v1164_v62 = vmul.f32 0.35355338, %v1158_v61  ;;  %v1871_v63 = vpop.f32.mrb[13].mxu1 }
 0x24a   : > { %v1161_v0 = vpop.f32.mrb[14].mxu1 }
 0x24b   : > { %v1872_v2 = vpop.f32.mrb[15].mxu1  ;;  %v1165_v3 = vadd.f32 %v1164_v62, %v681_v38  ;;  %v1958_v0 = vld [vmem:[%s2341_s9 + $0x8] sm:$0xff]  }
 0x24d   : > { %v1166_v4 = vsel %vm939_vm3, %v1165_v3, -inf }
 0x24e   : > { %1167 = vmax.xlane.f32.xlu0 %v1166_v4 }
 0x250   : > { %v1270_v5 = vpop.f32.mrb[16].mxu1 }
 0x251   : > { %v1276_v6 = vmul.f32 0.35355338, %v1270_v5  ;;  %v1883_v8 = vpop.f32.mrb[17].mxu1 }
 0x252   : > { %v1273_v9 = vpop.f32.mrb[18].mxu1 }
 0x253   : > { %v1884_v10 = vpop.f32.mrb[19].mxu1  ;;  %v1277_v11 = vadd.f32 %v1276_v6, %v681_v38 }
 0x255   : > { %v1278_v12 = vsel %vm939_vm3, %v1277_v11, -inf }
 0x256   : > { %1279 = vmax.xlane.f32.xlu0 %v1278_v12 }
 0x261   : > { %v942_v13 = vpop.xlane.xlu0 %941 }
 0x262   : > { %v943_v14 = vsub.f32 %v938_v43, %v942_v13 }
 0x264   : > { %v944_v15 = vmul.f32 1.442695, %v943_v14 }
 0x266   : > { %1965 = vpow2.f32 %v944_v15 }
 0x270   : > { %v1966_v16 = vpop.eup %1965 }
 0x271   : > { %v946_v17 = vsel %vm939_vm3, %v1966_v16, 0.0 }
 0x272   : > { %947 = vadd.xlane.f32.xlu1 %v946_v17 }
 0x283   : > { %1066 = vrot.lane.b32.xlu1 %v889_v52, %s2012_s28 }
 0x2d3   : > { %v1055_v18 = vpop.xlane.xlu1 %1054 }
 0x2d4   : > { %v1056_v19 = vsub.f32 %v1052_v59, %v1055_v18  ;;  %v1957_v59 = vld [vmem:[%s2341_s9] sm:$0xff]  }
 0x2d5   : > { %1892 = vmatpush3.bf16.msra.mxu1 %v1957_v59  ;;  %v1762_v18 = vld [vmem:[%s2342_s10] ss:$0 sm:$0xff] }
 0x2d6   : > { %v1057_v20 = vmul.f32 1.442695, %v1056_v19  ;;  %1893 = vmatprep.subr.bf16.mxu1 %v2009_v1 }
 0x2d8   : > { %1967 = vpow2.f32 %v1057_v20 }
 0x2d9   : > { %1894 = vmatpush3.bf16.msra.mxu1 %v1958_v0 }
 0x2da   : > { %1907 = vmatprep.subr.bf16.mxu1 %v2009_v1 }
 0x2db   : > { %v1168_v21 = vpop.xlane.xlu0 %1167 }
 0x2dc   : > { %v1169_v22 = vsub.f32 %v1165_v3, %v1168_v21 }
 0x2de   : > { %v1170_v23 = vmul.f32 1.442695, %v1169_v22 }
 0x2e0   : > { %1969 = vpow2.f32 %v1170_v23 }
 0x2e2   : > { %v1968_v24 = vpop.eup %1967 }
 0x2e3   : > { %v1280_v25 = vpop.xlane.xlu0 %1279  ;;  %v1059_v26 = vsel %vm939_vm3, %v1968_v24, 0.0 }
 0x2e4   : > { %v1281_v27 = vsub.f32 %v1277_v11, %v1280_v25  ;;  %1060 = vadd.xlane.f32.xlu0 %v1059_v26 }
 0x2e6   : > { %v1282_v28 = vmul.f32 1.442695, %v1281_v27 }
 0x2e8   : > { %1971 = vpow2.f32 %v1282_v28 }
 0x2ea   : > { %v1970_v29 = vpop.eup %1969 }
 0x2eb   : > { %v1172_v30 = vsel %vm939_vm3, %v1970_v29, 0.0 }
 0x2ec   : > { %1173 = vadd.xlane.f32.xlu1 %v1172_v30 }
 0x2f2   : > { %v1972_v31 = vpop.eup %1971 }
 0x2f3   : > { %v1284_v32 = vsel %vm939_vm3, %v1972_v31, 0.0 }
 0x2f4   : > { %1285 = vadd.xlane.f32.xlu0 %v1284_v32  ;;  %v1960_v32 = vld [vmem:[%s2345_s13 + $0x8] sm:$0xff]  }
 0x2fd   : > { %1290 = vrot.lane.b32.xlu1 %v889_v52, %s2013_s1  ;;  %s2014_s1 = smov 8  }
 0x2ff   : > { %v948_v33 = vpop.xlane.xlu1 %947 }
 0x300   : > { %1973 = vrcp.f32 %v948_v33  ;;  %v1962_v33 = vld [vmem:[%s2347_s15 + $0x8] sm:$0xff]  }
 0x303   : > { %v1067_v35 = vpop.permute.xlu1 %1066 }
 0x304   : > { %v1072_v38 = vsel %vm955_vm4, %v1067_v35, 0 }
 0x30a   : > { %v1974_v34 = vpop.eup %1973  ;;  %1178 = vrot.lane.b32.xlu0 %v889_v52, %s2011_s27 }
 0x30b   : > { %v950_v36 = vmul.f32 %v1974_v34, %v1966_v16 }
 0x30d   : > { %v951_v37 = vpack.c.bf16 %v950_v36, %v950_v36 }
 0x30f   : > { %1852 = vmatmul.mubr.msk.bf16.vlgmr.msra.gmra.mrb[8].mxu0 %vm939_vm3, %v951_v37 }
 0x310   : > { %1862 = vmatpush3.bf16.msra.mxu0 %v1072_v38  ;;  %1863 = vmatprep.mubr.msk.bf16.mxu0 %vm2010_vm0, %v2009_v1  ;;  %v1766_v38 = vld [vmem:[%s2343_s11] ss:$0 sm:$0xff] }
 0x311   : > { %1873 = vmatprep.subr.bf16.mxu0 %v2009_v1 }
 0x371   : > { %v1061_v39 = vpop.xlane.xlu0 %1060 }
 0x372   : > { %1975 = vrcp.f32 %v1061_v39 }
 0x379   : > { %v1174_v40 = vpop.xlane.xlu1 %1173 }
 0x37a   : > { %1977 = vrcp.f32 %v1174_v40  ;;  %v1767_v40 = vld [vmem:[%s2344_s12] ss:$0 sm:$0xff] }
 0x37c   : > { %v1976_v41 = vpop.eup %1975 }
 0x37d   : > { %v1063_v42 = vmul.f32 %v1976_v41, %v1968_v24  ;;  %v1291_v49 = vpop.permute.xlu1 %1290 }
 0x37e   : > { %v1296_v51 = vsel %vm955_vm4, %v1291_v49, 0 }
 0x37f   : > { %v1064_v43 = vpack.c.bf16 %v1063_v42, %v1063_v42 }
 0x381   : > { %v1286_v44 = vpop.xlane.xlu0 %1285  ;;  %1864 = vmatmul.mubr.msk.bf16.vlgmr.msra.gmra.mrb[12].mxu0 %vm939_vm3, %v1064_v43 }
 0x382   : > { %1979 = vrcp.f32 %v1286_v44  ;;  %1875 = vmatprep.mubr.msk.bf16.mxu0 %vm2010_vm0, %v2009_v1  ;;  %v1963_v44 = vld [vmem:[%s2347_s15 + $0x10] sm:$0xff]  }
 0x384   : > { %v1978_v45 = vpop.eup %1977 }
 0x385   : > { %v1176_v46 = vmul.f32 %v1978_v45, %v1970_v29  ;;  %v1179_v47 = vpop.permute.xlu0 %1178  ;;  %v1964_v45 = vld [vmem:[%s2347_s15 + $0x18] sm:$0xff]  }
 0x386   : > { %v1184_v48 = vsel %vm955_vm4, %v1179_v47, 0 }
 0x387   : > { %1874 = vmatpush3.bf16.msra.mxu0 %v1184_v48  ;;  %v1177_v50 = vpack.c.bf16 %v1176_v46, %v1176_v46  ;;  %v1768_v46 = vld [vmem:[%s2346_s14] ss:$0 sm:$0xff] }
 0x388   : > { %1885 = vmatprep.subr.bf16.mxu0 %v2009_v1 }
 0x38a   : > { %1876 = vmatmul.mubr.msk.bf16.vlgmr.msra.gmra.mrb[16].mxu0 %vm939_vm3, %v1177_v50 }
 0x38b   : > { %1886 = vmatpush3.bf16.msra.mxu0 %v1296_v51  ;;  %1887 = vmatprep.mubr.msk.bf16.mxu0 %vm2010_vm0, %v2009_v1 }
 0x38c   : > { %v1980_v52 = vpop.eup %1979  ;;  %1899 = vmatprep.subr.bf16.mxu0 %v2009_v1 }
 0x38d   : > { %v1288_v53 = vmul.f32 %v1980_v52, %v1972_v31  ;;  %v1959_v31 = vld [vmem:[%s2345_s13] sm:$0xff]  }
 0x38f   : > { %v1289_v54 = vpack.c.bf16 %v1288_v53, %v1288_v53 }
 0x392   : > { %1888 = vmatmul.mubr.msk.bf16.vlgmr.msra.gmra.mrb[20].mxu0 %vm939_vm3, %v1289_v54 }
 0x393   : > { %1903 = vmatprep.mubr.msk.bf16.mxu0 %vm2010_vm0, %v2009_v1  ;;  %1900 = vmatpush3.bf16.msra.mxu0 %v1959_v31 }
 0x394   : > { %1901 = vmatprep.subr.bf16.mxu0 %v2009_v1 }
 0x397   : > { %1902 = vmatpush3.bf16.msra.mxu0 %v1960_v32 }
 0x3e2   : > { %v993_v55 = vpop.f32.mrb[8].mxu0 }
 0x3e3   : > { %v1853_v56 = vpop.f32.mrb[9].mxu0 }
 0x3e4   : > { %v996_v57 = vpop.f32.mrb[10].mxu0 }
 0x3e5   : > { %v1854_v58 = vpop.f32.mrb[11].mxu0 }
 0x454   : > { %v1108_v60 = vpop.f32.mrb[12].mxu0 }
 0x455   : > { %1339 = vrot.lane.b32.xlu1 %v1108_v60, %s2014_s1  ;;  %v1865_v61 = vpop.f32.mrb[13].mxu0 }
 0x456   : > { %v1111_v62 = vpop.f32.mrb[14].mxu0 }
 0x457   : > { %v1866_v63 = vpop.f32.mrb[15].mxu0 }
 0x45d   : > { %v1220_v2 = vpop.f32.mrb[16].mxu0 }
 0x45e   : > { %1343 = vrot.lane.b32.xlu0 %v1220_v2, %s2015_s24  ;;  %v1877_v3 = vpop.f32.mrb[17].mxu0 }
 0x45f   : > { %v1223_v4 = vpop.f32.mrb[18].mxu0 }
 0x460   : > { %v1878_v5 = vpop.f32.mrb[19].mxu0 }
 0x465   : > { %v1332_v6 = vpop.f32.mrb[20].mxu0 }
 0x466   : > { %1347 = vrot.lane.b32.xlu1 %v1332_v6, %s2016_s25  ;;  %v1889_v8 = vpop.f32.mrb[21].mxu0 }
 0x467   : > { %v1335_v9 = vpop.f32.mrb[22].mxu0  ;;  %v1778_v8 = vld [vmem:[%s2349_s17] ss:$0 sm:$0xff] }
 0x468   : > { %v1890_v10 = vpop.f32.mrb[23].mxu0 }
 0x469   : > { %v1779_v10 = vld [vmem:[%s2350_s18] ss:$0 sm:$0xff] }
 0x4c7   : > { %v1340_v11 = vpop.permute.xlu1 %1339 }
 0x4c8   : > { %v1350_v13 = vsel %vm890_vm2, %v993_v55, %v1340_v11 }
 0x4d0   : > { %v1344_v12 = vpop.permute.xlu0 %1343 }
 0x4d1   : > { %v1352_v14 = vsel %vm1351_vm5, %v1350_v13, %v1344_v12 }
 0x4d8   : > { %v1348_v15 = vpop.permute.xlu1 %1347 }
 0x4d9   : > { %v1354_v16 = vsel %vm1353_vm6, %v1352_v14, %v1348_v15 }
 0x4da   : > { %v1355_v17 = vpack.c.bf16 %v1354_v16, %v1354_v16 }
 0x4dc   : > { %1896 = vmatmul.mubr.msk.bf16.vlgmr.msra.gmra.mrb[20].mxu1 %vm722_vm1, %v1355_v17 }
 0x4dd   : > { %1915 = vmatprep.mubr.msk.bf16.mxu1 %vm2010_vm0, %v2009_v1 }
 0x5af   : > { %v1411_v19 = vpop.f32.mrb[20].mxu1 }
 0x5b0   : > { %v1412_v20 = vadd.f32 %v1762_v18, %v1411_v19  ;;  %v1897_v21 = vpop.f32.mrb[21].mxu1 }
 0x5b1   : > { %v1414_v22 = vpop.f32.mrb[22].mxu1 }
 0x5b2   : > { %v1898_v23 = vpop.f32.mrb[23].mxu1  ;;  %v1417_v24 = vadd.f32 %v1412_v20, %v2165_v7  ;;  %v1961_v7 = vld [vmem:[%s2347_s15] sm:$0xff]  }
 0x5b3   : > { %1908 = vmatpush3.bf16.msra.mxu1 %v1961_v7 }
 0x5b4   : > { %v1420_v25 = vsel %vm722_vm1, %v1417_v24, 0.0  ;;  %1909 = vmatprep.subr.bf16.mxu1 %v2009_v1 }
 0x5b5   : > { %1421 = vadd.xlane.f32.xlu0 %v1420_v25 }
 0x5b7   : > { %1910 = vmatpush3.bf16.msra.mxu1 %v1962_v33 }
 0x5b8   : > { %1911 = vmatprep.subr.bf16.mxu1 %v2009_v1 }
 0x5bb   : > { %1912 = vmatpush3.bf16.msra.mxu1 %v1963_v44 }
 0x5bc   : > { %1913 = vmatprep.subr.bf16.mxu1 %v2009_v1  ;;  %v1772_v1 = vld [vmem:[%s2348_s16] ss:$0 sm:$0xff] }
 0x5bf   : > { %1914 = vmatpush3.bf16.msra.mxu1 %v1964_v45 }
 0x642   : > { %v1422_v26 = vpop.xlane.xlu0 %1421 }
 0x643   : > { %v1424_v27 = vmul.f32 0.03125, %v1422_v26 }
 0x645   : > { %v1425_v28 = vsub.f32 %v1417_v24, %v1424_v27 }
 0x647   : > { %v1426_v29 = vmul.f32 %v1425_v28, %v1425_v28 }
 0x649   : > { %v1427_v30 = vsel %vm722_vm1, %v1426_v29, 0.0 }
 0x64a   : > { %1428 = vadd.xlane.f32.xlu1 %v1427_v30 }
 0x6d7   : > { %v1429_v34 = vpop.xlane.xlu1 %1428 }
 0x6d8   : > { %v1430_v35 = vmul.f32 0.03125, %v1429_v34 }
 0x6da   : > { %v1431_v36 = vadd.f32 1e-05, %v1430_v35 }
 0x6dc   : > { %1981 = vrsqrt.f32 %v1431_v36 }
 0x6e6   : > { %v1982_v37 = vpop.eup %1981 }
 0x6e7   : > { %v1433_v39 = vmul.f32 %v1982_v37, %v1425_v28 }
 0x6e9   : > { %v1440_v41 = vmul.f32 %v1766_v38, %v1433_v39 }
 0x6eb   : > { %v1447_v42 = vadd.f32 %v1767_v40, %v1440_v41 }
 0x6ed   : > { %v1448_v43 = vpack.c.bf16 %v1447_v42, %v1447_v42 }
 0x6ef   : > { %1904 = vmatmul.mubr.msk.bf16.vlgmr.msra.gmra.mrb[24].mxu0 %vm722_vm1, %v1448_v43 }
 0x7c2   : > { %v1509_v47 = vpop.f32.mrb[24].mxu0 }
 0x7c3   : > { %v1510_v48 = vadd.f32 %v1768_v46, %v1509_v47  ;;  %v1905_v49 = vpop.f32.mrb[25].mxu0 }
 0x7c4   : > { %v1512_v50 = vpop.f32.mrb[26].mxu0 }
 0x7c5   : > { %v1515_v51 = vmax.f32 %v1510_v48, 0.0  ;;  %v1906_v52 = vpop.f32.mrb[27].mxu0 }
 0x7c7   : > { %v1516_v53 = vpack.c.bf16 %v1515_v51, %v1515_v51 }
 0x7c9   : > { %1916 = vmatmul.mubr.msk.bf16.vlgmr.msra.gmra.mrb[24].mxu1 %vm1556_vm7, %v1516_v53 }
 0x89c   : > { %v1594_v54 = vpop.f32.mrb[24].mxu1 }
 0x89d   : > { %v1595_v55 = vadd.f32 %v1772_v1, %v1594_v54  ;;  %v1917_v56 = vpop.f32.mrb[25].mxu1 }
 0x89e   : > { %v1597_v57 = vpop.f32.mrb[26].mxu1 }
 0x89f   : > { %v1918_v58 = vpop.f32.mrb[27].mxu1  ;;  %v1600_v59 = vadd.f32 %v1595_v55, %v1447_v42 }
 0x8a1   : > { %v1603_v60 = vsel %vm722_vm1, %v1600_v59, 0.0 }
 0x8a2   : > { %1604 = vadd.xlane.f32.xlu0 %v1603_v60 }
 0x92f   : > { %v1605_v61 = vpop.xlane.xlu0 %1604 }
 0x930   : > { %v1606_v62 = vmul.f32 0.03125, %v1605_v61 }
 0x932   : > { %v1607_v63 = vsub.f32 %v1600_v59, %v1606_v62 }
 0x934   : > { %v1608_v0 = vmul.f32 %v1607_v63, %v1607_v63 }
 0x936   : > { %v1609_v2 = vsel %vm722_vm1, %v1608_v0, 0.0 }
 0x937   : > { %1610 = vadd.xlane.f32.xlu0 %v1609_v2 }
 0x9c4   : > { %v1611_v3 = vpop.xlane.xlu0 %1610 }
 0x9c5   : > { %v1612_v4 = vmul.f32 0.03125, %v1611_v3 }
 0x9c7   : > { %v1613_v5 = vadd.f32 1e-05, %v1612_v4 }
 0x9c9   : > { %1983 = vrsqrt.f32 %v1613_v5 }
 0x9d3   : > { %v1984_v6 = vpop.eup %1983 }
 0x9d4   : > { %v1615_v9 = vmul.f32 %v1984_v6, %v1607_v63 }
 0x9d6   : > { %v1622_v11 = vmul.f32 %v1778_v8, %v1615_v9 }
 0x9d8   : > { %v1629_v12 = vadd.f32 %v1779_v10, %v1622_v11 }
 0x9da   : > { %1630 = vst.msk [vmem:[%s676_s22] sm:$0xff] %vm722_vm1, %v1629_v12 }
 0x9db PF: > { %s29_s20 = sadd.s32 1, %s2007_s20   ;;  %s2364_s27 = sld [smem:[#allocation2_spill]] }
 0x9dc   : > { %p26_p5 = scmp.ge.s32.totalorder %s29_s20, 4   ;;  %s2365_s0 = smov %s2003_s30 }
 0x9de   :  { %28 = sbr.rel (!%p26_p5) target bundleno = 6 (0x6), region = 132 }
 0x9e1   : > { %s2366_s30 = smov %s2364_s27 }

// kernel: decoder_forward.10
= control target key start
LH: loop header
LB: loop body
LE: loop exit
PB: predicated region body
PF: predicated region fallthrough
CT: control target
= control target key end

     0   :  { %s2547_s0 = inlined_call_operand.vmem [shape: f32[2,8,32], index: 0, kind: input, shape index: {}]   ;;  %s2548_s1 = inlined_call_operand.vmem [shape: f32[2,10,32], index: 1, kind: input, shape index: {}]   ;;  %s2549_s2 = inlined_call_operand.vmem [shape: f32[2,8,10], index: 2, kind: input, shape index: {}]   ;;  %s2550_s3 = inlined_call_operand.vmem [shape: bf16[32,32], index: 3, kind: input, shape index: {}]   ;;  %s2551_s4 = inlined_call_operand.vmem [shape: f32[1,32], index: 4, kind: input, shape index: {}]   ;;  %s2552_s5 = inlined_call_operand.vmem [shape: bf16[32,32], index: 5, kind: input, shape index: {}]   ;;  %s2553_s6 = inlined_call_operand.vmem [shape: f32[1,32], index: 6, kind: input, shape index: {}]   ;;  %s2554_s7 = inlined_call_operand.vmem [shape: bf16[32,32], index: 7, kind: input, shape index: {}]   ;;  %s2555_s8 = inlined_call_operand.vmem [shape: f32[1,32], index: 8, kind: input, shape index: {}]   ;;  %s2556_s9 = inlined_call_operand.vmem [shape: bf16[32,32], index: 9, kind: input, shape index: {}]   ;;  %s2557_s10 = inlined_call_operand.vmem [shape: f32[1,32], index: 10, kind: input, shape index: {}]   ;;  %s2558_s11 = inlined_call_operand.vmem [shape: f32[1,32], index: 11, kind: input, shape index: {}]   ;;  %s2559_s12 = inlined_call_operand.vmem [shape: f32[1,32], index: 12, kind: input, shape index: {}]   ;;  %s2560_s13 = inlined_call_operand.vmem [shape: bf16[32,64], index: 13, kind: input, shape index: {}]   ;;  %s2561_s14 = inlined_call_operand.vmem [shape: f32[1,64], index: 14, kind: input, shape index: {}]   ;;  %s2562_s15 = inlined_call_operand.vmem [shape: bf16[64,32], index: 15, kind: input, shape index: {}]   ;;  %s2563_s16 = inlined_call_operand.vmem [shape: f32[1,32], index: 16, kind: input, shape index: {}]   ;;  %s2564_s17 = inlined_call_operand.hbm [shape: f32[1,32], index: 17, kind: input, shape index: {}]   ;;  %s2565_s18 = inlined_call_operand.hbm [shape: f32[1,32], index: 18, kind: input, shape index: {}]   ;;  %s2566_s19 = inlined_call_operand.vmem [shape: f32[2,8,32], index: 19, kind: output, shape index: {}]  }
   0x1   :  { %2573 = sst [smem:[#allocation11_spill]] %s2547_s0 }
   0x2   :  { %2574 = sst [smem:[#allocation12_spill]] %s2548_s1 }
   0x3   :  { %2575 = sst [smem:[#allocation13_spill]] %s2549_s2 }
   0x4   :  { %2576 = sst [smem:[#allocation14_spill]] %s2550_s3 }
   0x5   :  { %2577 = sst [smem:[#allocation15_spill]] %s2564_s17 }
   0x6   :  { %2578 = sst [smem:[#allocation16_spill]] %s2565_s18 }
   0x7   :  { %24 = vsyncpa [#allocation3], 0 }
   0x8   :  { %25 = vsyncpa [#allocation5], 0  ;;  %s2257_s0 = smov 0   ;;  %s2259_s30 = smov 0  }
   0x9   :  { %s2261_s20 = smov 0  }
   0xa LB: > { %2579 = sst [smem:[#allocation8_spill]] %s2141_s30  ;;  %s1781_s21 = sadd.s32 4294967295, %s2145_s20   ;;  %s2145_s20 = sphi %s2261_s20, %s31_s20   ;;  %s2141_s30 = sphi %s2259_s30, %s2595_s30   ;;  %s2137_s0 = sphi %s2257_s0, %s2594_s0  }
   0xb   : > { %2580 = sst [smem:[#allocation9_spill]] %s2145_s20  ;;  %s43_s1 = sadd.s32 1, %s2141_s30 }
   0xc   : > { %p45_p0 = scmp.ge.s32.totalorder %s43_s1, 2  ;;  %p1783_p1 = scmp.ge.s32.totalorder %s2145_s20, 1 }
   0xd   : > { %p494_p2 = scmp.lt.s32.totalorder %s2145_s20, 3  ;;  %p2282_p4 = scmp.eq.s32.totalorder %s1781_s21, 0 }
   0xe   : > { %s2597_s1 = smov (%p45_p0, %s43_s1), 0  ;;  %s2147_s23 = smov [#allocation2]  }
   0xf   : > { %2581 = sst [smem:[#allocation10_spill]] %s2597_s1  ;;  %p2278_p3 = pnand %p1783_p1, %p494_p2 }
  0x10   : > { %s2583_s2 = scalar_select %p2282_p4, 1, 0 }
  0x11   : > { %s2582_s22 = scalar_select %p2278_p3, 1, 0 }
  0x12   : > { %p1980_p5 = pneg %p2278_p3  ;;  %s549_s24 = sshll.u32 %s2147_s23, 4  ;;  %s550_s24 = int_to_ptr.vmem [resolvable:$true] %s549_s24 }
  0x13   : > { %s2148_s25 = smov [#allocation4]   ;;  %s2585_s17 = sld [smem:[#allocation15_spill]] }
  0x14   : > { %s560_s3 = sshll.u32 %s2148_s25, 4  ;;  %p2290_p6 = pnand %p2282_p4, %p1980_p5  ;;  %s2294_s3 = int_to_ptr.vmem [resolvable:$true] %s560_s3 }
  0x16   : > { %p2061_p8 = pneg %p2290_p6 }
  0x19   : > { %s2059_s29 = scalar_lea.hbm %s2585_s17, 16 }
  0x1a   : > { %p2060_p7 = scmp.ne.s32.totalorder %s2585_s17, %s2059_s29  ;;  %p2066_p11 = scmp.lt.u32.totalorder %s2059_s29, %s2585_s17 }
  0x1c   : > { %p2062_p9 = pnand %p2061_p8, %p2060_p7 }
  0x1e   : > { %p2063_p10 = pneg %p2062_p9 }
  0x20   : > { %p2068_p12 = pnand %p2066_p11, %p2063_p10 }
  0x22   : > { %2071 = shalt.err (!%p2068_p12)
}
  0x23   : > { %s2072_s30 = scalar_lea.vmem %s550_s24, 16  ;;  %s2079_s1 = scalar_lea.vmem %s550_s24, 32 }
  0x24   : > { %p2073_p13 = scmp.ne.s32.totalorder %s550_s24, %s2072_s30  ;;  %p2080_p2 = scmp.lt.s32.totalorder %s550_s24, %s550_s24 }
  0x25   : > { %p2081_p5 = scmp.lt.s32.totalorder %s2079_s1, %s2072_s30 }
  0x26   : > { %p2075_p0 = pnand %p2073_p13, %p2061_p8 }
  0x27   : > { %p2082_p4 = por %p2081_p5, %p2080_p2 }
  0x28   : > { %p2076_p1 = pneg %p2075_p0 }
  0x2a   : > { %p2083_p3 = pnand %p2082_p4, %p2076_p1 }
  0x2c   : > { %2086 = shalt.err (!%p2083_p3)
}
  0x2d   : > { %1983 = dma.hbm_to_vmem [thread:$0]  (!%p2290_p6), %s2585_s17, 16, %s550_s24, [#allocation3]  }
  0x2e   : > { %s2586_s18 = sld [smem:[#allocation16_spill]] }
  0x34   : > { %s2087_s23 = scalar_lea.hbm %s2586_s18, 16 }
  0x35   : > { %p2088_p7 = scmp.ne.s32.totalorder %s2586_s18, %s2087_s23  ;;  %p2094_p3 = scmp.lt.u32.totalorder %s2087_s23, %s2586_s18 }
  0x37   : > { %p2090_p9 = pnand %p2088_p7, %p2061_p8 }
  0x39   : > { %p2091_p4 = pneg %p2090_p9 }
  0x3b   : > { %p2096_p10 = pnand %p2094_p3, %p2091_p4 }
  0x3d   : > { %2099 = shalt.err (!%p2096_p10)
}
  0x3e   : > { %s2100_s24 = scalar_lea.vmem %s2294_s3, 16  ;;  %s2107_s20 = scalar_lea.vmem %s2294_s3, 32 }
  0x3f   : > { %p2101_p11 = scmp.ne.s32.totalorder %s2294_s3, %s2100_s24  ;;  %p2108_p0 = scmp.lt.s32.totalorder %s2294_s3, %s2294_s3 }
  0x40   : > { %p2109_p1 = scmp.lt.s32.totalorder %s2107_s20, %s2100_s24 }
  0x41   : > { %p2103_p12 = pnand %p2101_p11, %p2061_p8 }
  0x42   : > { %p2110_p2 = por %p2109_p1, %p2108_p0 }
  0x43   : > { %p2104_p13 = pneg %p2103_p12 }
  0x45   : > { %p2111_p5 = pnand %p2110_p2, %p2104_p13 }
  0x47   : > { %2114 = shalt.err (!%p2111_p5)
}
  0x48   : > { %1986 = dma.hbm_to_vmem [thread:$0]  (!%p2290_p6), %s2586_s18, 16, %s2294_s3, [#allocation5]  }
  0x49   : > { %p2587_p7 = scmp.ne.s32.totalorder %s2582_s22, 0 }
  0x4a   : > { %p2588_p8 = scmp.ne.s32.totalorder (!%p2587_p7), %s2583_s2, 0 }
  0x4b   : > { %601 = sbr.rel (%p2587_p7) target bundleno = 2596 (0xa24), region = 96 }
  0x52   : > { %2128 = dma.done.wait (%p2588_p8), [#allocation3], 16  }
  0x53   : > { %2130 = vsyncadd (%p2588_p8), [#allocation3], 4294967280 }
  0x54   : > { %2132 = dma.done.wait (%p2588_p8), [#allocation5], 16  }
  0x55   : > { %2134 = vsyncadd (%p2588_p8), [#allocation5], 4294967280  ;;  %p677_p9 = scmp.lt.s32.totalorder %s2137_s0, 1  ;;  %v2149_v0 = vmov 0.0   ;;  %vm2150_vm0 = vmmov 0   ;;  %v2025_v1 = vld [vmem:[%s2552_s5] sm:$0xff]  }
  0x56   : > { %1880 = vmatprep.subr.bf16.mxu1 %v2149_v0  ;;  %1872 = vmatprep.subr.bf16.mxu0 %v2149_v0  ;;  %s2589_s23 = sld [smem:[#allocation12_spill]]  ;;  %v2026_v2 = vld [vmem:[%s2552_s5 + $0x8] sm:$0xff]   ;;  %s2590_s27 = sld [smem:[#allocation11_spill]]  ;;  %vm748_vm1 = vcmask 261120   ;;  %v1799_v10 = vld [vmem:[%s2553_s6] ss:$0 sm:$0xff] }
  0x57   : > { %1884 = vmatprep.mubr.msk.bf16.mxu1 %vm2150_vm0, %v2149_v0  ;;  %s2599_s0 = smov (!%p677_p9, %s2137_s0), 1  ;;  %1876 = vmatprep.mubr.msk.bf16.mxu0 %vm2150_vm0, %v2149_v0  ;;  %s2591_s18 = sld [smem:[#allocation14_spill]]  ;;  %v1795_v12 = vld [vmem:[%s2551_s4] ss:$0 sm:$0xff]  ;;  %vm916_vm2 = vcmask 64512   ;;  %v2030_v27 = vld [vmem:[%s2554_s7 + $0x8] sm:$0xff]  }
  0x58   : > { %s1835_s22 = sshll.u32 %s2599_s0, 4  ;;  %s2362_s3 = sshll.u32 %s2599_s0, 3  ;;  %1881 = vmatpush3.bf16.msra.mxu1 %v2025_v1  ;;  %v2029_v26 = vld [vmem:[%s2554_s7] sm:$0xff]   ;;  %vm965_vm3 = vcmask 80896   ;;  %vm981_vm4 = vcmask 1044480   ;;  %vm1377_vm5 = vcmask 130048  }
  0x59   : > { %1882 = vmatprep.subr.bf16.mxu1 %v2149_v0  ;;  %s2153_s30 = smov 104   ;;  %s2592_s2 = sld [smem:[#allocation13_spill]]  ;;  %v1803_v45 = vld [vmem:[%s2555_s8] ss:$0 sm:$0xff]  ;;  %vm1379_vm6 = vcmask 195584   ;;  %vm1582_vm7 = vcmask 523264  }
  0x5a   : > { %s2155_s1 = smov 16   ;;  %s2156_s24 = smov 24  }
  0x5b   : > { %s702_s21 = scalar_lea.vmem %s2566_s19, %s2362_s3 }
  0x5c   : > { %s688_s25 = scalar_lea.vmem %s2589_s23, %s1835_s22  ;;  %s683_s28 = scalar_lea.vmem %s2590_s27, %s2362_s3  ;;  %1883 = vmatpush3.bf16.msra.mxu1 %v2026_v2 }
  0x5d   : > { %v2027_v3 = vld [vmem:[%s2591_s18] sm:$0xff]   ;;  %v706_v5 = vld [vmem:[%s688_s25 + $0x8] sm:$0x3]  ;;  %1896 = vmatprep.subr.bf16.mxu1 %v2149_v0  ;;  %s2151_s23 = smov 112  }
  0x5e   : > { %v705_v4 = vld [vmem:[%s688_s25] sm:$0xff]  ;;  %1873 = vmatpush3.bf16.msra.mxu0 %v2027_v3  ;;  %v2028_v6 = vld [vmem:[%s2591_s18 + $0x8] sm:$0xff]   ;;  %s2152_s25 = smov 120  }
  0x5f   : > { %v2384_v7 = vld [vmem:[%s683_s28] sm:$0xff]  ;;  %v729_v8 = vpack.c.bf16 %v706_v5, %v705_v4  ;;  %1874 = vmatprep.subr.bf16.mxu0 %v2149_v0  ;;  %s695_s22 = scalar_lea.vmem %s2592_s2, %s2362_s3 }
  0x60   : > { %v728_v9 = vpack.c.bf16 %v2384_v7, %v2384_v7  ;;  %v707_v38 = vld [vmem:[%s695_s22] sm:$0xff] }
  0x61   : > { %1885 = vmatmul.mubr.msk.bf16.vlgmr.msra.gmra.mrb[0].mxu1 %vm748_vm1, %v729_v8 }
  0x62   : > { %1875 = vmatpush3.bf16.msra.mxu0 %v2028_v6  ;;  %1898 = vmatprep.mubr.msk.bf16.mxu1 %vm2150_vm0, %v2149_v0 }
  0x63   : > { %1888 = vmatprep.subr.bf16.mxu0 %v2149_v0 }
  0x65   : > { %1877 = vmatmul.mubr.msk.bf16.vlgmr.msra.gmra.mrb[0].mxu0 %vm748_vm1, %v728_v9 }
  0x66   : > { %1892 = vmatprep.mubr.msk.bf16.mxu0 %vm2150_vm0, %v2149_v0  ;;  %1889 = vmatpush3.bf16.msra.mxu0 %v2029_v26 }
  0x67   : > { %1890 = vmatprep.subr.bf16.mxu0 %v2149_v0 }
  0x6a   : > { %1891 = vmatpush3.bf16.msra.mxu0 %v2030_v27 }
  0x6b   : > { %1902 = vmatprep.subr.bf16.mxu0 %v2149_v0 }
  0x6d   : > { %1893 = vmatmul.mubr.msk.bf16.vlgmr.msra.gmra.mrb[4].mxu0 %vm748_vm1, %v729_v8 }
  0x6e   : > { %1904 = vmatprep.mubr.msk.bf16.mxu0 %vm2150_vm0, %v2149_v0 }
 0x134   : > { %v848_v11 = vpop.f32.mrb[0].mxu1 }
 0x135   : > { %v1886_v13 = vpop.f32.mrb[1].mxu1  ;;  %v849_v16 = vadd.f32 %v1799_v10, %v848_v11 }
 0x136   : > { %v851_v14 = vpop.f32.mrb[2].mxu1 }
 0x137   : > { %v852_v17 = vadd.f32 %v1799_v10, %v851_v14  ;;  %v1887_v18 = vpop.f32.mrb[3].mxu1 }
 0x138   : > { %v786_v15 = vpop.f32.mrb[0].mxu0 }
 0x139   : > { %v787_v19 = vadd.f32 %v1795_v12, %v786_v15  ;;  %v1878_v20 = vpop.f32.mrb[1].mxu0  ;;  %v855_v22 = vpack.c.bf16 %v852_v17, %v849_v16 }
 0x13a   : > { %v789_v21 = vpop.f32.mrb[2].mxu0 }
 0x13b   : > { %v1879_v23 = vpop.f32.mrb[3].mxu0  ;;  %v792_v24 = vpack.c.bf16 %v787_v19, %v787_v19  ;;  %1142 = vrot.lane.b32.xlu1 %v855_v22, %s2151_s23  ;;  %1029 = vrot.lane.b32.xlu0 %v855_v22, %s2152_s25  ;;  %v921_v25 = vsel %vm916_vm2, %v855_v22, 0 }
 0x13c   : > { %1897 = vmatpush3.bf16.xpose.msra.mxu1 %v921_v25 }
 0x13d   : > { %1908 = vmatprep.subr.bf16.mxu1 %v2149_v0 }
 0x13f   : > { %1140 = vrot.lane.b32.xlu1 %v792_v24, %s2151_s23  ;;  %1026 = vrot.lane.b32.xlu0 %v792_v24, %s2152_s25 }
 0x140   : > { %v908_v46 = vpop.f32.mrb[4].mxu0 }
 0x141   : > { %v909_v47 = vadd.f32 %v1803_v45, %v908_v46  ;;  %v1894_v48 = vpop.f32.mrb[5].mxu0 }
 0x142   : > { %v911_v49 = vpop.f32.mrb[6].mxu0 }
 0x143   : > { %1252 = vrot.lane.b32.xlu1 %v792_v24, %s2153_s30  ;;  %1254 = vrot.lane.b32.xlu0 %v855_v22, %s2153_s30  ;;  %v912_v50 = vadd.f32 %v1803_v45, %v911_v49  ;;  %v1895_v51 = vpop.f32.mrb[7].mxu0 }
 0x144   : > { %1899 = vmatmul.mubr.msk.bf16.vlgmr.msra.gmra.mrb[4].mxu1 %vm916_vm2, %v792_v24 }
 0x145   : > { %1910 = vmatprep.mubr.msk.bf16.mxu1 %vm2150_vm0, %v2149_v0  ;;  %v915_v52 = vpack.c.bf16 %v912_v50, %v909_v47 }
 0x147   : > { %v983_v53 = vsel %vm981_vm4, %v915_v52, 0 }
 0x148   : > { %1903 = vmatpush3.bf16.msra.mxu0 %v983_v53 }
 0x149   : > { %1914 = vmatprep.subr.bf16.mxu0 %v2149_v0 }
 0x1ad   : > { %v1030_v28 = vpop.permute.xlu0 %1029  ;;  %v1143_v30 = vpop.permute.xlu1 %1142 }
 0x1ae   : > { %v1035_v29 = vsel %vm916_vm2, %v1030_v28, 0  ;;  %v1148_v32 = vsel %vm916_vm2, %v1143_v30, 0 }
 0x1af   : > { %1909 = vmatpush3.bf16.xpose.msra.mxu1 %v1035_v29 }
 0x1b0   : > { %1920 = vmatprep.subr.bf16.mxu1 %v2149_v0 }
 0x1b1   : > { %v1027_v31 = vpop.permute.xlu0 %1026  ;;  %v1141_v34 = vpop.permute.xlu1 %1140 }
 0x1b5   : > { %v1255_v33 = vpop.permute.xlu0 %1254  ;;  %v1253_v36 = vpop.permute.xlu1 %1252 }
 0x1b6   : > { %1911 = vmatmul.mubr.msk.bf16.vlgmr.msra.gmra.mrb[8].mxu1 %vm916_vm2, %v1027_v31  ;;  %v1260_v35 = vsel %vm916_vm2, %v1255_v33, 0 }
 0x1b7   : > { %1921 = vmatpush3.bf16.xpose.msra.mxu1 %v1148_v32  ;;  %1922 = vmatprep.mubr.msk.bf16.mxu1 %vm2150_vm0, %v2149_v0 }
 0x1b8   : > { %1932 = vmatprep.subr.bf16.mxu1 %v2149_v0 }
 0x1be   : > { %1923 = vmatmul.mubr.msk.bf16.vlgmr.msra.gmra.mrb[12].mxu1 %vm916_vm2, %v1141_v34 }
 0x1bf   : > { %1933 = vmatpush3.bf16.xpose.msra.mxu1 %v1260_v35  ;;  %1934 = vmatprep.mubr.msk.bf16.mxu1 %vm2150_vm0, %v2149_v0 }
 0x1c0   : > { %1944 = vmatprep.subr.bf16.mxu1 %v2149_v0 }
 0x1c6   : > { %1935 = vmatmul.mubr.msk.bf16.vlgmr.msra.gmra.mrb[16].mxu1 %vm916_vm2, %v1253_v36 }
 0x1c7   : > { %1948 = vmatprep.mubr.msk.bf16.mxu1 %vm2150_vm0, %v2149_v0 }
 0x217   : > { %v957_v37 = vpop.f32.mrb[4].mxu1 }
 0x218   : > { %v963_v39 = vmul.f32 0.35355338, %v957_v37  ;;  %v1900_v40 = vpop.f32.mrb[5].mxu1 }
 0x219   : > { %v960_v41 = vpop.f32.mrb[6].mxu1 }
 0x21a   : > { %v1901_v42 = vpop.f32.mrb[7].mxu1  ;;  %v964_v43 = vadd.f32 %v963_v39, %v707_v38 }
 0x21c   : > { %v966_v44 = vsel %vm965_vm3, %v964_v43, -inf }
 0x21d   : > { %967 = vmax.xlane.f32.xlu0 %v966_v44 }
 0x289   : > { %v1071_v54 = vpop.f32.mrb[8].mxu1 }
 0x28a   : > { %v1077_v55 = vmul.f32 0.35355338, %v1071_v54  ;;  %v1912_v56 = vpop.f32.mrb[9].mxu1 }
 0x28b   : > { %v1074_v57 = vpop.f32.mrb[10].mxu1 }
 0x28c   : > { %v1913_v58 = vpop.f32.mrb[11].mxu1  ;;  %v1078_v59 = vadd.f32 %v1077_v55, %v707_v38 }
 0x28e   : > { %v1079_v60 = vsel %vm965_vm3, %v1078_v59, -inf }
 0x28f   : > { %1080 = vmax.xlane.f32.xlu1 %v1079_v60 }
 0x291   : > { %v1184_v61 = vpop.f32.mrb[12].mxu1 }
 0x292   : > { %v1190_v62 = vmul.f32 0.35355338, %v1184_v61  ;;  %v1924_v63 = vpop.f32.mrb[13].mxu1 }
 0x293   : > { %v1187_v1 = vpop.f32.mrb[14].mxu1 }
 0x294   : > { %v1925_v2 = vpop.f32.mrb[15].mxu1  ;;  %v1191_v3 = vadd.f32 %v1190_v62, %v707_v38  ;;  %v2032_v1 = vld [vmem:[%s2556_s9 + $0x8] sm:$0xff]  }
 0x296   : > { %v1192_v4 = vsel %vm965_vm3, %v1191_v3, -inf }
 0x297   : > { %1193 = vmax.xlane.f32.xlu0 %v1192_v4 }
 0x299   : > { %v1296_v5 = vpop.f32.mrb[16].mxu1 }
 0x29a   : > { %v1302_v6 = vmul.f32 0.35355338, %v1296_v5  ;;  %v1936_v8 = vpop.f32.mrb[17].mxu1 }
 0x29b   : > { %v1299_v9 = vpop.f32.mrb[18].mxu1 }
 0x29c   : > { %v1937_v10 = vpop.f32.mrb[19].mxu1  ;;  %v1303_v11 = vadd.f32 %v1302_v6, %v707_v38 }
 0x29e   : > { %v1304_v12 = vsel %vm965_vm3, %v1303_v11, -inf }
 0x29f   : > { %1305 = vmax.xlane.f32.xlu0 %v1304_v12 }
 0x2aa   : > { %v968_v13 = vpop.xlane.xlu0 %967 }
 0x2ab   : > { %v969_v14 = vsub.f32 %v964_v43, %v968_v13 }
 0x2ad   : > { %v970_v15 = vmul.f32 1.442695, %v969_v14 }
 0x2af   : > { %2039 = vpow2.f32 %v970_v15 }
 0x2b9   : > { %v2040_v16 = vpop.eup %2039 }
 0x2ba   : > { %v972_v17 = vsel %vm965_vm3, %v2040_v16, 0.0 }
 0x2bb   : > { %973 = vadd.xlane.f32.xlu1 %v972_v17 }
 0x2cc   : > { %1092 = vrot.lane.b32.xlu1 %v915_v52, %s2152_s25 }
 0x31c   : > { %v1081_v18 = vpop.xlane.xlu1 %1080 }
 0x31d   : > { %v1082_v19 = vsub.f32 %v1078_v59, %v1081_v18  ;;  %v2031_v59 = vld [vmem:[%s2556_s9] sm:$0xff]  }
 0x31e   : > { %1945 = vmatpush3.bf16.msra.mxu1 %v2031_v59  ;;  %v1815_v18 = vld [vmem:[%s2557_s10] ss:$0 sm:$0xff] }
 0x31f   : > { %v1083_v20 = vmul.f32 1.442695, %v1082_v19  ;;  %1946 = vmatprep.subr.bf16.mxu1 %v2149_v0 }
 0x321   : > { %2041 = vpow2.f32 %v1083_v20 }
 0x322   : > { %1947 = vmatpush3.bf16.msra.mxu1 %v2032_v1 }
 0x323   : > { %1960 = vmatprep.subr.bf16.mxu1 %v2149_v0 }
 0x324   : > { %v1194_v21 = vpop.xlane.xlu0 %1193 }
 0x325   : > { %v1195_v22 = vsub.f32 %v1191_v3, %v1194_v21 }
 0x327   : > { %v1196_v23 = vmul.f32 1.442695, %v1195_v22 }
 0x329   : > { %2043 = vpow2.f32 %v1196_v23 }
 0x32b   : > { %v2042_v24 = vpop.eup %2041 }
 0x32c   : > { %v1306_v25 = vpop.xlane.xlu0 %1305  ;;  %v1085_v26 = vsel %vm965_vm3, %v2042_v24, 0.0 }
 0x32d   : > { %v1307_v27 = vsub.f32 %v1303_v11, %v1306_v25  ;;  %1086 = vadd.xlane.f32.xlu0 %v1085_v26 }
 0x32f   : > { %v1308_v28 = vmul.f32 1.442695, %v1307_v27 }
 0x331   : > { %2045 = vpow2.f32 %v1308_v28 }
 0x333   : > { %v2044_v29 = vpop.eup %2043 }
 0x334   : > { %v1198_v30 = vsel %vm965_vm3, %v2044_v29, 0.0 }
 0x335   : > { %1199 = vadd.xlane.f32.xlu1 %v1198_v30 }
 0x33b   : > { %v2046_v31 = vpop.eup %2045 }
 0x33c   : > { %v1310_v32 = vsel %vm965_vm3, %v2046_v31, 0.0 }
 0x33d   : > { %1311 = vadd.xlane.f32.xlu0 %v1310_v32  ;;  %v2034_v32 = vld [vmem:[%s2560_s13 + $0x8] sm:$0xff]  }
 0x346   : > { %1316 = vrot.lane.b32.xlu1 %v915_v52, %s2153_s30 }
 0x348   : > { %v974_v33 = vpop.xlane.xlu1 %973 }
 0x349   : > { %2047 = vrcp.f32 %v974_v33  ;;  %v2036_v33 = vld [vmem:[%s2562_s15 + $0x8] sm:$0xff]  }
 0x34c   : > { %v1093_v35 = vpop.permute.xlu1 %1092 }
 0x34d   : > { %v1098_v38 = vsel %vm981_vm4, %v1093_v35, 0 }
 0x353   : > { %v2048_v34 = vpop.eup %2047  ;;  %1204 = vrot.lane.b32.xlu0 %v915_v52, %s2151_s23  ;;  %s2154_s23 = smov 8  }
 0x354   : > { %v976_v36 = vmul.f32 %v2048_v34, %v2040_v16 }
 0x356   : > { %v977_v37 = vpack.c.bf16 %v976_v36, %v976_v36 }
 0x358   : > { %1905 = vmatmul.mubr.msk.bf16.vlgmr.msra.gmra.mrb[8].mxu0 %vm965_vm3, %v977_v37 }
 0x359   : > { %1915 = vmatpush3.bf16.msra.mxu0 %v1098_v38  ;;  %1916 = vmatprep.mubr.msk.bf16.mxu0 %vm2150_vm0, %v2149_v0  ;;  %v1819_v38 = vld [vmem:[%s2558_s11] ss:$0 sm:$0xff] }
 0x35a   : > { %1926 = vmatprep.subr.bf16.mxu0 %v2149_v0 }
 0x3ba   : > { %v1087_v39 = vpop.xlane.xlu0 %1086 }
 0x3bb   : > { %2049 = vrcp.f32 %v1087_v39 }
 0x3c2   : > { %v1200_v40 = vpop.xlane.xlu1 %1199 }
 0x3c3   : > { %2051 = vrcp.f32 %v1200_v40  ;;  %v1820_v40 = vld [vmem:[%s2559_s12] ss:$0 sm:$0xff] }
 0x3c5   : > { %v2050_v41 = vpop.eup %2049 }
 0x3c6   : > { %v1089_v42 = vmul.f32 %v2050_v41, %v2042_v24  ;;  %v1317_v49 = vpop.permute.xlu1 %1316 }
 0x3c7   : > { %v1322_v51 = vsel %vm981_vm4, %v1317_v49, 0 }
 0x3c8   : > { %v1090_v43 = vpack.c.bf16 %v1089_v42, %v1089_v42 }
 0x3ca   : > { %v1312_v44 = vpop.xlane.xlu0 %1311  ;;  %1917 = vmatmul.mubr.msk.bf16.vlgmr.msra.gmra.mrb[12].mxu0 %vm965_vm3, %v1090_v43 }
 0x3cb   : > { %2053 = vrcp.f32 %v1312_v44  ;;  %1928 = vmatprep.mubr.msk.bf16.mxu0 %vm2150_vm0, %v2149_v0  ;;  %v2037_v44 = vld [vmem:[%s2562_s15 + $0x10] sm:$0xff]  }
 0x3cd   : > { %v2052_v45 = vpop.eup %2051 }
 0x3ce   : > { %v1202_v46 = vmul.f32 %v2052_v45, %v2044_v29  ;;  %v1205_v47 = vpop.permute.xlu0 %1204  ;;  %v2038_v45 = vld [vmem:[%s2562_s15 + $0x18] sm:$0xff]  }
 0x3cf   : > { %v1210_v48 = vsel %vm981_vm4, %v1205_v47, 0 }
 0x3d0   : > { %1927 = vmatpush3.bf16.msra.mxu0 %v1210_v48  ;;  %v1203_v50 = vpack.c.bf16 %v1202_v46, %v1202_v46  ;;  %v1821_v46 = vld [vmem:[%s2561_s14] ss:$0 sm:$0xff] }
 0x3d1   : > { %1938 = vmatprep.subr.bf16.mxu0 %v2149_v0 }
 0x3d3   : > { %1929 = vmatmul.mubr.msk.bf16.vlgmr.msra.gmra.mrb[16].mxu0 %vm965_vm3, %v1203_v50 }
 0x3d4   : > { %1939 = vmatpush3.bf16.msra.mxu0 %v1322_v51  ;;  %1940 = vmatprep.mubr.msk.bf16.mxu0 %vm2150_vm0, %v2149_v0 }
 0x3d5   : > { %v2054_v52 = vpop.eup %2053  ;;  %1952 = vmatprep.subr.bf16.mxu0 %v2149_v0 }
 0x3d6   : > { %v1314_v53 = vmul.f32 %v2054_v52, %v2046_v31  ;;  %v2033_v31 = vld [vmem:[%s2560_s13] sm:$0xff]  }
 0x3d8   : > { %v1315_v54 = vpack.c.bf16 %v1314_v53, %v1314_v53 }
 0x3db   : > { %1941 = vmatmul.mubr.msk.bf16.vlgmr.msra.gmra.mrb[20].mxu0 %vm965_vm3, %v1315_v54 }
 0x3dc   : > { %1956 = vmatprep.mubr.msk.bf16.mxu0 %vm2150_vm0, %v2149_v0  ;;  %1953 = vmatpush3.bf16.msra.mxu0 %v2033_v31 }
 0x3dd   : > { %1954 = vmatprep.subr.bf16.mxu0 %v2149_v0 }
 0x3e0   : > { %1955 = vmatpush3.bf16.msra.mxu0 %v2034_v32 }
 0x42b   : > { %v1019_v55 = vpop.f32.mrb[8].mxu0 }
 0x42c   : > { %v1906_v56 = vpop.f32.mrb[9].mxu0 }
 0x42d   : > { %v1022_v57 = vpop.f32.mrb[10].mxu0 }
 0x42e   : > { %v1907_v58 = vpop.f32.mrb[11].mxu0 }
 0x49d   : > { %v1134_v60 = vpop.f32.mrb[12].mxu0 }
 0x49e   : > { %1365 = vrot.lane.b32.xlu1 %v1134_v60, %s2154_s23  ;;  %v1918_v61 = vpop.f32.mrb[13].mxu0 }
 0x49f   : > { %v1137_v62 = vpop.f32.mrb[14].mxu0 }
 0x4a0   : > { %v1919_v63 = vpop.f32.mrb[15].mxu0 }
 0x4a6   : > { %v1246_v2 = vpop.f32.mrb[16].mxu0 }
 0x4a7   : > { %1369 = vrot.lane.b32.xlu0 %v1246_v2, %s2155_s1  ;;  %v1930_v3 = vpop.f32.mrb[17].mxu0 }
 0x4a8   : > { %v1249_v4 = vpop.f32.mrb[18].mxu0 }
 0x4a9   : > { %v1931_v5 = vpop.f32.mrb[19].mxu0 }
 0x4ae   : > { %v1358_v6 = vpop.f32.mrb[20].mxu0 }
 0x4af   : > { %1373 = vrot.lane.b32.xlu1 %v1358_v6, %s2156_s24  ;;  %v1942_v8 = vpop.f32.mrb[21].mxu0 }
 0x4b0   : > { %v1361_v9 = vpop.f32.mrb[22].mxu0  ;;  %v1831_v8 = vld [vmem:[#allocation2] ss:$0 sm:$0xff] }
 0x4b1   : > { %v1943_v10 = vpop.f32.mrb[23].mxu0 }
 0x4b2   : > { %v1832_v10 = vld [vmem:[#allocation4] ss:$0 sm:$0xff] }
 0x510   : > { %v1366_v11 = vpop.permute.xlu1 %1365 }
 0x511   : > { %v1376_v13 = vsel %vm916_vm2, %v1019_v55, %v1366_v11 }
 0x519   : > { %v1370_v12 = vpop.permute.xlu0 %1369 }
 0x51a   : > { %v1378_v14 = vsel %vm1377_vm5, %v1376_v13, %v1370_v12 }
 0x521   : > { %v1374_v15 = vpop.permute.xlu1 %1373 }
 0x522   : > { %v1380_v16 = vsel %vm1379_vm6, %v1378_v14, %v1374_v15 }
 0x523   : > { %v1381_v17 = vpack.c.bf16 %v1380_v16, %v1380_v16 }
 0x525   : > { %1949 = vmatmul.mubr.msk.bf16.vlgmr.msra.gmra.mrb[20].mxu1 %vm748_vm1, %v1381_v17 }
 0x526   : > { %1968 = vmatprep.mubr.msk.bf16.mxu1 %vm2150_vm0, %v2149_v0 }
 0x5f8   : > { %v1437_v19 = vpop.f32.mrb[20].mxu1 }
 0x5f9   : > { %v1438_v20 = vadd.f32 %v1815_v18, %v1437_v19  ;;  %v1950_v21 = vpop.f32.mrb[21].mxu1 }
 0x5fa   : > { %v1440_v22 = vpop.f32.mrb[22].mxu1 }
 0x5fb   : > { %v1951_v23 = vpop.f32.mrb[23].mxu1  ;;  %v1443_v24 = vadd.f32 %v1438_v20, %v2384_v7  ;;  %v2035_v7 = vld [vmem:[%s2562_s15] sm:$0xff]  }
 0x5fc   : > { %1961 = vmatpush3.bf16.msra.mxu1 %v2035_v7 }
 0x5fd   : > { %v1446_v25 = vsel %vm748_vm1, %v1443_v24, 0.0  ;;  %1962 = vmatprep.subr.bf16.mxu1 %v2149_v0 }
 0x5fe   : > { %1447 = vadd.xlane.f32.xlu0 %v1446_v25 }
 0x600   : > { %1963 = vmatpush3.bf16.msra.mxu1 %v2036_v33 }
 0x601   : > { %1964 = vmatprep.subr.bf16.mxu1 %v2149_v0 }
 0x604   : > { %1965 = vmatpush3.bf16.msra.mxu1 %v2037_v44 }
 0x605   : > { %1966 = vmatprep.subr.bf16.mxu1 %v2149_v0  ;;  %v1825_v0 = vld [vmem:[%s2563_s16] ss:$0 sm:$0xff] }
 0x608   : > { %1967 = vmatpush3.bf16.msra.mxu1 %v2038_v45 }
 0x68b   : > { %v1448_v26 = vpop.xlane.xlu0 %1447 }
 0x68c   : > { %v1450_v27 = vmul.f32 0.03125, %v1448_v26 }
 0x68e   : > { %v1451_v28 = vsub.f32 %v1443_v24, %v1450_v27 }
 0x690   : > { %v1452_v29 = vmul.f32 %v1451_v28, %v1451_v28 }
 0x692   : > { %v1453_v30 = vsel %vm748_vm1, %v1452_v29, 0.0 }
 0x693   : > { %1454 = vadd.xlane.f32.xlu1 %v1453_v30 }
 0x720   : > { %v1455_v34 = vpop.xlane.xlu1 %1454 }
 0x721   : > { %v1456_v35 = vmul.f32 0.03125, %v1455_v34 }
 0x723   : > { %v1457_v36 = vadd.f32 1e-05, %v1456_v35 }
 0x725   : > { %2055 = vrsqrt.f32 %v1457_v36 }
 0x72f   : > { %v2056_v37 = vpop.eup %2055 }
 0x730   : > { %v1459_v39 = vmul.f32 %v2056_v37, %v1451_v28 }
 0x732   : > { %v1466_v41 = vmul.f32 %v1819_v38, %v1459_v39 }
 0x734   : > { %v1473_v42 = vadd.f32 %v1820_v40, %v1466_v41 }
 0x736   : > { %v1474_v43 = vpack.c.bf16 %v1473_v42, %v1473_v42 }
 0x738   : > { %1957 = vmatmul.mubr.msk.bf16.vlgmr.msra.gmra.mrb[24].mxu0 %vm748_vm1, %v1474_v43 }
 0x80b   : > { %v1535_v47 = vpop.f32.mrb[24].mxu0 }
 0x80c   : > { %v1536_v48 = vadd.f32 %v1821_v46, %v1535_v47  ;;  %v1958_v49 = vpop.f32.mrb[25].mxu0 }
 0x80d   : > { %v1538_v50 = vpop.f32.mrb[26].mxu0 }
 0x80e   : > { %v1541_v51 = vmax.f32 %v1536_v48, 0.0  ;;  %v1959_v52 = vpop.f32.mrb[27].mxu0 }
 0x810   : > { %v1542_v53 = vpack.c.bf16 %v1541_v51, %v1541_v51 }
 0x812   : > { %1969 = vmatmul.mubr.msk.bf16.vlgmr.msra.gmra.mrb[24].mxu1 %vm1582_vm7, %v1542_v53 }
 0x8e5   : > { %v1620_v54 = vpop.f32.mrb[24].mxu1 }
 0x8e6   : > { %v1621_v55 = vadd.f32 %v1825_v0, %v1620_v54  ;;  %v1970_v56 = vpop.f32.mrb[25].mxu1 }
 0x8e7   : > { %v1623_v57 = vpop.f32.mrb[26].mxu1 }
 0x8e8   : > { %v1971_v58 = vpop.f32.mrb[27].mxu1  ;;  %v1626_v59 = vadd.f32 %v1621_v55, %v1473_v42 }
 0x8ea   : > { %v1629_v60 = vsel %vm748_vm1, %v1626_v59, 0.0 }
 0x8eb   : > { %1630 = vadd.xlane.f32.xlu0 %v1629_v60 }
 0x978   : > { %v1631_v61 = vpop.xlane.xlu0 %1630 }
 0x979   : > { %v1632_v62 = vmul.f32 0.03125, %v1631_v61 }
 0x97b   : > { %v1633_v63 = vsub.f32 %v1626_v59, %v1632_v62 }
 0x97d   : > { %v1634_v1 = vmul.f32 %v1633_v63, %v1633_v63 }
 0x97f   : > { %v1635_v2 = vsel %vm748_vm1, %v1634_v1, 0.0 }
 0x980   : > { %1636 = vadd.xlane.f32.xlu0 %v1635_v2 }
 0xa0d   : > { %v1637_v3 = vpop.xlane.xlu0 %1636 }
 0xa0e   : > { %v1638_v4 = vmul.f32 0.03125, %v1637_v3 }
 0xa10   : > { %v1639_v5 = vadd.f32 1e-05, %v1638_v4 }
 0xa12   : > { %2057 = vrsqrt.f32 %v1639_v5 }
 0xa1c   : > { %v2058_v6 = vpop.eup %2057 }
 0xa1d   : > { %v1641_v9 = vmul.f32 %v2058_v6, %v1633_v63 }
 0xa1f   : > { %v1648_v11 = vmul.f32 %v1831_v8, %v1641_v9 }
 0xa21   : > { %v1655_v12 = vadd.f32 %v1832_v10, %v1648_v11 }
 0xa23   : > { %1656 = vst.msk [vmem:[%s702_s21] sm:$0xff] %vm748_vm1, %v1655_v12 }
 0xa24 PF: > { %s2593_s23 = sld [smem:[#allocation9_spill]]  ;;  %s2594_s0 = sld [smem:[#allocation8_spill]] }
 0xa25   : > { %s2595_s30 = sld [smem:[#allocation10_spill]] }
 0xa2a   : > { %s31_s20 = sadd.s32 1, %s2593_s23  }
 0xa2b   : > { %p28_p6 = scmp.ge.s32.totalorder %s31_s20, 4  }
 0xa2d   :  { %30 = sbr.rel (!%p28_p6) target bundleno = 10 (0xa), region = 141 }
 0xa34   :  { %1682 = vsyncpa [#allocation3], 1 }
 0xa35   :  { %1684 = vsyncpa [#allocation3 + $0x1], 1 }
 0xa36   :  { %1685 = vsyncpa [#allocation5], 1 }

// kernel: decoder_forward.9
= control target key start
LH: loop header
LB: loop body
LE: loop exit
PB: predicated region body
PF: predicated region fallthrough
CT: control target
= control target key end

     0   :  { %12 = vsyncpa [#allocation3], 0  ;;  %s1251_s0 = inlined_call_operand.vmem [shape: f32[2,8,32], index: 0, kind: input, shape index: {}]   ;;  %s1252_s1 = inlined_call_operand.vmem [shape: f32[2,10,32], index: 1, kind: input, shape index: {}]   ;;  %s1253_s2 = inlined_call_operand.vmem [shape: f32[2,8,10], index: 2, kind: input, shape index: {}]   ;;  %s1254_s3 = inlined_call_operand.vmem [shape: bf16[32,32], index: 3, kind: input, shape index: {}]   ;;  %s1255_s4 = inlined_call_operand.vmem [shape: f32[1,32], index: 4, kind: input, shape index: {}]   ;;  %s1256_s5 = inlined_call_operand.vmem [shape: bf16[32,32], index: 5, kind: input, shape index: {}]   ;;  %s1257_s6 = inlined_call_operand.vmem [shape: f32[1,32], index: 6, kind: input, shape index: {}]   ;;  %s1258_s7 = inlined_call_operand.hbm [shape: f32[2,4,8,10], index: 7, kind: output, shape index: {}]  }
   0x1   :  { %14 = vsyncpa [#allocation3 + $0x1], 0  ;;  %s1076_s24 = smov 0   ;;  %s1078_s25 = smov 0  }
   0x2   :  { %s1080_s26 = smov 0   ;;  %s1082_s27 = smov 0  }
   0x3 LB: > { %s1097_s28 = sadd.s32 4294967295, %s1026_s27   ;;  %s813_s29 = sadd.s32 4294967294, %s1026_s27   ;;  %s1026_s27 = sphi %s1082_s27, %s1264_s27   ;;  %s1022_s26 = sphi %s1080_s26, %s1263_s26   ;;  %s1018_s25 = sphi %s1078_s25, %s1262_s25   ;;  %s1014_s24 = sphi %s1076_s24, %s1261_s24  }
   0x4   : > { %s1101_s30 = sadd.s32 1, %s1026_s27   ;;  %s189_s8 = sadd.s32 1, %s1022_s26 }
   0x5   : > { %s186_s9 = ssub.s32 %s1026_s27, %s1101_s30  ;;  %p199_p0 = scmp.ne.s32.totalorder %s1022_s26, %s1018_s25 }
   0x6   : > { %p187_p1 = scmp.eq.s32.totalorder %s186_s9, 0  ;;  %p200_p2 = scmp.eq.s32.totalorder %s1097_s28, 1 }
   0x7   : > { %p205_p3 = scmp.ne.s32.totalorder %s1018_s25, %s1014_s24  ;;  %p206_p4 = scmp.eq.s32.totalorder %s813_s29, 1 }
   0x8   : > { %s1112_s10 = scalar_select %p187_p1, %s1022_s26, %s189_s8  }
   0x9   : > { %p1114_p5 = por %p200_p2, %p199_p0  ;;  %p1118_p6 = por %p206_p4, %p205_p3 }
   0xa   : > { %p816_p7 = scmp.ge.s32.totalorder %s1026_s27, 1  ;;  %p258_p8 = scmp.lt.s32.totalorder %s1026_s27, 3 }
   0xc   : > { %p259_p9 = pnand %p816_p7, %p258_p8 }
   0xd   : > { %v944_v0 = vld [vmem:[%s1256_s5] sm:$0xff] (!%p259_p9)   ;;  %v1028_v1 = vmov (!%p259_p9), 0.0   ;;  %v945_v2 = vld [vmem:[%s1256_s5 + $0x8] sm:$0xff] (!%p259_p9)   ;;  %vm1029_vm0 = vmmov (!%p259_p9), 0   ;;  %p298_p10 = scmp.lt.s32.totalorder (!%p259_p9), %s1097_s28, 1  ;;  %vm340_vm1 = vcmask (!%p259_p9), 261120  }
   0xe   : > { %262 = sbr.rel (%p259_p9) target bundleno = 922 (0x39a), region = 48  ;;  %866 = vmatprep.subr.bf16.mxu1 (!%p259_p9), %v1028_v1  ;;  %858 = vmatprep.subr.bf16.mxu0 (!%p259_p9), %v1028_v1  ;;  %v946_v3 = vld [vmem:[%s1254_s3] sm:$0xff] (!%p259_p9)   ;;  %v947_v4 = vld [vmem:[%s1254_s3 + $0x8] sm:$0xff] (!%p259_p9)   ;;  %vm454_vm2 = vcmask (!%p259_p9), 64512   ;;  %s1030_s21 = smov (!%p259_p9), 112   ;;  %vm503_vm3 = vcmask (!%p259_p9), 80896  }
   0xf   : > { %867 = vmatpush3.bf16.msra.mxu1 (!%p259_p9), %v944_v0  ;;  %870 = vmatprep.mubr.msk.bf16.mxu1 (!%p259_p9), %vm1029_vm0, %v1028_v1  ;;  %v826_v10 = vld [vmem:[%s1257_s6] ss:$0 sm:$0xff] (!%p259_p9)  ;;  %s1032_s29 = smov (!%p259_p9), 104  }
  0x10   : > { %868 = vmatprep.subr.bf16.mxu1 (!%p259_p9), %v1028_v1  ;;  %862 = vmatprep.mubr.msk.bf16.mxu0 (!%p259_p9), %vm1029_vm0, %v1028_v1  ;;  %v822_v12 = vld [vmem:[%s1255_s4] ss:$0 sm:$0xff] (!%p259_p9) }
  0x11   : > { %859 = vmatpush3.bf16.msra.mxu0 (!%p259_p9), %v946_v3 }
  0x12   : > { %860 = vmatprep.subr.bf16.mxu0 (!%p259_p9), %v1028_v1 }
  0x13   : > { %869 = vmatpush3.bf16.msra.mxu1 (!%p259_p9), %v945_v2 }
  0x14   : > { %880 = vmatprep.subr.bf16.mxu1 (!%p259_p9), %v1028_v1 }
  0x15   : > { %s1142_s19 = scalar_select %p298_p10, %s1097_s28, 1  ;;  %861 = vmatpush3.bf16.msra.mxu0 %v947_v4 }
  0x16   : > { %874 = vmatprep.subr.bf16.mxu0 %v1028_v1 }
  0x17   : > { %s842_s22 = sshll.u32 %s1142_s19, 4  ;;  %s818_s23 = sshll.u32 %s1142_s19, 3 }
  0x18   : > { %s306_s9 = scalar_lea.vmem %s1252_s1, %s842_s22  ;;  %s301_s15 = scalar_lea.vmem %s1251_s0, %s818_s23 }
  0x19   : > { %v314_v5 = vld [vmem:[%s306_s9] sm:$0xff]  ;;  %v315_v6 = vld [vmem:[%s306_s9 + $0x8] sm:$0x3]  ;;  %s1031_s22 = smov 120   ;;  %s310_s13 = scalar_lea.vmem %s1253_s2, %s818_s23 }
  0x1a   : > { %v312_v7 = vld [vmem:[%s301_s15] sm:$0xff]  ;;  %v316_v8 = vpack.c.bf16 %v315_v6, %v314_v5  ;;  %s295_s19 = sand.u32 1, %s1018_s25   ;;  %s843_s15 = sshll.u32 %s1097_s28, 9 }
  0x1b   : > { %v313_v9 = vpack.c.bf16 %v312_v7, %v312_v7  ;;  %v453_v36 = vld [vmem:[%s310_s13] sm:$0xff]  ;;  %s817_s23 = sshll.u32 %s295_s19, 5  ;;  %s1205_s20 = scalar_lea.hbm %s1258_s7, %s843_s15 }
  0x1c   : > { %871 = vmatmul.mubr.msk.bf16.vlgmr.msra.gmra.mrb[0].mxu1 %vm340_vm1, %v316_v8  ;;  %s297_s14 = scalar_lea.vmem [#allocation2], %s817_s23  ;;  %s1033_s28 = smov [#allocation2]  }
  0x1d   : > { %863 = vmatmul.mubr.msk.bf16.vlgmr.msra.gmra.mrb[0].mxu0 %vm340_vm1, %v313_v9  ;;  %882 = vmatprep.mubr.msk.bf16.mxu1 %vm1029_vm0, %v1028_v1  ;;  %s727_s16 = sshll.u32 %s297_s14, 4  ;;  %s1207_s16 = int_to_ptr.vmem [resolvable:$true] %s727_s16 }
  0x1e   : > { %876 = vmatprep.mubr.msk.bf16.mxu0 %vm1029_vm0, %v1028_v1 }
  0xef   : > { %v445_v11 = vpop.f32.mrb[0].mxu1 }
  0xf0   : > { %v378_v13 = vpop.f32.mrb[0].mxu0  ;;  %v872_v14 = vpop.f32.mrb[1].mxu1  ;;  %v446_v18 = vadd.f32 %v826_v10, %v445_v11 }
  0xf1   : > { %v864_v15 = vpop.f32.mrb[1].mxu0  ;;  %v448_v16 = vpop.f32.mrb[2].mxu1  ;;  %v379_v21 = vadd.f32 %v822_v12, %v378_v13 }
  0xf2   : > { %v381_v17 = vpop.f32.mrb[2].mxu0  ;;  %v449_v19 = vadd.f32 %v826_v10, %v448_v16  ;;  %v873_v20 = vpop.f32.mrb[3].mxu1 }
  0xf3   : > { %v865_v22 = vpop.f32.mrb[3].mxu0  ;;  %v384_v24 = vpack.c.bf16 %v379_v21, %v379_v21 }
  0xf4   : > { %v452_v23 = vpack.c.bf16 %v449_v19, %v446_v18 }
  0xf6   : > { %585 = vrot.lane.b32.xlu1 %v452_v23, %s1030_s21  ;;  %520 = vrot.lane.b32.xlu0 %v452_v23, %s1031_s22  ;;  %v459_v25 = vsel %vm454_vm2, %v452_v23, 0 }
  0xf7   : > { %875 = vmatpush3.bf16.xpose.msra.mxu0 %v459_v25 }
  0xf8   : > { %886 = vmatprep.subr.bf16.mxu0 %v1028_v1 }
  0xfa   : > { %650 = vrot.lane.b32.xlu1 %v452_v23, %s1032_s29  ;;  %517 = vrot.lane.b32.xlu0 %v384_v24, %s1031_s22  ;;  %s964_s22 = scalar_lea.vmem %s1207_s16, 512 }
  0xfb   : > { %p965_p11 = scmp.ne.s32.totalorder %s1207_s16, %s964_s22 }
  0xfd   : > { %p966_p12 = pnand %p965_p11, %p1114_p5 }
  0xfe   : > { %583 = vrot.lane.b32.xlu0 %v384_v24, %s1030_s21  ;;  %877 = vmatmul.mubr.msk.bf16.vlgmr.msra.gmra.mrb[4].mxu0 %vm454_vm2, %v384_v24  ;;  %s1210_s21 = scalar_lea.sflag [#allocation3], %s295_s19 }
  0xff   : > { %648 = vrot.lane.b32.xlu1 %v384_v24, %s1032_s29  ;;  %888 = vmatprep.mubr.msk.bf16.mxu0 %vm1029_vm0, %v1028_v1  ;;  %p967_p13 = pneg %p966_p12  ;;  %s968_s29 = sshll.u32 %s1033_s28, 4  ;;  %s969_s29 = int_to_ptr.vmem [resolvable:$false] %s968_s29 }
 0x100   : > { %s970_s8 = scalar_lea.vmem %s969_s29, 1024  ;;  %p971_p0 = scmp.lt.s32.totalorder %s1207_s16, %s969_s29 }
 0x101   : > { %p972_p1 = scmp.lt.s32.totalorder %s970_s8, %s964_s22 }
 0x103   : > { %p973_p2 = por %p972_p1, %p971_p0 }
 0x105   : > { %p974_p3 = pnand %p973_p2, %p967_p13 }
 0x168   : > { %v586_v26 = vpop.permute.xlu1 %585  ;;  %v521_v27 = vpop.permute.xlu0 %520 }
 0x169   : > { %v591_v28 = vsel %vm454_vm2, %v586_v26, 0  ;;  %v526_v29 = vsel %vm454_vm2, %v521_v27, 0 }
 0x16a   : > { %881 = vmatpush3.bf16.xpose.msra.mxu1 %v526_v29  ;;  %887 = vmatpush3.bf16.xpose.msra.mxu0 %v591_v28 }
 0x16b   : > { %892 = vmatprep.subr.bf16.mxu1 %v1028_v1 }
 0x16c   : > { %v518_v30 = vpop.permute.xlu0 %517  ;;  %v651_v31 = vpop.permute.xlu1 %650 }
 0x16d   : > { %v656_v33 = vsel %vm454_vm2, %v651_v31, 0 }
 0x170   : > { %v584_v32 = vpop.permute.xlu0 %583 }
 0x171   : > { %883 = vmatmul.mubr.msk.bf16.vlgmr.msra.gmra.mrb[4].mxu1 %vm454_vm2, %v518_v30  ;;  %889 = vmatmul.mubr.msk.bf16.vlgmr.msra.gmra.mrb[8].mxu0 %vm454_vm2, %v584_v32  ;;  %v649_v34 = vpop.permute.xlu1 %648 }
 0x172   : > { %893 = vmatpush3.bf16.xpose.msra.mxu1 %v656_v33  ;;  %894 = vmatprep.mubr.msk.bf16.mxu1 %vm1029_vm0, %v1028_v1 }
 0x179   : > { %895 = vmatmul.mubr.msk.bf16.vlgmr.msra.gmra.mrb[8].mxu1 %vm454_vm2, %v649_v34 }
 0x1d1   : > { %v495_v35 = vpop.f32.mrb[4].mxu0 }
 0x1d2   : > { %v501_v37 = vmul.f32 0.35355338, %v495_v35  ;;  %v878_v38 = vpop.f32.mrb[5].mxu0 }
 0x1d3   : > { %v498_v39 = vpop.f32.mrb[6].mxu0 }
 0x1d4   : > { %v879_v40 = vpop.f32.mrb[7].mxu0  ;;  %v502_v41 = vadd.f32 %v501_v37, %v453_v36 }
 0x1d6   : > { %v504_v42 = vsel %vm503_vm3, %v502_v41, -inf }
 0x1d7   : > { %505 = vmax.xlane.f32.xlu0 %v504_v42 }
 0x244   : > { %v562_v43 = vpop.f32.mrb[4].mxu1  ;;  %v627_v44 = vpop.f32.mrb[8].mxu0 }
 0x245   : > { %v568_v45 = vmul.f32 0.35355338, %v562_v43  ;;  %v633_v46 = vmul.f32 0.35355338, %v627_v44  ;;  %v884_v47 = vpop.f32.mrb[5].mxu1  ;;  %v890_v48 = vpop.f32.mrb[9].mxu0 }
 0x246   : > { %v565_v49 = vpop.f32.mrb[6].mxu1  ;;  %v630_v50 = vpop.f32.mrb[10].mxu0 }
 0x247   : > { %v885_v51 = vpop.f32.mrb[7].mxu1  ;;  %v891_v52 = vpop.f32.mrb[11].mxu0  ;;  %v569_v53 = vadd.f32 %v568_v45, %v453_v36  ;;  %v634_v54 = vadd.f32 %v633_v46, %v453_v36 }
 0x249   : > { %v570_v55 = vsel %vm503_vm3, %v569_v53, -inf  ;;  %v635_v56 = vsel %vm503_vm3, %v634_v54, -inf }
 0x24a   : > { %571 = vmax.xlane.f32.xlu1 %v570_v55  ;;  %636 = vmax.xlane.f32.xlu0 %v635_v56 }
 0x24c   : > { %v692_v57 = vpop.f32.mrb[8].mxu1 }
 0x24d   : > { %v698_v58 = vmul.f32 0.35355338, %v692_v57  ;;  %v896_v59 = vpop.f32.mrb[9].mxu1 }
 0x24e   : > { %v695_v60 = vpop.f32.mrb[10].mxu1 }
 0x24f   : > { %v897_v61 = vpop.f32.mrb[11].mxu1  ;;  %v699_v62 = vadd.f32 %v698_v58, %v453_v36 }
 0x251   : > { %v700_v63 = vsel %vm503_vm3, %v699_v62, -inf }
 0x252   : > { %701 = vmax.xlane.f32.xlu0 %v700_v63 }
 0x264   : > { %v506_v0 = vpop.xlane.xlu0 %505 }
 0x265   : > { %v507_v1 = vsub.f32 %v502_v41, %v506_v0 }
 0x267   : > { %v508_v2 = vmul.f32 1.442695, %v507_v1 }
 0x269   : > { %948 = vpow2.f32 %v508_v2 }
 0x273   : > { %v949_v3 = vpop.eup %948 }
 0x274   : > { %v510_v4 = vsel %vm503_vm3, %v949_v3, 0.0 }
 0x275   : > { %511 = vadd.xlane.f32.xlu1 %v510_v4 }
 0x2d7   : > { %v572_v5 = vpop.xlane.xlu1 %571  ;;  %v637_v6 = vpop.xlane.xlu0 %636 }
 0x2d8   : > { %v573_v7 = vsub.f32 %v569_v53, %v572_v5  ;;  %v638_v8 = vsub.f32 %v634_v54, %v637_v6 }
 0x2da   : > { %v574_v9 = vmul.f32 1.442695, %v573_v7  ;;  %v639_v10 = vmul.f32 1.442695, %v638_v8 }
 0x2dc   : > { %950 = vpow2.f32 %v574_v9 }
 0x2dd   : > { %952 = vpow2.f32 %v639_v10 }
 0x2df   : > { %v702_v11 = vpop.xlane.xlu0 %701 }
 0x2e0   : > { %v703_v12 = vsub.f32 %v699_v62, %v702_v11 }
 0x2e2   : > { %v704_v13 = vmul.f32 1.442695, %v703_v12 }
 0x2e4   : > { %954 = vpow2.f32 %v704_v13 }
 0x2e6   : > { %v951_v14 = vpop.eup %950 }
 0x2e7   : > { %v953_v15 = vpop.eup %952  ;;  %v576_v16 = vsel %vm503_vm3, %v951_v14, 0.0 }
 0x2e8   : > { %577 = vadd.xlane.f32.xlu0 %v576_v16  ;;  %v641_v17 = vsel %vm503_vm3, %v953_v15, 0.0 }
 0x2e9   : > { %642 = vadd.xlane.f32.xlu1 %v641_v17 }
 0x2ee   : > { %v955_v18 = vpop.eup %954 }
 0x2ef   : > { %v706_v19 = vsel %vm503_vm3, %v955_v18, 0.0 }
 0x2f0   : > { %707 = vadd.xlane.f32.xlu0 %v706_v19 }
 0x302   : > { %v512_v20 = vpop.xlane.xlu1 %511 }
 0x303   : > { %956 = vrcp.f32 %v512_v20 }
 0x30d   : > { %v957_v21 = vpop.eup %956 }
 0x30e   : > { %v514_v22 = vmul.f32 %v957_v21, %v949_v3 }
 0x310   : > { %515 = vst.msk [vmem:[%s297_s14] sm:$0xff] %vm503_vm3, %v514_v22 }
 0x375   : > { %v578_v23 = vpop.xlane.xlu0 %577 }
 0x376   : > { %v643_v24 = vpop.xlane.xlu1 %642  ;;  %958 = vrcp.f32 %v578_v23 }
 0x377   : > { %960 = vrcp.f32 %v643_v24 }
 0x37d   : > { %v708_v25 = vpop.xlane.xlu0 %707 }
 0x37e   : > { %962 = vrcp.f32 %v708_v25 }
 0x380   : > { %v959_v26 = vpop.eup %958 }
 0x381   : > { %v961_v27 = vpop.eup %960  ;;  %v580_v28 = vmul.f32 %v959_v26, %v951_v14 }
 0x382   : > { %v645_v29 = vmul.f32 %v961_v27, %v953_v15 }
 0x383   : > { %832 = vst.msk [vmem:[%s297_s14 + $0x8] sm:$0xff] %vm503_vm3, %v580_v28 }
 0x384   : > { %834 = vst.msk [vmem:[%s297_s14 + $0x10] sm:$0xff] %vm503_vm3, %v645_v29 }
 0x388   : > { %v963_v30 = vpop.eup %962 }
 0x389   : > { %v710_v31 = vmul.f32 %v963_v30, %v955_v18 }
 0x38b   : > { %836 = vst.msk [vmem:[%s297_s14 + $0x18] sm:$0xff] %vm503_vm3, %v710_v31 }
 0x38c   : > { %977 = shalt.err (!%p974_p3)
}
 0x38d   : > { %s978_s9 = scalar_lea.hbm %s1205_s20, 512  ;;  %s982_s23 = scalar_lea.hbm %s1258_s7, 1024 }
 0x38e   : > { %p979_p4 = scmp.ne.s32.totalorder %s1205_s20, %s978_s9  ;;  %p983_p9 = scmp.lt.u32.totalorder %s1205_s20, %s1258_s7 }
 0x38f   : > { %p984_p10 = scmp.lt.u32.totalorder %s982_s23, %s978_s9  ;;  %p986_p12 = scmp.lt.u32.totalorder %s978_s9, %s1205_s20 }
 0x390   : > { %p980_p7 = pnand %p979_p4, %p1114_p5 }
 0x391   : > { %p985_p11 = por %p984_p10, %p983_p9 }
 0x392   : > { %p981_p8 = pneg %p980_p7 }
 0x393   : > { %p987_p13 = por %p986_p12, %p985_p11 }
 0x395   : > { %p988_p0 = pnand %p987_p13, %p981_p8 }
 0x397   : > { %991 = shalt.err (!%p988_p0)
}
 0x398   : > { %s1034_s17 = smov 128   ;;  %s1035_s18 = smov 8  }
 0x399   : > { %898 = dma.vmem_to_hbm [thread:$0]  (%p1114_p5), %s1207_s16, 512, %s1205_s20, %s1210_s21, %s1034_s17, %s1034_s17, %s1035_s18  }
 0x39a PF: > { %p904_p1 = scmp.ge.s32.totalorder %s1026_s27, 2  ;;  %s742_s22 = sand.u32 1, %s1014_s24  }
 0x39b   : > { %s743_s28 = scalar_lea.sflag [#allocation3], %s742_s22 }
 0x39c   : > { %p901_p2 = pnand %p904_p1, %p1118_p6 }
 0x39e   : > { %1009 = dma.done.wait (!%p901_p2), %s743_s28, 512  }
 0x39f   : > { %1011 = vsyncadd (!%p901_p2), %s743_s28, 4294966784  ;;  %p17_p3 = scmp.ge.s32.totalorder %s1101_s30, 4   ;;  %s1261_s24 = smov %s1018_s25 }
 0x3a0   : > { %s1262_s25 = smov %s1022_s26  ;;  %s1263_s26 = smov %s1112_s10 }
 0x3a1   : > { %s1264_s27 = smov %s1101_s30  ;;  %19 = sbr.rel (!%p17_p3) target bundleno = 3 (0x3), region = 92 }
 0x3a8   :  { %748 = vsyncpa [#allocation3], 1 }
 0x3a9   :  { %750 = vsyncpa [#allocation3 + $0x1], 1 }

</bundles_post_ra>
